<compile_context>
chip_gen: v6e
topology: v6e:2x2x1
jax: 0.10.0
libtpu: 0.0.40
codegen_flags: <defaults>
</compile_context>

<pallas_src>
import functools

import jax
import jax.numpy as jnp
from jax.experimental import pallas as pl
from jax.experimental.pallas import tpu as pltpu


def _round_up(n, m):
    return ((n + m - 1) // m) * m


def _fcn_kernel(x_ref, w1_ref, b1_ref, w2_ref, b2_ref, w3_ref, b3_ref,
                w4_ref, b4_ref, labels_ref,
                feat_ref, logit_ref, loss_ref, *, num_labels):
    """One batch tile of the fused Fcn forward pass.

    Matmuls run on the MXU with bf16 operands / f32 accumulation; bias,
    ReLU, sigmoid and the cross-entropy terms stay in f32 (VPU/EUP).
    The per-row CE loss is written out; the batch mean is a trivial
    reduction done by the wrapper so the batch grid axis stays parallel.
    """
    x = x_ref[...]                                             # (TM, Din) bf16

    # feature_layer: Linear(Din,512)+ReLU, Linear(512,256)+ReLU,
    #                Linear(256,F)+ReLU   (F zero-padded to F_pad lanes)
    h1 = jnp.dot(x, w1_ref[...], preferred_element_type=jnp.float32)
    h1 = jnp.maximum(h1 + b1_ref[...], 0.0)
    h2 = jnp.dot(h1.astype(jnp.bfloat16), w2_ref[...],
                 preferred_element_type=jnp.float32)
    h2 = jnp.maximum(h2 + b2_ref[...], 0.0)
    feat = jnp.dot(h2.astype(jnp.bfloat16), w3_ref[...],
                   preferred_element_type=jnp.float32)
    feat = jnp.maximum(feat + b3_ref[...], 0.0)                # (TM, F_pad)
    feat_ref[...] = feat

    # prediction_layer: Linear(F, L) + Sigmoid   (L zero-padded to L_pad)
    z = jnp.dot(feat.astype(jnp.bfloat16), w4_ref[...],
                preferred_element_type=jnp.float32) + b4_ref[...]
    logit = jax.nn.sigmoid(z)                                  # (TM, L_pad)
    logit_ref[...] = logit

    # CrossEntropyLoss(logit, labels) per row (the module feeds the sigmoid
    # output into nn.CrossEntropyLoss):  logsumexp(logit_i) - logit_i[y_i]
    tm, l_pad = logit.shape
    classes = jax.lax.broadcasted_iota(jnp.int32, (tm, l_pad), 1)
    masked = jnp.where(classes < num_labels, logit, -jnp.inf)  # ignore pad lanes
    m = jnp.max(masked, axis=-1, keepdims=True)
    lse = jnp.log(jnp.sum(jnp.exp(masked - m), axis=-1, keepdims=True)) + m
    onehot = (classes == labels_ref[...]).astype(jnp.float32)
    picked = jnp.sum(logit * onehot, axis=-1, keepdims=True)
    loss_ref[...] = lse - picked                               # (TM, 1)


def _pick_batch_tile(batch):
    # Prefer 256 (v6e/v7x 2x256^2 MXU), then 128 (v5e 4x128^2), then smaller.
    for tm in (256, 128, 64, 32, 16, 8):
        if batch % tm == 0:
            return tm
    return batch  # tiny / irregular batch: one tile


def fcn_forward(x, labels, params):
    """x: (B, input_dim) f32, labels: (B,) int, params from init_params."""
    B, d_in = x.shape
    F = params["w3"].shape[1]
    L = params["w4"].shape[1]
    F_pad = _round_up(F, 128)
    L_pad = _round_up(L, 128)

    TM = _pick_batch_tile(B)
    grid = (B // TM,)

    # bf16 MXU operands (f32 accumulation in-kernel); zero-pad the narrow
    # output dims to 128 lanes so feat/logit writebacks are unmasked.
    x_bf = x.astype(jnp.bfloat16)
    w1 = params["w1"].astype(jnp.bfloat16)
    w2 = params["w2"].astype(jnp.bfloat16)
    w3 = jnp.pad(params["w3"], ((0, 0), (0, F_pad - F))).astype(jnp.bfloat16)
    b3 = jnp.pad(params["b3"], ((0, 0), (0, F_pad - F)))
    w4 = jnp.pad(params["w4"],
                 ((0, F_pad - F), (0, L_pad - L))).astype(jnp.bfloat16)
    b4 = jnp.pad(params["b4"], ((0, 0), (0, L_pad - L)))
    labels2d = labels.astype(jnp.int32).reshape(B, 1)

    def tiled(shape):            # batch-tiled operand / output
        return pl.BlockSpec(shape, lambda i: (i, 0))

    def resident(shape):         # weights / biases: same block every step
        return pl.BlockSpec(shape, lambda i: (0, 0))

    flops = 2 * B * (d_in * 512 + 512 * 256 + 256 * F_pad + F_pad * L_pad)
    bytes_accessed = (
        x_bf.size * 2 + labels2d.size * 4
        + (w1.size + w2.size + w3.size + w4.size) * 2
        + (params["b1"].size + params["b2"].size + b3.size + b4.size) * 4
        + B * (F_pad + L_pad + 1) * 4)

    feat_p, logit_p, loss_rows = pl.pallas_call(
        functools.partial(_fcn_kernel, num_labels=L),
        out_shape=(
            jax.ShapeDtypeStruct((B, F_pad), jnp.float32),
            jax.ShapeDtypeStruct((B, L_pad), jnp.float32),
            jax.ShapeDtypeStruct((B, 1), jnp.float32),
        ),
        grid=grid,
        in_specs=[
            tiled((TM, d_in)),
            resident((d_in, 512)), resident((1, 512)),
            resident((512, 256)), resident((1, 256)),
            resident((256, F_pad)), resident((1, F_pad)),
            resident((F_pad, L_pad)), resident((1, L_pad)),
            tiled((TM, 1)),
        ],
        out_specs=(
            tiled((TM, F_pad)),
            tiled((TM, L_pad)),
            tiled((TM, 1)),
        ),
        compiler_params=pltpu.CompilerParams(
            dimension_semantics=("parallel",)),
        cost_estimate=pl.CostEstimate(
            flops=int(flops),
            transcendentals=int(B * (2 * L_pad + 1)),
            bytes_accessed=int(bytes_accessed)),
    )(x_bf, w1, params["b1"], w2, params["b2"], w3, b3, w4, b4, labels2d)

    feat = feat_p[:, :F]
    logit = logit_p[:, :L]
    loss = jnp.mean(loss_rows)
    return feat, logit, loss


def init_params(key, input_dim, feature_dim, num_labels):
    """Deterministic init matching nn.Linear default (uniform +-1/sqrt(fan_in)).

    Weights stored as (in_features, out_features) f32; biases as
    (1, out_features) so they broadcast over the batch inside the kernel.
    """
    dims = [(input_dim, 512), (512, 256), (256, feature_dim),
            (feature_dim, num_labels)]
    params = {}
    keys = jax.random.split(key, 2 * len(dims))
    for i, (fan_in, fan_out) in enumerate(dims):
        bound = 1.0 / (fan_in ** 0.5)
        params[f"w{i+1}"] = jax.random.uniform(
            keys[2 * i], (fan_in, fan_out), jnp.float32, -bound, bound)
        params[f"b{i+1}"] = jax.random.uniform(
            keys[2 * i + 1], (1, fan_out), jnp.float32, -bound, bound)
    return params


if __name__ == "__main__":
    # Small, module-consistent shapes; batch big enough to exercise the grid.
    batch = 512          # TM=256 -> grid=(2,)
    input_dim = 32
    feature_dim = 64
    num_labels = 8

    key = jax.random.PRNGKey(0)
    k_param, k_x, k_lab = jax.random.split(key, 3)

    params = init_params(k_param, input_dim, feature_dim, num_labels)
    x = jax.random.normal(k_x, (batch, input_dim), jnp.float32)
    labels = jax.random.randint(k_lab, (batch,), 0, num_labels, jnp.int32)

    feat, logit, loss = jax.jit(functools.partial(fcn_forward, params=params))(
        x, labels)
    jax.block_until_ready((feat, logit, loss))

    assert feat.shape == (batch, feature_dim)
    assert logit.shape == (batch, num_labels)
    assert loss.shape == ()
    assert bool(jnp.isfinite(loss))

    print("KERNEL_OK")
</pallas_src>

<mosaic_0001>
module attributes {stable_mosaic.version = 11 : i64} {
  func.func @_fcn_kernel(%arg0: i32, %arg1: memref<256x32xbf16, #tpu.memory_space<vmem>>, %arg2: memref<32x512xbf16, #tpu.memory_space<vmem>>, %arg3: memref<1x512xf32, #tpu.memory_space<vmem>>, %arg4: memref<512x256xbf16, #tpu.memory_space<vmem>>, %arg5: memref<1x256xf32, #tpu.memory_space<vmem>>, %arg6: memref<256x128xbf16, #tpu.memory_space<vmem>>, %arg7: memref<1x128xf32, #tpu.memory_space<vmem>>, %arg8: memref<128x128xbf16, #tpu.memory_space<vmem>>, %arg9: memref<1x128xf32, #tpu.memory_space<vmem>>, %arg10: memref<256x1xi32, #tpu.memory_space<vmem>>, %arg11: memref<256x128xf32, #tpu.memory_space<vmem>>, %arg12: memref<256x128xf32, #tpu.memory_space<vmem>>, %arg13: memref<256x1xf32, #tpu.memory_space<vmem>>) attributes {dimension_semantics = [#tpu.dimension_semantics<parallel>], iteration_bounds = array<i64: 2>, scalar_prefetch = 0 : i64, scratch_operands = 0 : i64, tpu.core_type = #tpu.core_type<tc>, window_params = [{transform_indices = @transform_0, window_bounds = array<i64: 256, 32>}, {pipeline_mode = #tpu.pipeline_mode<synchronous>, transform_indices = @transform_1, window_bounds = array<i64: 32, 512>}, {pipeline_mode = #tpu.pipeline_mode<synchronous>, transform_indices = @transform_2, window_bounds = array<i64: 1, 512>}, {pipeline_mode = #tpu.pipeline_mode<synchronous>, transform_indices = @transform_3, window_bounds = array<i64: 512, 256>}, {pipeline_mode = #tpu.pipeline_mode<synchronous>, transform_indices = @transform_4, window_bounds = array<i64: 1, 256>}, {pipeline_mode = #tpu.pipeline_mode<synchronous>, transform_indices = @transform_5, window_bounds = array<i64: 256, 128>}, {pipeline_mode = #tpu.pipeline_mode<synchronous>, transform_indices = @transform_6, window_bounds = array<i64: 1, 128>}, {pipeline_mode = #tpu.pipeline_mode<synchronous>, transform_indices = @transform_7, window_bounds = array<i64: 128, 128>}, {pipeline_mode = #tpu.pipeline_mode<synchronous>, transform_indices = @transform_8, window_bounds = array<i64: 1, 128>}, {transform_indices = @transform_9, window_bounds = array<i64: 256, 1>}, {transform_indices = @transform_10, window_bounds = array<i64: 256, 128>}, {transform_indices = @transform_11, window_bounds = array<i64: 256, 128>}, {transform_indices = @transform_12, window_bounds = array<i64: 256, 1>}]} {
    %c0 = arith.constant 0 : index
    %c0_0 = arith.constant 0 : index
    %0 = vector.load %arg1[%c0, %c0_0] : memref<256x32xbf16, #tpu.memory_space<vmem>>, vector<256x32xbf16>
    %c0_1 = arith.constant 0 : index
    %c0_2 = arith.constant 0 : index
    %1 = vector.load %arg2[%c0_1, %c0_2] : memref<32x512xbf16, #tpu.memory_space<vmem>>, vector<32x512xbf16>
    %cst = arith.constant dense<0.000000e+00> : vector<256x512xf32>
    %2 = tpu.matmul %0, %1, %cst {dimension_numbers = #tpu.dot_dimension_numbers<[1], [0], [0], [1], [0, 0, 1, 1], [], []>} : vector<256x32xbf16>, vector<32x512xbf16>, vector<256x512xf32> -> vector<256x512xf32>
    %c0_3 = arith.constant 0 : index
    %c0_4 = arith.constant 0 : index
    %3 = vector.load %arg3[%c0_3, %c0_4] : memref<1x512xf32, #tpu.memory_space<vmem>>, vector<1x512xf32>
    %4 = vector.broadcast %3 : vector<1x512xf32> to vector<256x512xf32>
    %5 = arith.addf %2, %4 : vector<256x512xf32>
    %cst_5 = arith.constant 0.000000e+00 : f32
    %6 = vector.broadcast %cst_5 : f32 to vector<256x512xf32>
    %7 = arith.maximumf %5, %6 : vector<256x512xf32>
    %8 = arith.truncf %7 : vector<256x512xf32> to vector<256x512xbf16>
    %c0_6 = arith.constant 0 : index
    %c0_7 = arith.constant 0 : index
    %9 = vector.load %arg4[%c0_6, %c0_7] : memref<512x256xbf16, #tpu.memory_space<vmem>>, vector<512x256xbf16>
    %cst_8 = arith.constant dense<0.000000e+00> : vector<256x256xf32>
    %10 = tpu.matmul %8, %9, %cst_8 {dimension_numbers = #tpu.dot_dimension_numbers<[1], [0], [0], [1], [0, 0, 1, 1], [], []>} : vector<256x512xbf16>, vector<512x256xbf16>, vector<256x256xf32> -> vector<256x256xf32>
    %c0_9 = arith.constant 0 : index
    %c0_10 = arith.constant 0 : index
    %11 = vector.load %arg5[%c0_9, %c0_10] : memref<1x256xf32, #tpu.memory_space<vmem>>, vector<1x256xf32>
    %12 = vector.broadcast %11 : vector<1x256xf32> to vector<256x256xf32>
    %13 = arith.addf %10, %12 : vector<256x256xf32>
    %cst_11 = arith.constant 0.000000e+00 : f32
    %14 = vector.broadcast %cst_11 : f32 to vector<256x256xf32>
    %15 = arith.maximumf %13, %14 : vector<256x256xf32>
    %16 = arith.truncf %15 : vector<256x256xf32> to vector<256x256xbf16>
    %c0_12 = arith.constant 0 : index
    %c0_13 = arith.constant 0 : index
    %17 = vector.load %arg6[%c0_12, %c0_13] : memref<256x128xbf16, #tpu.memory_space<vmem>>, vector<256x128xbf16>
    %cst_14 = arith.constant dense<0.000000e+00> : vector<256x128xf32>
    %18 = tpu.matmul %16, %17, %cst_14 {dimension_numbers = #tpu.dot_dimension_numbers<[1], [0], [0], [1], [0, 0, 1, 1], [], []>} : vector<256x256xbf16>, vector<256x128xbf16>, vector<256x128xf32> -> vector<256x128xf32>
    %c0_15 = arith.constant 0 : index
    %c0_16 = arith.constant 0 : index
    %19 = vector.load %arg7[%c0_15, %c0_16] : memref<1x128xf32, #tpu.memory_space<vmem>>, vector<1x128xf32>
    %20 = vector.broadcast %19 : vector<1x128xf32> to vector<256x128xf32>
    %21 = arith.addf %18, %20 : vector<256x128xf32>
    %cst_17 = arith.constant 0.000000e+00 : f32
    %22 = vector.broadcast %cst_17 : f32 to vector<256x128xf32>
    %23 = arith.maximumf %21, %22 : vector<256x128xf32>
    %c0_18 = arith.constant 0 : index
    %c0_19 = arith.constant 0 : index
    %24 = vector.load %arg11[%c0_18, %c0_19] : memref<256x128xf32, #tpu.memory_space<vmem>>, vector<256x128xf32>
    tpu.vector_store %arg11[%c0_18, %c0_19], %23 {strides = array<i32>} : memref<256x128xf32, #tpu.memory_space<vmem>>, vector<256x128xf32>,
    %25 = arith.truncf %23 : vector<256x128xf32> to vector<256x128xbf16>
    %c0_20 = arith.constant 0 : index
    %c0_21 = arith.constant 0 : index
    %26 = vector.load %arg8[%c0_20, %c0_21] : memref<128x128xbf16, #tpu.memory_space<vmem>>, vector<128x128xbf16>
    %cst_22 = arith.constant dense<0.000000e+00> : vector<256x128xf32>
    %27 = tpu.matmul %25, %26, %cst_22 {dimension_numbers = #tpu.dot_dimension_numbers<[1], [0], [0], [1], [0, 0, 1, 1], [], []>} : vector<256x128xbf16>, vector<128x128xbf16>, vector<256x128xf32> -> vector<256x128xf32>
    %c0_23 = arith.constant 0 : index
    %c0_24 = arith.constant 0 : index
    %28 = vector.load %arg9[%c0_23, %c0_24] : memref<1x128xf32, #tpu.memory_space<vmem>>, vector<1x128xf32>
    %29 = vector.broadcast %28 : vector<1x128xf32> to vector<256x128xf32>
    %30 = arith.addf %27, %29 : vector<256x128xf32>
    %31 = arith.negf %30 : vector<256x128xf32>
    %32 = math.exp %31 : vector<256x128xf32>
    %cst_25 = arith.constant 1.000000e+00 : f32
    %33 = vector.broadcast %cst_25 : f32 to vector<256x128xf32>
    %34 = arith.addf %33, %32 : vector<256x128xf32>
    %35 = arith.divf %33, %34 : vector<256x128xf32>
    %c0_26 = arith.constant 0 : index
    %c0_27 = arith.constant 0 : index
    %36 = vector.load %arg12[%c0_26, %c0_27] : memref<256x128xf32, #tpu.memory_space<vmem>>, vector<256x128xf32>
    tpu.vector_store %arg12[%c0_26, %c0_27], %35 {strides = array<i32>} : memref<256x128xf32, #tpu.memory_space<vmem>>, vector<256x128xf32>,
    %37 = tpu.iota {dimensions = array<i32: 1>} : vector<256x128xi32>
    %c8_i32 = arith.constant 8 : i32
    %38 = vector.broadcast %c8_i32 : i32 to vector<256x128xi32>
    %39 = arith.cmpi slt, %37, %38 : vector<256x128xi32>
    %cst_28 = arith.constant 0xFF800000 : f32
    %40 = vector.broadcast %cst_28 : f32 to vector<256x128xf32>
    %41 = arith.select %39, %35, %40 : vector<256x128xi1>, vector<256x128xf32>
    %cst_29 = arith.constant dense<0xFF800000> : vector<256xf32>
    %42 = vector.multi_reduction <maximumf>, %41, %cst_29 [1] : vector<256x128xf32> to vector<256xf32>
    %43 = vector.shape_cast %42 : vector<256xf32> to vector<256x1xf32>
    %44 = vector.broadcast %43 : vector<256x1xf32> to vector<256x128xf32>
    %45 = arith.subf %41, %44 : vector<256x128xf32>
    %46 = math.exp %45 : vector<256x128xf32>
    %cst_30 = arith.constant dense<0.000000e+00> : vector<256xf32>
    %47 = vector.multi_reduction <add>, %46, %cst_30 [1] : vector<256x128xf32> to vector<256xf32>
    %48 = vector.shape_cast %47 : vector<256xf32> to vector<256x1xf32>
    %49 = math.log %48 : vector<256x1xf32>
    %50 = arith.addf %49, %43 : vector<256x1xf32>
    %c0_31 = arith.constant 0 : index
    %c0_32 = arith.constant 0 : index
    %51 = vector.load %arg10[%c0_31, %c0_32] : memref<256x1xi32, #tpu.memory_space<vmem>>, vector<256x1xi32>
    %52 = vector.broadcast %51 : vector<256x1xi32> to vector<256x128xi32>
    %53 = arith.cmpi eq, %37, %52 : vector<256x128xi32>
    %54 = arith.extui %53 : vector<256x128xi1> to vector<256x128xi32>
    %55 = arith.sitofp %54 : vector<256x128xi32> to vector<256x128xf32>
    %56 = arith.mulf %35, %55 : vector<256x128xf32>
    %cst_33 = arith.constant dense<0.000000e+00> : vector<256xf32>
    %57 = vector.multi_reduction <add>, %56, %cst_33 [1] : vector<256x128xf32> to vector<256xf32>
    %58 = vector.shape_cast %57 : vector<256xf32> to vector<256x1xf32>
    %59 = arith.subf %50, %58 : vector<256x1xf32>
    %c0_34 = arith.constant 0 : index
    %c0_35 = arith.constant 0 : index
    %60 = vector.load %arg13[%c0_34, %c0_35] : memref<256x1xf32, #tpu.memory_space<vmem>>, vector<256x1xf32>
    tpu.vector_store %arg13[%c0_34, %c0_35], %59 {strides = array<i32>} : memref<256x1xf32, #tpu.memory_space<vmem>>, vector<256x1xf32>,
    return
  }
  func.func @transform_0(%arg0: i32) -> (i32, i32) {
    %c0_i32 = arith.constant 0 : i32
    %c0_i32_0 = arith.constant 0 : i32
    return %arg0, %c0_i32 : i32, i32
  }
  func.func @transform_1(%arg0: i32) -> (i32, i32) {
    %c0_i32 = arith.constant 0 : i32
    %c0_i32_0 = arith.constant 0 : i32
    %c0_i32_1 = arith.constant 0 : i32
    return %c0_i32, %c0_i32_0 : i32, i32
  }
  func.func @transform_2(%arg0: i32) -> (i32, i32) {
    %c0_i32 = arith.constant 0 : i32
    %c0_i32_0 = arith.constant 0 : i32
    %c0_i32_1 = arith.constant 0 : i32
    return %c0_i32, %c0_i32_0 : i32, i32
  }
  func.func @transform_3(%arg0: i32) -> (i32, i32) {
    %c0_i32 = arith.constant 0 : i32
    %c0_i32_0 = arith.constant 0 : i32
    %c0_i32_1 = arith.constant 0 : i32
    return %c0_i32, %c0_i32_0 : i32, i32
  }
  func.func @transform_4(%arg0: i32) -> (i32, i32) {
    %c0_i32 = arith.constant 0 : i32
    %c0_i32_0 = arith.constant 0 : i32
    %c0_i32_1 = arith.constant 0 : i32
    return %c0_i32, %c0_i32_0 : i32, i32
  }
  func.func @transform_5(%arg0: i32) -> (i32, i32) {
    %c0_i32 = arith.constant 0 : i32
    %c0_i32_0 = arith.constant 0 : i32
    %c0_i32_1 = arith.constant 0 : i32
    return %c0_i32, %c0_i32_0 : i32, i32
  }
  func.func @transform_6(%arg0: i32) -> (i32, i32) {
    %c0_i32 = arith.constant 0 : i32
    %c0_i32_0 = arith.constant 0 : i32
    %c0_i32_1 = arith.constant 0 : i32
    return %c0_i32, %c0_i32_0 : i32, i32
  }
  func.func @transform_7(%arg0: i32) -> (i32, i32) {
    %c0_i32 = arith.constant 0 : i32
    %c0_i32_0 = arith.constant 0 : i32
    %c0_i32_1 = arith.constant 0 : i32
    return %c0_i32, %c0_i32_0 : i32, i32
  }
  func.func @transform_8(%arg0: i32) -> (i32, i32) {
    %c0_i32 = arith.constant 0 : i32
    %c0_i32_0 = arith.constant 0 : i32
    %c0_i32_1 = arith.constant 0 : i32
    return %c0_i32, %c0_i32_0 : i32, i32
  }
  func.func @transform_9(%arg0: i32) -> (i32, i32) {
    %c0_i32 = arith.constant 0 : i32
    %c0_i32_0 = arith.constant 0 : i32
    return %arg0, %c0_i32 : i32, i32
  }
  func.func @transform_10(%arg0: i32) -> (i32, i32) {
    %c0_i32 = arith.constant 0 : i32
    %c0_i32_0 = arith.constant 0 : i32
    return %arg0, %c0_i32 : i32, i32
  }
  func.func @transform_11(%arg0: i32) -> (i32, i32) {
    %c0_i32 = arith.constant 0 : i32
    %c0_i32_0 = arith.constant 0 : i32
    return %arg0, %c0_i32 : i32, i32
  }
  func.func @transform_12(%arg0: i32) -> (i32, i32) {
    %c0_i32 = arith.constant 0 : i32
    %c0_i32_0 = arith.constant 0 : i32
    return %arg0, %c0_i32 : i32, i32
  }
}

</mosaic_0001>

<bundles_post_ra>
// kernel: fcn_forward.1
= control target key start
LH: loop header
LB: loop body
LE: loop exit
PB: predicated region body
PF: predicated region fallthrough
CT: control target
= control target key end

     0   :  { %s4768_s21 = smov 0   ;;  %s6437_s0 = inlined_call_operand.vmem [shape: bf16[512,32], index: 0, kind: input, shape index: {}]   ;;  %s6438_s1 = inlined_call_operand.vmem [shape: bf16[32,512], index: 1, kind: input, shape index: {}]   ;;  %s6439_s2 = inlined_call_operand.vmem [shape: f32[1,512], index: 2, kind: input, shape index: {}]   ;;  %s6440_s3 = inlined_call_operand.vmem [shape: bf16[512,256], index: 3, kind: input, shape index: {}]   ;;  %s6441_s4 = inlined_call_operand.vmem [shape: f32[1,256], index: 4, kind: input, shape index: {}]   ;;  %s6442_s5 = inlined_call_operand.vmem [shape: bf16[256,128], index: 5, kind: input, shape index: {}]   ;;  %s6443_s6 = inlined_call_operand.vmem [shape: f32[1,128], index: 6, kind: input, shape index: {}]   ;;  %s6444_s7 = inlined_call_operand.vmem [shape: bf16[128,128], index: 7, kind: input, shape index: {}]   ;;  %s6445_s8 = inlined_call_operand.vmem [shape: f32[1,128], index: 8, kind: input, shape index: {}]   ;;  %s6446_s9 = inlined_call_operand.vmem [shape: s32[512,1], index: 9, kind: input, shape index: {}]   ;;  %s6447_s10 = inlined_call_operand.vmem [shape: f32[512,128], index: 10, kind: output, shape index: {0}]   ;;  %s6448_s11 = inlined_call_operand.vmem [shape: f32[512,128], index: 11, kind: output, shape index: {1}]   ;;  %s6449_s12 = inlined_call_operand.vmem [shape: f32[512,1], index: 12, kind: output, shape index: {2}]  }
   0x1 LB: > { %s3862_s22 = sadd.s32 4294967295, %s4699_s21   ;;  %p3866_p0 = scmp.ge.s32.totalorder %s4699_s21, 1  ;;  %s4699_s21 = sphi %s4768_s21, %s23_s21  }
   0x2   : > { %p379_p1 = scmp.lt.s32.totalorder %s4699_s21, 3 }
   0x4   : > { %p380_p2 = pnand %p3866_p0, %p379_p1 }
   0x6   : > { %383 = sbr.rel (%p380_p2) target bundleno = 1346 (0x542), region = 60 }
   0xb   : > { %v4289_v0 = vld [vmem:[%s6438_s1 + $0x24] ss:$16 sps:$4 sm:$0xff]   ;;  %s3867_s25 = sshll.u32 %s3862_s22, 5  ;;  %v4291_v1 = vld [vmem:[%s6438_s1 + $0x20] ss:$16 sps:$4 sm:$0xff]   ;;  %v4701_v2 = vmov 0  }
   0xc   : > { %730 = vmatprep.mubr.bf16.mxu0 %v4701_v2  ;;  %850 = vmatprep.mubr.bf16.mxu1 %v4701_v2  ;;  %p437_p3 = scmp.lt.s32.totalorder %s3867_s25, 63  ;;  %v4292_v3 = vld [vmem:[%s6438_s1 + $0x4] ss:$16 sps:$4 sm:$0xff]   ;;  %v4294_v4 = vld [vmem:[%s6438_s1] ss:$16 sps:$4 sm:$0xff]   ;;  %vm649_vm0 = vcmask 261120  }
   0xd   : > { %710 = vmatprep.subr.bf16.mxu0 %v4289_v0  ;;  %4273 = vmatprep.subr.bf16.mxu1 %v4289_v0  ;;  %v4299_v5 = vld [vmem:[%s6438_s1 + $0x2c] ss:$16 sps:$4 sm:$0xff]   ;;  %v4297_v6 = vld [vmem:[%s6438_s1 + $0x28] ss:$16 sps:$4 sm:$0xff]  }
   0xe   : > { %711 = vmatpush1.bf16.msra.mxu0 %v4291_v1  ;;  %4275 = vmatpush1.bf16.msra.mxu1 %v4291_v1  ;;  %s6457_s25 = smov (!%p437_p3, %s3867_s25), 63  ;;  %v4306_v7 = vld [vmem:[%s6438_s1 + $0xc] ss:$16 sps:$4 sm:$0xff]   ;;  %v4304_v10 = vld [vmem:[%s6438_s1 + $0x8] ss:$16 sps:$4 sm:$0xff]  }
   0xf   : > { %712 = vmatprep.subr.bf16.mxu0 %v4292_v3  ;;  %4274 = vmatprep.subr.bf16.mxu1 %v4292_v3  ;;  %s3868_s16 = sshll.u32 %s6457_s25, 2  ;;  %v4319_v11 = vld [vmem:[%s6440_s3 + $0x174] ss:$8 sps:$4 sm:$0xff]   ;;  %v4329_v16 = vld [vmem:[%s6440_s3 + $0x70] ss:$8 sps:$4 sm:$0xff]   ;;  %s5610_s23 = sshll.u32 %s6457_s25, 3 }
  0x10   : > { %4288 = vset.pattern.permute.xlu1 %v4701_v2  ;;  %4287 = vset.pattern.permute.xlu0 %v4701_v2  ;;  %s4801_s19 = scalar_lea.vmem %s6437_s0, %s3868_s16  ;;  %v4331_v17 = vld [vmem:[%s6440_s3 + $0x74] ss:$8 sps:$4 sm:$0xff]   ;;  %v4337_v20 = vld [vmem:[%s6440_s3 + $0x64] ss:$8 sps:$4 sm:$0xff]   ;;  %v4335_v21 = vld [vmem:[%s6440_s3 + $0x60] ss:$8 sps:$4 sm:$0xff]   ;;  %s5616_s27 = scalar_lea.vmem %s6446_s9, %s5610_s23 }
  0x11   : > { %v4295_v8 = vld [vmem:[%s4801_s19] sm:$0xff]   ;;  %v4300_v12 = vld [vmem:[%s4801_s19 + $0x8] sm:$0xff]   ;;  %v4834_v14 = vld [vmem:[%s4801_s19 + $0x10] sm:$0xff]   ;;  %s5644_s30 = scalar_lea.vmem %s6447_s10, %s5610_s23  ;;  %s5753_s17 = scalar_lea.vmem %s6448_s11, %s5610_s23 }
  0x12   : > { %713 = vmatpush1.bf16.msra.mxu0 %v4294_v4  ;;  %4276 = vmatpush1.bf16.msra.mxu1 %v4294_v4  ;;  %v4811_v9 = vld [vmem:[%s4801_s19 + $0x60] sm:$0xff]   ;;  %v4826_v13 = vld [vmem:[%s4801_s19 + $0x68] sm:$0xff]   ;;  %v4837_v15 = vld [vmem:[%s4801_s19 + $0x70] sm:$0xff]   ;;  %s6315_s22 = scalar_lea.vmem %s6449_s12, %s5610_s23 }
  0x13   : > { %903 = vmatprep.subr.bf16.mxu1 %v4299_v5  ;;  %v4852_v18 = vld [vmem:[%s4801_s19 + $0x18] sm:$0xff]   ;;  %1672 = vmatprep.subr.bf16.mxu0 %v4331_v17  ;;  %v4346_v24 = vld [vmem:[%s6440_s3 + $0x44] ss:$8 sps:$4 sm:$0xff]   ;;  %v4344_v28 = vld [vmem:[%s6440_s3 + $0x40] ss:$8 sps:$4 sm:$0xff]  }
  0x14   : > { %v4855_v19 = vld [vmem:[%s4801_s19 + $0x78] sm:$0xff]   ;;  %v4879_v25 = vld [vmem:[%s4801_s19 + $0x20] sm:$0xff]   ;;  %v4911_v34 = vld [vmem:[%s4801_s19 + $0x28] sm:$0xff]  }
  0x15   : > { %3901 = vmatmul.mubr.msk.bf16.vlgmr.msra.gmra.mxu0 %vm649_vm0, %v4295_v8  ;;  %3913 = vmatmul.mubr.msk.bf16.vlgmr.msra.gmra.mxu1 %vm649_vm0, %v4811_v9  ;;  %v4340_v22 = vld [vmem:[%s6440_s3 + $0x54] ss:$8 sps:$4 sm:$0xff]   ;;  %v4338_v23 = vld [vmem:[%s6440_s3 + $0x50] ss:$8 sps:$4 sm:$0xff]   ;;  %v4322_v27 = vld [vmem:[%s6440_s3 + $0x164] ss:$8 sps:$4 sm:$0xff]  }
  0x16   : > { %904 = vmatpush1.bf16.msra.mxu1 %v4297_v6  ;;  %740 = vmatprep.mubr.bf16.mxu0 %v4701_v2  ;;  %v4317_v26 = vld [vmem:[%s6440_s3 + $0x170] ss:$8 sps:$4 sm:$0xff]   ;;  %v4349_v29 = vld [vmem:[%s6440_s3 + $0x34] ss:$8 sps:$4 sm:$0xff]   ;;  %v4320_v30 = vld [vmem:[%s6440_s3 + $0x160] ss:$8 sps:$4 sm:$0xff]  }
  0x17   : > { %860 = vmatprep.mubr.bf16.mxu1 %v4701_v2  ;;  %905 = vmatprep.subr.bf16.mxu1 %v4306_v7  ;;  %v4325_v31 = vld [vmem:[%s6440_s3 + $0x154] ss:$8 sps:$4 sm:$0xff]   ;;  %v4347_v32 = vld [vmem:[%s6440_s3 + $0x30] ss:$8 sps:$4 sm:$0xff]   ;;  %v4355_v33 = vld [vmem:[%s6440_s3 + $0x24] ss:$8 sps:$4 sm:$0xff]  }
  0x18   : > { %1673 = vmatpush1.bf16.msra.mxu0 %v4329_v16  ;;  %v4323_v35 = vld [vmem:[%s6440_s3 + $0x150] ss:$8 sps:$4 sm:$0xff]   ;;  %v4328_v36 = vld [vmem:[%s6440_s3 + $0x144] ss:$8 sps:$4 sm:$0xff]   ;;  %v4353_v37 = vld [vmem:[%s6440_s3 + $0x20] ss:$8 sps:$4 sm:$0xff]  }
  0x19   : > { %1674 = vmatprep.subr.bf16.mxu0 %v4337_v20  ;;  %v4358_v38 = vld [vmem:[%s6440_s3 + $0x14] ss:$8 sps:$4 sm:$0xff]   ;;  %v4326_v39 = vld [vmem:[%s6440_s3 + $0x140] ss:$8 sps:$4 sm:$0xff]   ;;  %v4356_v41 = vld [vmem:[%s6440_s3 + $0x10] ss:$8 sps:$4 sm:$0xff]  }
  0x1a   : > { %906 = vmatpush1.bf16.msra.mxu1 %v4304_v10  ;;  %v4934_v40 = vld [vmem:[%s4801_s19 + $0x30] sm:$0xff]   ;;  %v4364_v43 = vld [vmem:[%s6440_s3 + $0x4] ss:$8 sps:$4 sm:$0xff]   ;;  %v4362_v45 = vld [vmem:[%s6440_s3] ss:$8 sps:$4 sm:$0xff]  }
  0x1b   : > { %1865 = vmatprep.subr.bf16.mxu1 %v4319_v11  ;;  %v4334_v42 = vld [vmem:[%s6440_s3 + $0x134] ss:$8 sps:$4 sm:$0xff]   ;;  %v4332_v44 = vld [vmem:[%s6440_s3 + $0x130] ss:$8 sps:$4 sm:$0xff]   ;;  %v4343_v46 = vld [vmem:[%s6440_s3 + $0x124] ss:$8 sps:$4 sm:$0xff]  }
  0x1c   : > { %1675 = vmatpush1.bf16.msra.mxu0 %v4335_v21  ;;  %v4367_v47 = vld [vmem:[%s6440_s3 + $0xf4] ss:$8 sps:$4 sm:$0xff]   ;;  %v4341_v48 = vld [vmem:[%s6440_s3 + $0x120] ss:$8 sps:$4 sm:$0xff]   ;;  %v4365_v49 = vld [vmem:[%s6440_s3 + $0xf0] ss:$8 sps:$4 sm:$0xff]  }
  0x1d   : > { %3902 = vmatmul.mubr.msk.bf16.gmra.mxu0 %vm649_vm0, %v4300_v12  ;;  %3914 = vmatmul.mubr.msk.bf16.gmra.mxu1 %vm649_vm0, %v4826_v13  ;;  %v4352_v50 = vld [vmem:[%s6440_s3 + $0x114] ss:$8 sps:$4 sm:$0xff]   ;;  %v4373_v51 = vld [vmem:[%s6440_s3 + $0xe4] ss:$8 sps:$4 sm:$0xff]   ;;  %v4350_v53 = vld [vmem:[%s6440_s3 + $0x110] ss:$8 sps:$4 sm:$0xff]  }
  0x1e   : > { %750 = vmatprep.mubr.bf16.mxu0 %v4701_v2  ;;  %870 = vmatprep.mubr.bf16.mxu1 %v4701_v2  ;;  %v4976_v52 = vld [vmem:[%s4801_s19 + $0x38] sm:$0xff]   ;;  %v4371_v54 = vld [vmem:[%s6440_s3 + $0xe0] ss:$8 sps:$4 sm:$0xff]   ;;  %v4361_v55 = vld [vmem:[%s6440_s3 + $0x104] ss:$8 sps:$4 sm:$0xff]  }
  0x1f   : > { %1676 = vmatprep.subr.bf16.mxu0 %v4340_v22  ;;  %v4376_v56 = vld [vmem:[%s6440_s3 + $0xd4] ss:$8 sps:$4 sm:$0xff]   ;;  %v4359_v57 = vld [vmem:[%s6440_s3 + $0x100] ss:$8 sps:$4 sm:$0xff]   ;;  %v4374_v58 = vld [vmem:[%s6440_s3 + $0xd0] ss:$8 sps:$4 sm:$0xff]  }
  0x20   : > { %1677 = vmatpush1.bf16.msra.mxu0 %v4338_v23  ;;  %v4370_v59 = vld [vmem:[%s6440_s3 + $0x1f4] ss:$8 sps:$4 sm:$0xff]   ;;  %v4382_v60 = vld [vmem:[%s6440_s3 + $0xc4] ss:$8 sps:$4 sm:$0xff]   ;;  %v4368_v62 = vld [vmem:[%s6440_s3 + $0x1f0] ss:$8 sps:$4 sm:$0xff]  }
  0x21   : > { %1678 = vmatprep.subr.bf16.mxu0 %v4346_v24  ;;  %v5009_v61 = vld [vmem:[%s4801_s19 + $0x40] sm:$0xff]   ;;  %v4385_v1 = vld [vmem:[%s6440_s3 + $0xb4] ss:$8 sps:$4 sm:$0xff]   ;;  %v4383_v4 = vld [vmem:[%s6440_s3 + $0xb0] ss:$8 sps:$4 sm:$0xff]  }
  0x22   : > { %v4380_v63 = vld [vmem:[%s6440_s3 + $0xc0] ss:$8 sps:$4 sm:$0xff]   ;;  %v4379_v0 = vld [vmem:[%s6440_s3 + $0x1e4] ss:$8 sps:$4 sm:$0xff]   ;;  %v4388_v5 = vld [vmem:[%s6440_s3 + $0x1d4] ss:$8 sps:$4 sm:$0xff]  }
  0x23   : > { %v4377_v3 = vld [vmem:[%s6440_s3 + $0x1e0] ss:$8 sps:$4 sm:$0xff]   ;;  %v4391_v6 = vld [vmem:[%s6440_s3 + $0xa4] ss:$8 sps:$4 sm:$0xff]   ;;  %v4394_v11 = vld [vmem:[%s6440_s3 + $0x94] ss:$8 sps:$4 sm:$0xff]  }
  0x24   : > { %1679 = vmatpush1.bf16.msra.mxu0 %v4344_v28  ;;  %v4314_v7 = vld [vmem:[%s4801_s19 + $0x48] sm:$0xff]   ;;  %v4401_v21 = vld [vmem:[%s6440_s3 + $0x1b0] ss:$8 sps:$4 sm:$0xff]   ;;  %v4403_v22 = vld [vmem:[%s6440_s3 + $0x1b4] ss:$8 sps:$4 sm:$0xff]  }
  0x25   : > { %3903 = vmatmul.mubr.msk.bf16.gmra.mxu0 %vm649_vm0, %v4834_v14  ;;  %3915 = vmatmul.mubr.msk.bf16.gmra.mxu1 %vm649_vm0, %v4837_v15  ;;  %v4389_v10 = vld [vmem:[%s6440_s3 + $0xa0] ss:$8 sps:$4 sm:$0xff]   ;;  %v4400_v17 = vld [vmem:[%s6440_s3 + $0x84] ss:$8 sps:$4 sm:$0xff]   ;;  %v4316_v23 = vld [vmem:[%s4801_s19 + $0x58] sm:$0xff]  }
  0x26   : > { %760 = vmatprep.mubr.bf16.mxu0 %v4701_v2  ;;  %880 = vmatprep.mubr.bf16.mxu1 %v4701_v2  ;;  %v4395_v16 = vld [vmem:[%s6440_s3 + $0x1c0] ss:$8 sps:$4 sm:$0xff]  }
  0x27   : > { %1680 = vmatprep.subr.bf16.mxu0 %v4349_v29  ;;  %v4398_v20 = vld [vmem:[%s6440_s3 + $0x80] ss:$8 sps:$4 sm:$0xff]   ;;  %v4412_v29 = vld [vmem:[%s6440_s3 + $0x184] ss:$8 sps:$4 sm:$0xff]  }
  0x28   : > { %1681 = vmatpush1.bf16.msra.mxu0 %v4347_v32  ;;  %v4404_v24 = vld [vmem:[%s6440_s3 + $0x1a0] ss:$8 sps:$4 sm:$0xff]  }
  0x29   : > { %1682 = vmatprep.subr.bf16.mxu0 %v4355_v33  ;;  %v4410_v28 = vld [vmem:[%s6440_s3 + $0x180] ss:$8 sps:$4 sm:$0xff]  }
  0x2c   : > { %1683 = vmatpush1.bf16.msra.mxu0 %v4353_v37 }
  0x2d   : > { %3904 = vmatmul.mubr.msk.bf16.gmra.mxu0 %vm649_vm0, %v4852_v18  ;;  %3916 = vmatmul.mubr.msk.bf16.gmra.mxu1 %vm649_vm0, %v4855_v19 }
  0x2e   : > { %770 = vmatprep.mubr.bf16.mxu0 %v4701_v2  ;;  %923 = vmatprep.mubr.bf16.mxu1 %v4701_v2 }
  0x2f   : > { %1684 = vmatprep.subr.bf16.mxu0 %v4358_v38 }
  0x30   : > { %1685 = vmatpush1.bf16.msra.mxu0 %v4356_v41 }
  0x31   : > { %1686 = vmatprep.subr.bf16.mxu0 %v4364_v43 }
  0x34   : > { %1687 = vmatpush1.bf16.msra.mxu0 %v4362_v45 }
  0x35   : > { %3905 = vmatmul.mubr.msk.bf16.gmra.mxu0 %vm649_vm0, %v4879_v25  ;;  %3917 = vmatmul.mubr.msk.bf16.vlgmr.msra.gmra.mxu1 %vm649_vm0, %v4295_v8  ;;  %v4386_v8 = vld [vmem:[%s6440_s3 + $0x1d0] ss:$8 sps:$4 sm:$0xff]  }
  0x36   : > { %780 = vmatprep.mubr.bf16.mxu0 %v4701_v2  ;;  %933 = vmatprep.mubr.bf16.mxu1 %v4701_v2 }
  0x37   : > { %1866 = vmatpush1.bf16.msra.mxu1 %v4317_v26  ;;  %1688 = vmatprep.subr.bf16.mxu0 %v4367_v47  ;;  %v4407_v26 = vld [vmem:[%s6440_s3 + $0x190] ss:$8 sps:$4 sm:$0xff]  }
  0x38   : > { %1867 = vmatprep.subr.bf16.mxu1 %v4322_v27  ;;  %1689 = vmatpush2.bf16.msra.mxu0 %v4365_v49  ;;  %v4409_v27 = vld [vmem:[%s6440_s3 + $0x194] ss:$8 sps:$4 sm:$0xff]  }
  0x39   : > { %1690 = vmatprep.subr.bf16.mxu0 %v4373_v51 }
  0x3b   : > { %1868 = vmatpush1.bf16.msra.mxu1 %v4320_v30  ;;  %v509_v30 = vlaneseq }
  0x3c   : > { %1869 = vmatprep.subr.bf16.mxu1 %v4325_v31  ;;  %1691 = vmatpush2.bf16.msra.mxu0 %v4371_v54 }
  0x3d   : > { %3906 = vmatmul.mubr.msk.bf16.gmra.mxu0 %vm649_vm0, %v4911_v34  ;;  %3918 = vmatmul.mubr.msk.bf16.gmra.mxu1 %vm649_vm0, %v4300_v12  ;;  %v4397_v12 = vld [vmem:[%s6440_s3 + $0x1c4] ss:$8 sps:$4 sm:$0xff]   ;;  %v5127_v31 = vshrl.u32 %v509_v30, 7 }
  0x3e   : > { %790 = vmatprep.mubr.bf16.mxu0 %v4701_v2  ;;  %943 = vmatprep.mubr.bf16.mxu1 %v4701_v2 }
  0x3f   : > { %1870 = vmatpush1.bf16.msra.mxu1 %v4323_v35  ;;  %1692 = vmatprep.subr.bf16.mxu0 %v4376_v56  ;;  %v515_v32 = vsub.s32 1, %v5127_v31 }
  0x40   : > { %1871 = vmatprep.subr.bf16.mxu1 %v4328_v36  ;;  %1693 = vmatpush2.bf16.msra.mxu0 %v4374_v58 }
  0x41   : > { %1694 = vmatprep.subr.bf16.mxu0 %v4382_v60 }
  0x43   : > { %1872 = vmatpush1.bf16.msra.mxu1 %v4326_v39 }
  0x44   : > { %1873 = vmatprep.subr.bf16.mxu1 %v4334_v42  ;;  %1695 = vmatpush2.bf16.msra.mxu0 %v4380_v63  ;;  %v4414_v63 = vld [vmem:[%s6442_s5 + $0x38] sm:$0xff]  }
  0x45   : > { %3907 = vmatmul.mubr.msk.bf16.gmra.mxu0 %vm649_vm0, %v4934_v40  ;;  %3919 = vmatmul.mubr.msk.bf16.gmra.mxu1 %vm649_vm0, %v4834_v14  ;;  %v4392_v14 = vld [vmem:[%s6440_s3 + $0x90] ss:$8 sps:$4 sm:$0xff]  }
  0x46   : > { %800 = vmatprep.mubr.bf16.mxu0 %v4701_v2  ;;  %953 = vmatprep.mubr.bf16.mxu1 %v4701_v2 }
  0x47   : > { %1874 = vmatpush1.bf16.msra.mxu1 %v4332_v44  ;;  %1696 = vmatprep.subr.bf16.mxu0 %v4385_v1 }
  0x48   : > { %1875 = vmatprep.subr.bf16.mxu1 %v4343_v46  ;;  %1697 = vmatpush2.bf16.msra.mxu0 %v4383_v4 }
  0x49   : > { %1698 = vmatprep.subr.bf16.mxu0 %v4391_v6 }
  0x4b   : > { %1876 = vmatpush1.bf16.msra.mxu1 %v4341_v48 }
  0x4c   : > { %1877 = vmatprep.subr.bf16.mxu1 %v4352_v50  ;;  %1699 = vmatpush2.bf16.msra.mxu0 %v4389_v10 }
  0x4d   : > { %3908 = vmatmul.mubr.msk.bf16.gmra.mxu0 %vm649_vm0, %v4976_v52  ;;  %3920 = vmatmul.mubr.msk.bf16.gmra.mxu1 %vm649_vm0, %v4852_v18  ;;  %v4315_v18 = vld [vmem:[%s4801_s19 + $0x50] sm:$0xff]  }
  0x4e   : > { %810 = vmatprep.mubr.bf16.mxu0 %v4701_v2  ;;  %963 = vmatprep.mubr.bf16.mxu1 %v4701_v2 }
  0x4f   : > { %1878 = vmatpush1.bf16.msra.mxu1 %v4350_v53  ;;  %1700 = vmatprep.subr.bf16.mxu0 %v4394_v11 }
  0x50   : > { %1879 = vmatprep.subr.bf16.mxu1 %v4361_v55  ;;  %1701 = vmatpush2.bf16.msra.mxu0 %v4392_v14 }
  0x51   : > { %1702 = vmatprep.subr.bf16.mxu0 %v4400_v17 }
  0x53   : > { %1880 = vmatpush1.bf16.msra.mxu1 %v4359_v57 }
  0x54   : > { %1881 = vmatprep.subr.bf16.mxu1 %v4370_v59  ;;  %1703 = vmatpush2.bf16.msra.mxu0 %v4398_v20 }
  0x55   : > { %3909 = vmatmul.mubr.msk.bf16.gmra.mxu0 %vm649_vm0, %v5009_v61  ;;  %3921 = vmatmul.mubr.msk.bf16.gmra.mxu1 %vm649_vm0, %v4879_v25  ;;  %v4406_v25 = vld [vmem:[%s6440_s3 + $0x1a4] ss:$8 sps:$4 sm:$0xff]  }
  0x56   : > { %820 = vmatprep.mubr.bf16.mxu0 %v4701_v2  ;;  %973 = vmatprep.mubr.bf16.mxu1 %v4701_v2 }
  0x57   : > { %1882 = vmatpush2.bf16.msra.mxu1 %v4368_v62 }
  0x58   : > { %1883 = vmatprep.subr.bf16.mxu1 %v4379_v0 }
  0x5b   : > { %1884 = vmatpush2.bf16.msra.mxu1 %v4377_v3 }
  0x5c   : > { %1885 = vmatprep.subr.bf16.mxu1 %v4388_v5 }
  0x5d   : > { %3910 = vmatmul.mubr.msk.bf16.gmra.mxu0 %vm649_vm0, %v4314_v7  ;;  %3922 = vmatmul.mubr.msk.bf16.gmra.mxu1 %vm649_vm0, %v4911_v34  ;;  %v4413_v34 = vld [vmem:[%s6442_s5 + $0x78] sm:$0xff]  }
  0x5e   : > { %830 = vmatprep.mubr.bf16.mxu0 %v4701_v2  ;;  %983 = vmatprep.mubr.bf16.mxu1 %v4701_v2 }
  0x5f   : > { %1886 = vmatpush2.bf16.msra.mxu1 %v4386_v8  ;;  %4089 = vmatprep.subr.bf16.mxu0 %v4413_v34 }
  0x60   : > { %1887 = vmatprep.subr.bf16.mxu1 %v4397_v12 }
  0x63   : > { %1888 = vmatpush2.bf16.msra.mxu1 %v4395_v16 }
  0x64   : > { %1889 = vmatprep.subr.bf16.mxu1 %v4403_v22  ;;  %v4416_v22 = vld [vmem:[%s6442_s5 + $0x30] sm:$0xff]  }
  0x65   : > { %3911 = vmatmul.mubr.msk.bf16.gmra.mxu0 %vm649_vm0, %v4315_v18  ;;  %3923 = vmatmul.mubr.msk.bf16.gmra.mxu1 %vm649_vm0, %v4934_v40 }
  0x66   : > { %840 = vmatprep.mubr.bf16.mxu0 %v4701_v2  ;;  %993 = vmatprep.mubr.bf16.mxu1 %v4701_v2 }
  0x67   : > { %1890 = vmatpush2.bf16.msra.mxu1 %v4401_v21  ;;  %v4415_v21 = vld [vmem:[%s6442_s5 + $0x70] sm:$0xff]  }
  0x68   : > { %1891 = vmatprep.subr.bf16.mxu1 %v4406_v25 }
  0x6b   : > { %1892 = vmatpush2.bf16.msra.mxu1 %v4404_v24 }
  0x6c   : > { %1893 = vmatprep.subr.bf16.mxu1 %v4409_v27 }
  0x6d   : > { %3912 = vmatmul.mubr.msk.bf16.gmra.mxu0 %vm649_vm0, %v4316_v23  ;;  %3924 = vmatmul.mubr.msk.bf16.gmra.mxu1 %vm649_vm0, %v4976_v52 }
  0x6e   : > { %1003 = vmatprep.mubr.bf16.mxu1 %v4701_v2 }
  0x6f   : > { %1894 = vmatpush2.bf16.msra.mxu1 %v4407_v26 }
  0x70   : > { %1895 = vmatprep.subr.bf16.mxu1 %v4412_v29 }
  0x73   : > { %1896 = vmatpush2.bf16.msra.mxu1 %v4410_v28 }
  0x75   : > { %3925 = vmatmul.mubr.msk.bf16.gmra.mxu1 %vm649_vm0, %v5009_v61 }
  0x76   : > { %1013 = vmatprep.mubr.bf16.mxu1 %v4701_v2 }
  0x7d   : > { %3926 = vmatmul.mubr.msk.bf16.gmra.mxu1 %vm649_vm0, %v4314_v7 }
  0x7e   : > { %1023 = vmatprep.mubr.bf16.mxu1 %v4701_v2 }
  0x85   : > { %3927 = vmatmul.mubr.msk.bf16.gmra.mxu1 %vm649_vm0, %v4315_v18 }
  0x86   : > { %1033 = vmatprep.mubr.bf16.mxu1 %v4701_v2 }
  0x8d   : > { %3928 = vmatmul.mubr.msk.bf16.gmra.mxu1 %vm649_vm0, %v4316_v23 }
  0x8e   : > { %1043 = vmatprep.mubr.bf16.mxu1 %v4701_v2 }
  0x95   : > { %3929 = vmatmul.mubr.msk.bf16.gmra.mxu1 %vm649_vm0, %v4811_v9  ;;  %v511_v9 = vsub.s32 0, %v5127_v31 }
  0x96   : > { %1053 = vmatprep.mubr.bf16.mxu1 %v4701_v2 }
  0x9d   : > { %3930 = vmatmul.mubr.msk.bf16.gmra.mxu1 %vm649_vm0, %v4826_v13  ;;  %v5133_v13 = vld [vmem:[%s6439_s2] sm:$0xf] }
  0x9e   : > { %1063 = vmatprep.mubr.bf16.mxu1 %v4701_v2  ;;  %v5144_v33 = vrot.slane %v5133_v13, %v515_v32 }
  0xa5   : > { %3931 = vmatmul.mubr.msk.bf16.gmra.mxu1 %vm649_vm0, %v4837_v15 }
  0xa6   : > { %1073 = vmatprep.mubr.bf16.mxu1 %v4701_v2  ;;  %v5139_v2 = vrot.slane %v5133_v13, %v511_v9 }
  0xad   : > { %3932 = vmatmul.mubr.msk.bf16.gmra.mxu1 %vm649_vm0, %v4855_v19 }
  0xd5   : > { %v732_v15 = vpop.f32.mrf.mxu0  ;;  %v852_v19 = vpop.f32.mrf.mxu1 }
  0xd6   : > { %v733_v35 = vadd.f32 %v732_v15, %v5139_v2  ;;  %v853_v36 = vadd.f32 %v852_v19, %v5139_v2 }
  0xd7   : > { %v734_v37 = vpop.f32.mrf.mxu0  ;;  %v5151_v38 = vpop.f32.mrf.mxu1 }
  0xd8   : > { %v735_v39 = vadd.f32 %v734_v37, %v5144_v33  ;;  %v1084_v44 = vmax.f32 %v733_v35, 0.0  ;;  %v1180_v45 = vmax.f32 %v853_v36, 0.0 }
  0xd9   : > { %v736_v40 = vpop.f32.mrf.mxu0  ;;  %v856_v41 = vpop.f32.mrf.mxu1 }
  0xda   : > { %v737_v42 = vadd.f32 %v736_v40, %v5139_v2  ;;  %v857_v43 = vadd.f32 %v856_v41, %v5139_v2  ;;  %v1085_v48 = vmax.f32 %v735_v39, 0.0 }
  0xdb   : > { %v738_v46 = vpop.f32.mrf.mxu0  ;;  %v5156_v47 = vpop.f32.mrf.mxu1 }
  0xdc   : > { %v1088_v49 = vmax.f32 %v737_v42, 0.0  ;;  %v1184_v50 = vmax.f32 %v857_v43, 0.0  ;;  %v739_v51 = vadd.f32 %v738_v46, %v5144_v33 }
  0xdd   : > { %v742_v52 = vpop.f32.mrf.mxu0  ;;  %v862_v53 = vpop.f32.mrf.mxu1 }
  0xde   : > { %v5159_v54 = vpack.c.bf16 %v1184_v50, %v1180_v45  ;;  %v1089_v55 = vmax.f32 %v739_v51, 0.0  ;;  %v1212_v56 = vpack.c.bf16 %v1088_v49, %v1084_v44  ;;  %v743_v57 = vadd.f32 %v742_v52, %v5139_v2 }
  0xdf   : > { %v863_v58 = vadd.f32 %v862_v53, %v5139_v2  ;;  %v744_v59 = vpop.f32.mrf.mxu0  ;;  %v5163_v60 = vpop.f32.mrf.mxu1 }
  0xe0   : > { %v745_v61 = vadd.f32 %v744_v59, %v5144_v33  ;;  %v1213_v62 = vpack.c.bf16 %v1089_v55, %v1085_v48  ;;  %v1092_v5 = vmax.f32 %v743_v57, 0.0 }
  0xe1   : > { %v746_v0 = vpop.f32.mrf.mxu0  ;;  %v866_v1 = vpop.f32.mrf.mxu1  ;;  %v1188_v6 = vmax.f32 %v863_v58, 0.0 }
  0xe2   : > { %v747_v3 = vadd.f32 %v746_v0, %v5139_v2  ;;  %v867_v4 = vadd.f32 %v866_v1, %v5139_v2  ;;  %1704 = vmatprep.mubr.bf16.mxu0 %v1213_v62  ;;  %v1093_v10 = vmax.f32 %v745_v61, 0.0 }
  0xe3   : > { %v748_v7 = vpop.f32.mrf.mxu0  ;;  %v5171_v8 = vpop.f32.mrf.mxu1  ;;  %1705 = vmatmul.mubr.bf16.vlgmr.msra.gmra.mxu0 %v1212_v56 }
  0xe4   : > { %v1096_v11 = vmax.f32 %v747_v3, 0.0  ;;  %v1192_v12 = vmax.f32 %v867_v4, 0.0  ;;  %v749_v14 = vadd.f32 %v748_v7, %v5144_v33  ;;  %4090 = vmatpush3.bf16.msra.mxu0 %v4414_v63  ;;  %v523_v63 = vsub.s32 3, %v5127_v31 }
  0xe5   : > { %v752_v16 = vpop.f32.mrf.mxu0  ;;  %v872_v17 = vpop.f32.mrf.mxu1  ;;  %4091 = vmatprep.subr.bf16.mxu0 %v4415_v21  ;;  %v4417_v21 = vld [vmem:[%s6442_s5 + $0x68] sm:$0xff]  }
  0xe6   : > { %v5174_v18 = vpack.c.bf16 %v1192_v12, %v1188_v6  ;;  %v1097_v20 = vmax.f32 %v749_v14, 0.0  ;;  %v1216_v23 = vpack.c.bf16 %v1096_v11, %v1092_v5  ;;  %v753_v24 = vadd.f32 %v752_v16, %v5139_v2 }
  0xe7   : > { %v873_v25 = vadd.f32 %v872_v17, %v5139_v2  ;;  %v754_v26 = vpop.f32.mrf.mxu0  ;;  %v5184_v27 = vpop.f32.mrf.mxu1  ;;  %v519_v5 = vsub.s32 2, %v5127_v31 }
  0xe8   : > { %v755_v28 = vadd.f32 %v754_v26, %v5144_v33  ;;  %v1217_v29 = vpack.c.bf16 %v1097_v20, %v1093_v10  ;;  %4092 = vmatpush3.bf16.msra.mxu0 %v4416_v22  ;;  %v1100_v36 = vmax.f32 %v753_v24, 0.0  ;;  %v5209_v20 = vrot.slane %v5133_v13, %v523_v63  ;;  %v4418_v22 = vld [vmem:[%s6442_s5 + $0x28] sm:$0xff]  }
  0xe9   : > { %v756_v15 = vpop.f32.mrf.mxu0  ;;  %v876_v19 = vpop.f32.mrf.mxu1  ;;  %v1196_v37 = vmax.f32 %v873_v25, 0.0  ;;  %v5219_v25 = vrot.slane %v5133_v13, %v519_v5  ;;  %4093 = vmatprep.subr.bf16.mxu0 %v4417_v21 }
  0xea   : > { %v757_v34 = vadd.f32 %v756_v15, %v5139_v2  ;;  %v877_v35 = vadd.f32 %v876_v19, %v5139_v2  ;;  %1714 = vmatprep.mubr.bf16.mxu0 %v1217_v29  ;;  %v1101_v41 = vmax.f32 %v755_v28, 0.0 }
  0xeb   : > { %v758_v39 = vpop.f32.mrf.mxu0  ;;  %v5189_v40 = vpop.f32.mrf.mxu1  ;;  %1715 = vmatmul.mubr.bf16.gmra.mxu0 %v1216_v23 }
  0xec   : > { %v1104_v42 = vmax.f32 %v757_v34, 0.0  ;;  %v1200_v43 = vmax.f32 %v877_v35, 0.0  ;;  %v759_v44 = vadd.f32 %v758_v39, %v5144_v33  ;;  %4094 = vmatpush3.bf16.msra.mxu0 %v4418_v22 }
  0xed   : > { %v762_v45 = vpop.f32.mrf.mxu0  ;;  %v882_v46 = vpop.f32.mrf.mxu1 }
  0xee   : > { %v5192_v48 = vpack.c.bf16 %v1200_v43, %v1196_v37  ;;  %v1105_v49 = vmax.f32 %v759_v44, 0.0  ;;  %v1220_v50 = vpack.c.bf16 %v1104_v42, %v1100_v36  ;;  %v763_v51 = vadd.f32 %v762_v45, %v5139_v2  ;;  %v4419_v43 = vld [vmem:[%s6442_s5 + $0x60] sm:$0xff]   ;;  %v4421_v45 = vld [vmem:[%s6442_s5 + $0x58] sm:$0xff]  }
  0xef   : > { %v883_v52 = vadd.f32 %v882_v46, %v5139_v2  ;;  %v764_v53 = vpop.f32.mrf.mxu0  ;;  %v5196_v55 = vpop.f32.mrf.mxu1  ;;  %v4420_v44 = vld [vmem:[%s6442_s5 + $0x20] sm:$0xff]   ;;  %4095 = vmatprep.subr.bf16.mxu0 %v4419_v43 }
  0xf0   : > { %v765_v56 = vadd.f32 %v764_v53, %v5144_v33  ;;  %v1221_v57 = vpack.c.bf16 %v1105_v49, %v1101_v41  ;;  %v1108_v0 = vmax.f32 %v763_v51, 0.0  ;;  %4096 = vmatpush3.bf16.msra.mxu0 %v4420_v44 }
  0xf1   : > { %v766_v58 = vpop.f32.mrf.mxu0  ;;  %v886_v59 = vpop.f32.mrf.mxu1  ;;  %v1204_v1 = vmax.f32 %v883_v52, 0.0  ;;  %4097 = vmatprep.subr.bf16.mxu0 %v4421_v45 }
  0xf2   : > { %v767_v61 = vadd.f32 %v766_v58, %v5139_v2  ;;  %v887_v62 = vadd.f32 %v886_v59, %v5139_v2  ;;  %1724 = vmatprep.mubr.bf16.mxu0 %v1221_v57  ;;  %v1109_v6 = vmax.f32 %v765_v56, 0.0 }
  0xf3   : > { %v768_v3 = vpop.f32.mrf.mxu0  ;;  %v5202_v4 = vpop.f32.mrf.mxu1  ;;  %1725 = vmatmul.mubr.bf16.gmra.mxu0 %v1220_v50 }
  0xf4   : > { %v1112_v7 = vmax.f32 %v767_v61, 0.0  ;;  %v1208_v10 = vmax.f32 %v887_v62, 0.0  ;;  %v769_v11 = vadd.f32 %v768_v3, %v5144_v33 }
  0xf5   : > { %v772_v12 = vpop.f32.mrf.mxu0  ;;  %v925_v14 = vpop.f32.mrf.mxu1 }
  0xf6   : > { %v5206_v16 = vpack.c.bf16 %v1208_v10, %v1204_v1  ;;  %v1113_v17 = vmax.f32 %v769_v11, 0.0  ;;  %v1224_v23 = vpack.c.bf16 %v1112_v7, %v1108_v0  ;;  %v773_v24 = vadd.f32 %v772_v12, %v5139_v2  ;;  %v4422_v7 = vld [vmem:[%s6442_s5 + $0x18] sm:$0xff]  }
  0xf7   : > { %v774_v26 = vpop.f32.mrf.mxu0  ;;  %v927_v28 = vpop.f32.mrf.mxu1  ;;  %v926_v13 = vadd.f32 %v925_v14, %v5219_v25  ;;  %v4423_v14 = vld [vmem:[%s6442_s5 + $0x50] sm:$0xff]   ;;  %4098 = vmatpush3.bf16.msra.mxu0 %v4422_v7 }
  0xf8   : > { %v775_v29 = vadd.f32 %v774_v26, %v5144_v33  ;;  %v1225_v15 = vpack.c.bf16 %v1113_v17, %v1109_v6  ;;  %v928_v35 = vadd.f32 %v927_v28, %v5209_v20  ;;  %v1116_v39 = vmax.f32 %v773_v24, 0.0  ;;  %4099 = vmatprep.subr.bf16.mxu0 %v4423_v14 }
  0xf9   : > { %v776_v19 = vpop.f32.mrf.mxu0  ;;  %v929_v34 = vpop.f32.mrf.mxu1  ;;  %v1086_v61 = vmax.f32 %v926_v13, 0.0 }
  0xfa   : > { %v777_v36 = vadd.f32 %v776_v19, %v5139_v2  ;;  %v930_v37 = vadd.f32 %v929_v34, %v5219_v25  ;;  %1734 = vmatprep.mubr.bf16.mxu0 %v1225_v15  ;;  %v1117_v46 = vmax.f32 %v775_v29, 0.0  ;;  %v1087_v57 = vmax.f32 %v928_v35, 0.0  ;;  %v4424_v35 = vld [vmem:[%s6442_s5 + $0x10] sm:$0xff]  }
  0xfb   : > { %v778_v41 = vpop.f32.mrf.mxu0  ;;  %v931_v42 = vpop.f32.mrf.mxu1  ;;  %1735 = vmatmul.mubr.bf16.gmra.mxu0 %v1224_v23 }
  0xfc   : > { %v1120_v49 = vmax.f32 %v777_v36, 0.0  ;;  %v779_v50 = vadd.f32 %v778_v41, %v5144_v33  ;;  %v932_v51 = vadd.f32 %v931_v42, %v5209_v20  ;;  %v1090_v52 = vmax.f32 %v930_v37, 0.0  ;;  %4100 = vmatpush3.bf16.msra.mxu0 %v4424_v35 }
  0xfd   : > { %v782_v53 = vpop.f32.mrf.mxu0  ;;  %v935_v56 = vpop.f32.mrf.mxu1 }
  0xfe   : > { %v1121_v58 = vmax.f32 %v779_v50, 0.0  ;;  %v1091_v59 = vmax.f32 %v932_v51, 0.0  ;;  %v1228_v62 = vpack.c.bf16 %v1120_v49, %v1116_v39  ;;  %v783_v63 = vadd.f32 %v782_v53, %v5139_v2 }
  0xff   : > { %v784_v0 = vpop.f32.mrf.mxu0  ;;  %v937_v1 = vpop.f32.mrf.mxu1  ;;  %v1214_v10 = vpack.c.bf16 %v1090_v52, %v1086_v61  ;;  %v936_v24 = vadd.f32 %v935_v56, %v5219_v25 }
 0x100   : > { %v785_v3 = vadd.f32 %v784_v0, %v5144_v33  ;;  %v1229_v5 = vpack.c.bf16 %v1121_v58, %v1117_v46  ;;  %v1215_v6 = vpack.c.bf16 %v1091_v59, %v1087_v57  ;;  %v938_v17 = vadd.f32 %v937_v1, %v5209_v20 }
 0x101   : > { %v786_v11 = vpop.f32.mrf.mxu0  ;;  %v939_v12 = vpop.f32.mrf.mxu1  ;;  %v1124_v23 = vmax.f32 %v783_v63, 0.0  ;;  %v1094_v43 = vmax.f32 %v936_v24, 0.0 }
 0x102   : > { %v787_v21 = vadd.f32 %v786_v11, %v5139_v2  ;;  %v940_v22 = vadd.f32 %v939_v12, %v5219_v25  ;;  %1744 = vmatprep.mubr.bf16.mxu0 %v1229_v5  ;;  %1897 = vmatprep.mubr.bf16.mxu1 %v1215_v6  ;;  %v1125_v29 = vmax.f32 %v785_v3, 0.0  ;;  %v1095_v13 = vmax.f32 %v938_v17, 0.0 }
 0x103   : > { %v788_v26 = vpop.f32.mrf.mxu0  ;;  %v941_v28 = vpop.f32.mrf.mxu1  ;;  %1745 = vmatmul.mubr.bf16.gmra.mxu0 %v1228_v62  ;;  %1898 = vmatmul.mubr.bf16.vlgmr.msra.gmra.mxu1 %v1214_v10 }
 0x104   : > { %v1128_v15 = vmax.f32 %v787_v21, 0.0  ;;  %v789_v19 = vadd.f32 %v788_v26, %v5144_v33  ;;  %v942_v34 = vadd.f32 %v941_v28, %v5209_v20  ;;  %v1098_v36 = vmax.f32 %v940_v22, 0.0 }
 0x105   : > { %v792_v37 = vpop.f32.mrf.mxu0  ;;  %v945_v39 = vpop.f32.mrf.mxu1 }
 0x106   : > { %v1129_v41 = vmax.f32 %v789_v19, 0.0  ;;  %v1099_v42 = vmax.f32 %v942_v34, 0.0  ;;  %v1232_v44 = vpack.c.bf16 %v1128_v15, %v1124_v23  ;;  %v793_v45 = vadd.f32 %v792_v37, %v5139_v2 }
 0x107   : > { %v794_v46 = vpop.f32.mrf.mxu0  ;;  %v947_v49 = vpop.f32.mrf.mxu1  ;;  %v1218_v53 = vpack.c.bf16 %v1098_v36, %v1094_v43  ;;  %v946_v63 = vadd.f32 %v945_v39, %v5219_v25 }
 0x108   : > { %v795_v50 = vadd.f32 %v794_v46, %v5144_v33  ;;  %v1233_v51 = vpack.c.bf16 %v1129_v41, %v1125_v29  ;;  %v1219_v52 = vpack.c.bf16 %v1099_v42, %v1095_v13  ;;  %v948_v58 = vadd.f32 %v947_v49, %v5209_v20 }
 0x109   : > { %v796_v56 = vpop.f32.mrf.mxu0  ;;  %v949_v57 = vpop.f32.mrf.mxu1  ;;  %v1132_v62 = vmax.f32 %v793_v45, 0.0  ;;  %v1102_v22 = vmax.f32 %v946_v63, 0.0 }
 0x10a   : > { %v797_v59 = vadd.f32 %v796_v56, %v5139_v2  ;;  %v950_v61 = vadd.f32 %v949_v57, %v5219_v25  ;;  %1754 = vmatprep.mubr.bf16.mxu0 %v1233_v51  ;;  %1907 = vmatprep.mubr.bf16.mxu1 %v1219_v52  ;;  %v1133_v3 = vmax.f32 %v795_v50, 0.0  ;;  %v1103_v14 = vmax.f32 %v948_v58, 0.0 }
 0x10b   : > { %v798_v0 = vpop.f32.mrf.mxu0  ;;  %v951_v1 = vpop.f32.mrf.mxu1  ;;  %1755 = vmatmul.mubr.bf16.gmra.mxu0 %v1232_v44  ;;  %1908 = vmatmul.mubr.bf16.gmra.mxu1 %v1218_v53 }
 0x10c   : > { %v1136_v5 = vmax.f32 %v797_v59, 0.0  ;;  %v799_v6 = vadd.f32 %v798_v0, %v5144_v33  ;;  %v952_v7 = vadd.f32 %v951_v1, %v5209_v20  ;;  %v1106_v10 = vmax.f32 %v950_v61, 0.0 }
 0x10d   : > { %v802_v11 = vpop.f32.mrf.mxu0  ;;  %v955_v12 = vpop.f32.mrf.mxu1 }
 0x10e   : > { %v1137_v17 = vmax.f32 %v799_v6, 0.0  ;;  %v1107_v21 = vmax.f32 %v952_v7, 0.0  ;;  %v1236_v23 = vpack.c.bf16 %v1136_v5, %v1132_v62  ;;  %v803_v24 = vadd.f32 %v802_v11, %v5139_v2 }
 0x10f   : > { %v804_v26 = vpop.f32.mrf.mxu0  ;;  %v957_v28 = vpop.f32.mrf.mxu1  ;;  %v1222_v34 = vpack.c.bf16 %v1106_v10, %v1102_v22  ;;  %v956_v42 = vadd.f32 %v955_v12, %v5219_v25 }
 0x110   : > { %v805_v29 = vadd.f32 %v804_v26, %v5144_v33  ;;  %v1237_v15 = vpack.c.bf16 %v1137_v17, %v1133_v3  ;;  %v1223_v19 = vpack.c.bf16 %v1107_v21, %v1103_v14  ;;  %v958_v37 = vadd.f32 %v957_v28, %v5209_v20 }
 0x111   : > { %v806_v35 = vpop.f32.mrf.mxu0  ;;  %v959_v36 = vpop.f32.mrf.mxu1  ;;  %v1140_v41 = vmax.f32 %v803_v24, 0.0  ;;  %v1110_v59 = vmax.f32 %v956_v42, 0.0 }
 0x112   : > { %v807_v39 = vadd.f32 %v806_v35, %v5139_v2  ;;  %v960_v13 = vadd.f32 %v959_v36, %v5219_v25  ;;  %1764 = vmatprep.mubr.bf16.mxu0 %v1237_v15  ;;  %1917 = vmatprep.mubr.bf16.mxu1 %v1223_v19  ;;  %v1141_v45 = vmax.f32 %v805_v29, 0.0  ;;  %v1111_v56 = vmax.f32 %v958_v37, 0.0 }
 0x113   : > { %v808_v43 = vpop.f32.mrf.mxu0  ;;  %v961_v44 = vpop.f32.mrf.mxu1  ;;  %1765 = vmatmul.mubr.bf16.gmra.mxu0 %v1236_v23  ;;  %1918 = vmatmul.mubr.bf16.gmra.mxu1 %v1222_v34 }
 0x114   : > { %v1144_v46 = vmax.f32 %v807_v39, 0.0  ;;  %v809_v49 = vadd.f32 %v808_v43, %v5144_v33  ;;  %v962_v50 = vadd.f32 %v961_v44, %v5209_v20  ;;  %v1114_v51 = vmax.f32 %v960_v13, 0.0 }
 0x115   : > { %v812_v52 = vpop.f32.mrf.mxu0  ;;  %v965_v53 = vpop.f32.mrf.mxu1 }
 0x116   : > { %v1145_v57 = vmax.f32 %v809_v49, 0.0  ;;  %v1115_v58 = vmax.f32 %v962_v50, 0.0  ;;  %v1240_v61 = vpack.c.bf16 %v1144_v46, %v1140_v41  ;;  %v813_v62 = vadd.f32 %v812_v52, %v5139_v2 }
 0x117   : > { %v814_v63 = vpop.f32.mrf.mxu0  ;;  %v967_v0 = vpop.f32.mrf.mxu1  ;;  %v1226_v6 = vpack.c.bf16 %v1114_v51, %v1110_v59  ;;  %v966_v21 = vadd.f32 %v965_v53, %v5219_v25 }
 0x118   : > { %v815_v1 = vadd.f32 %v814_v63, %v5144_v33  ;;  %v1241_v3 = vpack.c.bf16 %v1145_v57, %v1141_v45  ;;  %v1227_v5 = vpack.c.bf16 %v1115_v58, %v1111_v56  ;;  %v968_v11 = vadd.f32 %v967_v0, %v5209_v20 }
 0x119   : > { %v816_v7 = vpop.f32.mrf.mxu0  ;;  %v969_v10 = vpop.f32.mrf.mxu1  ;;  %v1148_v17 = vmax.f32 %v813_v62, 0.0  ;;  %v1118_v39 = vmax.f32 %v966_v21, 0.0 }
 0x11a   : > { %v817_v12 = vadd.f32 %v816_v7, %v5139_v2  ;;  %v970_v14 = vadd.f32 %v969_v10, %v5219_v25  ;;  %1774 = vmatprep.mubr.bf16.mxu0 %v1241_v3  ;;  %1927 = vmatprep.mubr.bf16.mxu1 %v1227_v5  ;;  %v1149_v24 = vmax.f32 %v815_v1, 0.0  ;;  %v1119_v35 = vmax.f32 %v968_v11, 0.0 }
 0x11b   : > { %v818_v22 = vpop.f32.mrf.mxu0  ;;  %v971_v23 = vpop.f32.mrf.mxu1  ;;  %1775 = vmatmul.mubr.bf16.gmra.mxu0 %v1240_v61  ;;  %1928 = vmatmul.mubr.bf16.gmra.mxu1 %v1226_v6 }
 0x11c   : > { %v1152_v26 = vmax.f32 %v817_v12, 0.0  ;;  %v819_v28 = vadd.f32 %v818_v22, %v5144_v33  ;;  %v972_v29 = vadd.f32 %v971_v23, %v5209_v20  ;;  %v1122_v15 = vmax.f32 %v970_v14, 0.0 }
 0x11d   : > { %v822_v19 = vpop.f32.mrf.mxu0  ;;  %v975_v34 = vpop.f32.mrf.mxu1 }
 0x11e   : > { %v1153_v36 = vmax.f32 %v819_v28, 0.0  ;;  %v1123_v37 = vmax.f32 %v972_v29, 0.0  ;;  %v1244_v13 = vpack.c.bf16 %v1152_v26, %v1148_v17  ;;  %v823_v41 = vadd.f32 %v822_v19, %v5139_v2 }
 0x11f   : > { %v824_v42 = vpop.f32.mrf.mxu0  ;;  %v977_v43 = vpop.f32.mrf.mxu1  ;;  %v1230_v49 = vpack.c.bf16 %v1122_v15, %v1118_v39  ;;  %v976_v58 = vadd.f32 %v975_v34, %v5219_v25 }
 0x120   : > { %v825_v44 = vadd.f32 %v824_v42, %v5144_v33  ;;  %v1245_v45 = vpack.c.bf16 %v1153_v36, %v1149_v24  ;;  %v1231_v46 = vpack.c.bf16 %v1123_v37, %v1119_v35  ;;  %v978_v52 = vadd.f32 %v977_v43, %v5209_v20 }
 0x121   : > { %v826_v50 = vpop.f32.mrf.mxu0  ;;  %v979_v51 = vpop.f32.mrf.mxu1  ;;  %v1156_v57 = vmax.f32 %v823_v41, 0.0  ;;  %v1126_v12 = vmax.f32 %v976_v58, 0.0 }
 0x122   : > { %v827_v53 = vadd.f32 %v826_v50, %v5139_v2  ;;  %v980_v56 = vadd.f32 %v979_v51, %v5219_v25  ;;  %1784 = vmatprep.mubr.bf16.mxu0 %v1245_v45  ;;  %1937 = vmatprep.mubr.bf16.mxu1 %v1231_v46  ;;  %v1157_v62 = vmax.f32 %v825_v44, 0.0  ;;  %v1127_v7 = vmax.f32 %v978_v52, 0.0 }
 0x123   : > { %v828_v59 = vpop.f32.mrf.mxu0  ;;  %v981_v61 = vpop.f32.mrf.mxu1  ;;  %1785 = vmatmul.mubr.bf16.gmra.mxu0 %v1244_v13  ;;  %1938 = vmatmul.mubr.bf16.gmra.mxu1 %v1230_v49 }
 0x124   : > { %v1160_v63 = vmax.f32 %v827_v53, 0.0  ;;  %v829_v0 = vadd.f32 %v828_v59, %v5144_v33  ;;  %v982_v1 = vadd.f32 %v981_v61, %v5209_v20  ;;  %v1130_v3 = vmax.f32 %v980_v56, 0.0 }
 0x125   : > { %v832_v5 = vpop.f32.mrf.mxu0  ;;  %v985_v6 = vpop.f32.mrf.mxu1 }
 0x126   : > { %v1161_v10 = vmax.f32 %v829_v0, 0.0  ;;  %v1131_v11 = vmax.f32 %v982_v1, 0.0  ;;  %v1248_v14 = vpack.c.bf16 %v1160_v63, %v1156_v57  ;;  %v833_v17 = vadd.f32 %v832_v5, %v5139_v2 }
 0x127   : > { %v834_v21 = vpop.f32.mrf.mxu0  ;;  %v987_v22 = vpop.f32.mrf.mxu1  ;;  %v1234_v28 = vpack.c.bf16 %v1130_v3, %v1126_v12  ;;  %v986_v37 = vadd.f32 %v985_v6, %v5219_v25  ;;  %v859_v0 = vadd.f32 %v5156_v47, %v5144_v33  ;;  %v4426_v12 = vld [vmem:[%s6442_s5 + $0x8] sm:$0xff]   ;;  %v855_v47 = vadd.f32 %v5151_v38, %v5144_v33 }
 0x128   : > { %v835_v23 = vadd.f32 %v834_v21, %v5144_v33  ;;  %v1249_v24 = vpack.c.bf16 %v1161_v10, %v1157_v62  ;;  %v1235_v26 = vpack.c.bf16 %v1131_v11, %v1127_v7  ;;  %v988_v19 = vadd.f32 %v987_v22, %v5209_v20  ;;  %v4425_v11 = vld [vmem:[%s6442_s5 + $0x48] sm:$0xff]  }
 0x129   : > { %v836_v29 = vpop.f32.mrf.mxu0  ;;  %v989_v15 = vpop.f32.mrf.mxu1  ;;  %v1164_v36 = vmax.f32 %v833_v17, 0.0  ;;  %v1134_v53 = vmax.f32 %v986_v37, 0.0  ;;  %4101 = vmatprep.subr.bf16.mxu0 %v4425_v11  ;;  %v4428_v11 = vld [vmem:[%s6442_s5] sm:$0xff]  }
 0x12a   : > { %v837_v34 = vadd.f32 %v836_v29, %v5139_v2  ;;  %v990_v35 = vadd.f32 %v989_v15, %v5219_v25  ;;  %1794 = vmatprep.mubr.bf16.mxu0 %v1249_v24  ;;  %1947 = vmatprep.mubr.bf16.mxu1 %v1235_v26  ;;  %v1165_v41 = vmax.f32 %v835_v23, 0.0  ;;  %v1135_v50 = vmax.f32 %v988_v19, 0.0 }
 0x12b   : > { %v838_v39 = vpop.f32.mrf.mxu0  ;;  %v991_v13 = vpop.f32.mrf.mxu1  ;;  %1795 = vmatmul.mubr.bf16.gmra.mxu0 %v1248_v14  ;;  %1948 = vmatmul.mubr.bf16.gmra.mxu1 %v1234_v28  ;;  %v1185_v28 = vmax.f32 %v859_v0, 0.0 }
 0x12c   : > { %v1168_v42 = vmax.f32 %v837_v34, 0.0  ;;  %v839_v43 = vadd.f32 %v838_v39, %v5144_v33  ;;  %v992_v44 = vadd.f32 %v991_v13, %v5209_v20  ;;  %v1138_v45 = vmax.f32 %v990_v35, 0.0  ;;  %4102 = vmatpush3.bf16.msra.mxu0 %v4426_v12 }
 0x12d   : > { %v842_v46 = vpop.f32.mrf.mxu0  ;;  %v995_v49 = vpop.f32.mrf.mxu1  ;;  %v1181_v35 = vmax.f32 %v855_v47, 0.0 }
 0x12e   : > { %v1169_v51 = vmax.f32 %v839_v43, 0.0  ;;  %v1139_v52 = vmax.f32 %v992_v44, 0.0  ;;  %v1252_v56 = vpack.c.bf16 %v1168_v42, %v1164_v36  ;;  %v843_v57 = vadd.f32 %v842_v46, %v5139_v2 }
 0x12f   : > { %v844_v58 = vpop.f32.mrf.mxu0  ;;  %v997_v59 = vpop.f32.mrf.mxu1  ;;  %v1238_v1 = vpack.c.bf16 %v1138_v45, %v1134_v53  ;;  %v996_v17 = vadd.f32 %v995_v49, %v5219_v25  ;;  %v1261_v44 = vpack.c.bf16 %v1185_v28, %v1181_v35  ;;  %v869_v45 = vadd.f32 %v5171_v8, %v5144_v33 }
 0x130   : > { %v845_v61 = vadd.f32 %v844_v58, %v5144_v33  ;;  %v1253_v62 = vpack.c.bf16 %v1169_v51, %v1165_v41  ;;  %v1239_v63 = vpack.c.bf16 %v1139_v52, %v1135_v50  ;;  %v998_v6 = vadd.f32 %v997_v59, %v5209_v20 }
 0x131   : > { %v846_v3 = vpop.f32.mrf.mxu0  ;;  %v999_v5 = vpop.f32.mrf.mxu1  ;;  %v1172_v14 = vmax.f32 %v843_v57, 0.0  ;;  %v1142_v36 = vmax.f32 %v996_v17, 0.0  ;;  %v865_v52 = vadd.f32 %v5163_v60, %v5144_v33  ;;  %v1193_v8 = vmax.f32 %v869_v45, 0.0 }
 0x132   : > { %v847_v7 = vadd.f32 %v846_v3, %v5139_v2  ;;  %v1000_v10 = vadd.f32 %v999_v5, %v5219_v25  ;;  %1804 = vmatprep.mubr.bf16.mxu0 %v1253_v62  ;;  %1957 = vmatprep.mubr.bf16.mxu1 %v1239_v63  ;;  %v1173_v22 = vmax.f32 %v845_v61, 0.0  ;;  %v1143_v19 = vmax.f32 %v998_v6, 0.0 }
 0x133   : > { %v848_v21 = vpop.f32.mrf.mxu0  ;;  %v1001_v2 = vpop.f32.mrf.mxu1  ;;  %1805 = vmatmul.mubr.bf16.gmra.mxu0 %v1252_v56  ;;  %1958 = vmatmul.mubr.bf16.gmra.mxu1 %v1238_v1  ;;  %v1189_v63 = vmax.f32 %v865_v52, 0.0  ;;  %v879_v5 = vadd.f32 %v5189_v40, %v5144_v33  ;;  %v875_v40 = vadd.f32 %v5184_v27, %v5144_v33 }
 0x134   : > { %v1176_v23 = vmax.f32 %v847_v7, 0.0  ;;  %v849_v24 = vadd.f32 %v848_v21, %v5144_v33  ;;  %v1002_v26 = vadd.f32 %v1001_v2, %v5209_v20  ;;  %v1146_v29 = vmax.f32 %v1000_v10, 0.0  ;;  %v4427_v10 = vld [vmem:[%s6442_s5 + $0x40] sm:$0xff]  }
 0x135   : > { %v1005_v15 = vpop.f32.mrf.mxu1  ;;  %v1265_v7 = vpack.c.bf16 %v1193_v8, %v1189_v63  ;;  %4103 = vmatprep.subr.bf16.mxu0 %v4427_v10  ;;  %v1201_v2 = vmax.f32 %v879_v5, 0.0  ;;  %v1197_v28 = vmax.f32 %v875_v40, 0.0 }
 0x136   : > { %v1177_v38 = vmax.f32 %v849_v24, 0.0  ;;  %v1147_v34 = vmax.f32 %v1002_v26, 0.0  ;;  %v1256_v37 = vpack.c.bf16 %v1176_v23, %v1172_v14  ;;  %v1242_v42 = vpack.c.bf16 %v1146_v29, %v1142_v36  ;;  %4104 = vmatpush3.bf16.msra.mxu0 %v4428_v11 }
 0x137   : > { %v1007_v39 = vpop.f32.mrf.mxu1  ;;  %v1006_v50 = vadd.f32 %v1005_v15, %v5219_v25 }
 0x138   : > { %v1257_v13 = vpack.c.bf16 %v1177_v38, %v1173_v22  ;;  %v1243_v41 = vpack.c.bf16 %v1147_v34, %v1143_v19  ;;  %v1008_v46 = vadd.f32 %v1007_v39, %v5209_v20  ;;  %v889_v19 = vadd.f32 %v5202_v4, %v5144_v33 }
 0x139   : > { %v1009_v43 = vpop.f32.mrf.mxu1  ;;  %v1150_v61 = vmax.f32 %v1006_v50, 0.0  ;;  %v1269_v34 = vpack.c.bf16 %v1201_v2, %v1197_v28 }
 0x13a   : > { %v1010_v49 = vadd.f32 %v1009_v43, %v5219_v25  ;;  %1814 = vmatprep.mubr.bf16.mxu0 %v1257_v13  ;;  %1967 = vmatprep.mubr.bf16.mxu1 %v1243_v41  ;;  %v1151_v58 = vmax.f32 %v1008_v46, 0.0  ;;  %v1209_v41 = vmax.f32 %v889_v19, 0.0 }
 0x13b   : > { %v1011_v51 = vpop.f32.mrf.mxu1  ;;  %1815 = vmatmul.mubr.bf16.gmra.mxu0 %v1256_v37  ;;  %1968 = vmatmul.mubr.bf16.gmra.mxu1 %v1242_v42  ;;  %v885_v37 = vadd.f32 %v5196_v55, %v5144_v33 }
 0x13c   : > { %v1012_v53 = vadd.f32 %v1011_v51, %v5209_v20  ;;  %1824 = vmatprep.mubr.bf16.mxu0 %v1261_v44  ;;  %v1154_v56 = vmax.f32 %v1010_v49, 0.0 }
 0x13d   : > { %v1015_v57 = vpop.f32.mrf.mxu1  ;;  %v1205_v46 = vmax.f32 %v885_v37, 0.0 }
 0x13e   : > { %v1155_v59 = vmax.f32 %v1012_v53, 0.0  ;;  %v1246_v1 = vpack.c.bf16 %v1154_v56, %v1150_v61  ;;  %v1016_v12 = vadd.f32 %v1015_v57, %v5219_v25 }
 0x13f   : > { %v1017_v62 = vpop.f32.mrf.mxu1  ;;  %v1273_v33 = vpack.c.bf16 %v1209_v41, %v1205_v46 }
 0x140   : > { %v1247_v0 = vpack.c.bf16 %v1155_v59, %v1151_v58  ;;  %v1018_v6 = vadd.f32 %v1017_v62, %v5209_v20  ;;  %v1158_v24 = vmax.f32 %v1016_v12, 0.0 }
 0x141   : > { %v1019_v3 = vpop.f32.mrf.mxu1 }
 0x142   : > { %v1020_v60 = vadd.f32 %v1019_v3, %v5219_v25  ;;  %1977 = vmatprep.mubr.bf16.mxu1 %v1247_v0  ;;  %v1159_v22 = vmax.f32 %v1018_v6, 0.0 }
 0x143   : > { %v1021_v47 = vpop.f32.mrf.mxu1  ;;  %1825 = vmatmul.mubr.bf16.gmra.mxu0 %v5159_v54  ;;  %1978 = vmatmul.mubr.bf16.gmra.mxu1 %v1246_v1 }
 0x144   : > { %v1022_v14 = vadd.f32 %v1021_v47, %v5209_v20  ;;  %1834 = vmatprep.mubr.bf16.mxu0 %v1265_v7  ;;  %v1162_v17 = vmax.f32 %v1020_v60, 0.0 }
 0x145   : > { %v1025_v21 = vpop.f32.mrf.mxu1 }
 0x146   : > { %v1163_v23 = vmax.f32 %v1022_v14, 0.0  ;;  %v1250_v15 = vpack.c.bf16 %v1162_v17, %v1158_v24  ;;  %v1026_v35 = vadd.f32 %v1025_v21, %v5219_v25 }
 0x147   : > { %v1027_v26 = vpop.f32.mrf.mxu1 }
 0x148   : > { %v1251_v29 = vpack.c.bf16 %v1163_v23, %v1159_v22  ;;  %v1028_v27 = vadd.f32 %v1027_v26, %v5209_v20  ;;  %v1166_v44 = vmax.f32 %v1026_v35, 0.0 }
 0x149   : > { %v1029_v54 = vpop.f32.mrf.mxu1 }
 0x14a   : > { %v1030_v38 = vadd.f32 %v1029_v54, %v5219_v25  ;;  %1987 = vmatprep.mubr.bf16.mxu1 %v1251_v29  ;;  %v1167_v42 = vmax.f32 %v1028_v27, 0.0 }
 0x14b   : > { %v1031_v36 = vpop.f32.mrf.mxu1  ;;  %1835 = vmatmul.mubr.bf16.gmra.mxu0 %v5174_v18  ;;  %1988 = vmatmul.mubr.bf16.gmra.mxu1 %v1250_v15 }
 0x14c   : > { %v1032_v39 = vadd.f32 %v1031_v36, %v5209_v20  ;;  %1844 = vmatprep.mubr.bf16.mxu0 %v1269_v34  ;;  %v1170_v13 = vmax.f32 %v1030_v38, 0.0 }
 0x14d   : > { %v1035_v4 = vpop.f32.mrf.mxu1 }
 0x14e   : > { %v1171_v43 = vmax.f32 %v1032_v39, 0.0  ;;  %v1254_v50 = vpack.c.bf16 %v1170_v13, %v1166_v44  ;;  %v1036_v55 = vadd.f32 %v1035_v4, %v5219_v25 }
 0x14f   : > { %v1037_v45 = vpop.f32.mrf.mxu1 }
 0x150   : > { %v1255_v49 = vpack.c.bf16 %v1171_v43, %v1167_v42  ;;  %v1038_v18 = vadd.f32 %v1037_v45, %v5209_v20  ;;  %v1174_v61 = vmax.f32 %v1036_v55, 0.0 }
 0x151   : > { %v1039_v51 = vpop.f32.mrf.mxu1 }
 0x152   : > { %v1040_v52 = vadd.f32 %v1039_v51, %v5219_v25  ;;  %1997 = vmatprep.mubr.bf16.mxu1 %v1255_v49  ;;  %v1175_v58 = vmax.f32 %v1038_v18, 0.0 }
 0x153   : > { %v1041_v53 = vpop.f32.mrf.mxu1  ;;  %1845 = vmatmul.mubr.bf16.gmra.mxu0 %v5192_v48  ;;  %1998 = vmatmul.mubr.bf16.gmra.mxu1 %v1254_v50 }
 0x154   : > { %v1042_v56 = vadd.f32 %v1041_v53, %v5209_v20  ;;  %1854 = vmatprep.mubr.bf16.mxu0 %v1273_v33  ;;  %v1178_v57 = vmax.f32 %v1040_v52, 0.0 }
 0x155   : > { %v1045_v8 = vpop.f32.mrf.mxu1 }
 0x156   : > { %v1179_v59 = vmax.f32 %v1042_v56, 0.0  ;;  %v1258_v0 = vpack.c.bf16 %v1178_v57, %v1174_v61  ;;  %v1046_v48 = vadd.f32 %v1045_v8, %v5219_v25 }
 0x157   : > { %v1047_v62 = vpop.f32.mrf.mxu1 }
 0x158   : > { %v1259_v63 = vpack.c.bf16 %v1179_v59, %v1175_v58  ;;  %v1048_v3 = vadd.f32 %v1047_v62, %v5209_v20  ;;  %v1182_v47 = vmax.f32 %v1046_v48, 0.0 }
 0x159   : > { %v1049_v1 = vpop.f32.mrf.mxu1 }
 0x15a   : > { %v1050_v5 = vadd.f32 %v1049_v1, %v5219_v25  ;;  %2007 = vmatprep.mubr.bf16.mxu1 %v1259_v63  ;;  %v1183_v11 = vmax.f32 %v1048_v3, 0.0 }
 0x15b   : > { %v1051_v6 = vpop.f32.mrf.mxu1  ;;  %1855 = vmatmul.mubr.bf16.gmra.mxu0 %v5206_v16  ;;  %2008 = vmatmul.mubr.bf16.gmra.mxu1 %v1258_v0 }
 0x15c   : > { %v1052_v60 = vadd.f32 %v1051_v6, %v5209_v20  ;;  %v1186_v7 = vmax.f32 %v1050_v5, 0.0 }
 0x15d   : > { %v1055_v10 = vpop.f32.mrf.mxu1 }
 0x15e   : > { %v1187_v12 = vmax.f32 %v1052_v60, 0.0  ;;  %v1262_v17 = vpack.c.bf16 %v1186_v7, %v1182_v47  ;;  %v1056_v23 = vadd.f32 %v1055_v10, %v5219_v25 }
 0x15f   : > { %v1057_v40 = vpop.f32.mrf.mxu1 }
 0x160   : > { %v1263_v14 = vpack.c.bf16 %v1187_v12, %v1183_v11  ;;  %v1058_v2 = vadd.f32 %v1057_v40, %v5209_v20  ;;  %v1190_v54 = vmax.f32 %v1056_v23, 0.0  ;;  %v1340_v11 = vld [vmem:[%s6441_s4] sm:$0x3] }
 0x161   : > { %v1059_v21 = vpop.f32.mrf.mxu1  ;;  %v5387_v40 = vrot.slane %v1340_v11, %v511_v9 }
 0x162   : > { %v1060_v22 = vadd.f32 %v1059_v21, %v5219_v25  ;;  %2017 = vmatprep.mubr.bf16.mxu1 %v1263_v14  ;;  %v1191_v29 = vmax.f32 %v1058_v2, 0.0  ;;  %v5391_v14 = vrot.slane %v1340_v11, %v515_v32 }
 0x163   : > { %v1061_v16 = vpop.f32.mrf.mxu1  ;;  %2018 = vmatmul.mubr.bf16.gmra.mxu1 %v1262_v17 }
 0x164   : > { %v1062_v24 = vadd.f32 %v1061_v16, %v5209_v20  ;;  %v1194_v26 = vmax.f32 %v1060_v22, 0.0 }
 0x165   : > { %v1065_v28 = vpop.f32.mrf.mxu1 }
 0x166   : > { %v1195_v15 = vmax.f32 %v1062_v24, 0.0  ;;  %v1266_v38 = vpack.c.bf16 %v1194_v26, %v1190_v54  ;;  %v1066_v37 = vadd.f32 %v1065_v28, %v5219_v25 }
 0x167   : > { %v1067_v19 = vpop.f32.mrf.mxu1 }
 0x168   : > { %v1267_v27 = vpack.c.bf16 %v1195_v15, %v1191_v29  ;;  %v1068_v35 = vadd.f32 %v1067_v19, %v5209_v20  ;;  %v1198_v44 = vmax.f32 %v1066_v37, 0.0  ;;  %v4429_v19 = vld [vmem:[%s6444_s7 + $0x38] sm:$0xff]  }
 0x169   : > { %v1069_v34 = vpop.f32.mrf.mxu1  ;;  %4225 = vmatprep.subr.bf16.mxu1 %v4429_v19 }
 0x16a   : > { %v1070_v36 = vadd.f32 %v1069_v34, %v5219_v25  ;;  %2027 = vmatprep.mubr.bf16.mxu1 %v1267_v27  ;;  %v1199_v42 = vmax.f32 %v1068_v35, 0.0  ;;  %v4430_v27 = vld [vmem:[%s6444_s7 + $0x30] sm:$0xff]   ;;  %4226 = vmatpush3.bf16.msra.mxu1 %v4429_v19 }
 0x16b   : > { %v1071_v39 = vpop.f32.mrf.mxu1  ;;  %2028 = vmatmul.mubr.bf16.gmra.mxu1 %v1266_v38  ;;  %4227 = vmatprep.subr.bf16.mxu1 %v4430_v27 }
 0x16c   : > { %v1072_v13 = vadd.f32 %v1071_v39, %v5209_v20  ;;  %v1202_v4 = vmax.f32 %v1070_v36, 0.0 }
 0x16d   : > { %v1075_v41 = vpop.f32.mrf.mxu1 }
 0x16e   : > { %v1203_v43 = vmax.f32 %v1072_v13, 0.0  ;;  %v1270_v49 = vpack.c.bf16 %v1202_v4, %v1198_v44  ;;  %v1076_v52 = vadd.f32 %v1075_v41, %v5219_v25  ;;  %4228 = vmatpush3.bf16.msra.mxu1 %v4430_v27 }
 0x16f   : > { %v1077_v45 = vpop.f32.mrf.mxu1 }
 0x170   : > { %v1271_v46 = vpack.c.bf16 %v1203_v43, %v1199_v42  ;;  %v1078_v51 = vadd.f32 %v1077_v45, %v5209_v20  ;;  %v1206_v8 = vmax.f32 %v1076_v52, 0.0  ;;  %v4431_v42 = vld [vmem:[%s6444_s7 + $0x28] sm:$0xff]  }
 0x171   : > { %v1079_v50 = vpop.f32.mrf.mxu1  ;;  %4229 = vmatprep.subr.bf16.mxu1 %v4431_v42 }
 0x172   : > { %v1080_v18 = vadd.f32 %v1079_v50, %v5219_v25  ;;  %2037 = vmatprep.mubr.bf16.mxu1 %v1271_v46  ;;  %v1207_v56 = vmax.f32 %v1078_v51, 0.0  ;;  %4230 = vmatpush3.bf16.msra.mxu1 %v4431_v42 }
 0x173   : > { %v1081_v33 = vpop.f32.mrf.mxu1  ;;  %2038 = vmatmul.mubr.bf16.gmra.mxu1 %v1270_v49 }
 0x174   : > { %v1082_v55 = vadd.f32 %v1081_v33, %v5209_v20  ;;  %v1210_v53 = vmax.f32 %v1080_v18, 0.0 }
 0x176   : > { %v1211_v57 = vmax.f32 %v1082_v55, 0.0  ;;  %v1274_v59 = vpack.c.bf16 %v1210_v53, %v1206_v8 }
 0x178   : > { %v1275_v58 = vpack.c.bf16 %v1211_v57, %v1207_v56  ;;  %v4432_v57 = vld [vmem:[%s6444_s7 + $0x20] sm:$0xff]  }
 0x179   : > { %4231 = vmatprep.subr.bf16.mxu1 %v4432_v57 }
 0x17a   : > { %2047 = vmatprep.mubr.bf16.mxu1 %v1275_v58  ;;  %4232 = vmatpush3.bf16.msra.mxu1 %v4432_v57 }
 0x17b   : > { %2048 = vmatmul.mubr.bf16.gmra.mxu1 %v1274_v59 }
 0x1a3   : > { %v1706_v61 = vpop.f32.mrf.mxu0 }
 0x1a4   : > { %v1707_v24 = vadd.f32 %v1706_v61, %v5387_v40 }
 0x1a5   : > { %v1708_v62 = vpop.f32.mrf.mxu0 }
 0x1a6   : > { %v1709_v23 = vadd.f32 %v1708_v62, %v5391_v14 }
 0x1a7   : > { %v1710_v63 = vpop.f32.mrf.mxu0 }
 0x1a8   : > { %v1711_v16 = vadd.f32 %v1710_v63, %v5387_v40 }
 0x1a9   : > { %v1712_v0 = vpop.f32.mrf.mxu0 }
 0x1aa   : > { %v1713_v28 = vadd.f32 %v1712_v0, %v5391_v14 }
 0x1ab   : > { %v1716_v1 = vpop.f32.mrf.mxu0 }
 0x1ac   : > { %v1717_v46 = vadd.f32 %v1716_v1, %v5387_v40 }
 0x1ad   : > { %v1718_v3 = vpop.f32.mrf.mxu0 }
 0x1ae   : > { %v1719_v43 = vadd.f32 %v1718_v3, %v5391_v14 }
 0x1af   : > { %v1720_v5 = vpop.f32.mrf.mxu0 }
 0x1b0   : > { %v1721_v44 = vadd.f32 %v1720_v5, %v5387_v40  ;;  %v4433_v5 = vld [vmem:[%s6444_s7 + $0x18] sm:$0xff]  }
 0x1b1   : > { %v1722_v25 = vpop.f32.mrf.mxu0  ;;  %4233 = vmatprep.subr.bf16.mxu1 %v4433_v5 }
 0x1b2   : > { %v1723_v18 = vadd.f32 %v1722_v25, %v5391_v14  ;;  %4234 = vmatpush3.bf16.msra.mxu1 %v4433_v5 }
 0x1b3   : > { %v5366_v48 = vpop.f32.mrf.mxu0 }
 0x1b5   : > { %v5368_v6 = vpop.f32.mrf.mxu0 }
 0x1b6   : > { %v1729_v25 = vadd.f32 %v5368_v6, %v5391_v14 }
 0x1b7   : > { %v5370_v20 = vpop.f32.mrf.mxu0 }
 0x1b8   : > { %v1731_v11 = vadd.f32 %v5370_v20, %v5387_v40 }
 0x1b9   : > { %v5372_v60 = vpop.f32.mrf.mxu0 }
 0x1bb   : > { %v5374_v7 = vpop.f32.mrf.mxu0 }
 0x1bd   : > { %v5376_v10 = vpop.f32.mrf.mxu0 }
 0x1bf   : > { %v5381_v12 = vpop.f32.mrf.mxu0 }
 0x1c1   : > { %v5383_v47 = vpop.f32.mrf.mxu0 }
 0x1c3   : > { %v5393_v17 = vpop.f32.mrf.mxu0  ;;  %v1899_v21 = vpop.f32.mrf.mxu1 }
 0x1c4   : > { %v1900_v29 = vadd.f32 %v1899_v21, %v1707_v24 }
 0x1c5   : > { %v5395_v2 = vpop.f32.mrf.mxu0  ;;  %v1901_v22 = vpop.f32.mrf.mxu1 }
 0x1c6   : > { %v1902_v31 = vadd.f32 %v1901_v22, %v1709_v23  ;;  %v2058_v13 = vmax.f32 %v1900_v29, 0.0  ;;  %v1727_v22 = vadd.f32 %v5366_v48, %v5387_v40 }
 0x1c7   : > { %v5400_v26 = vpop.f32.mrf.mxu0  ;;  %v1903_v9 = vpop.f32.mrf.mxu1 }
 0x1c8   : > { %v1904_v32 = vadd.f32 %v1903_v9, %v1711_v16  ;;  %v2059_v37 = vmax.f32 %v1902_v31, 0.0  ;;  %v1733_v9 = vadd.f32 %v5372_v60, %v5391_v14 }
 0x1c9   : > { %v5403_v15 = vpop.f32.mrf.mxu0  ;;  %v1905_v54 = vpop.f32.mrf.mxu1 }
 0x1ca   : > { %v1906_v38 = vadd.f32 %v1905_v54, %v1713_v28  ;;  %v2060_v34 = vmax.f32 %v1904_v32, 0.0 }
 0x1cb   : > { %v5411_v35 = vpop.f32.mrf.mxu0  ;;  %v1909_v36 = vpop.f32.mrf.mxu1 }
 0x1cc   : > { %v2061_v39 = vmax.f32 %v1906_v38, 0.0  ;;  %v2122_v49 = vpack.c.bf16 %v2060_v34, %v2058_v13  ;;  %v1910_v55 = vadd.f32 %v1909_v36, %v1717_v46 }
 0x1cd   : > { %v5413_v4 = vpop.f32.mrf.mxu0  ;;  %v1911_v41 = vpop.f32.mrf.mxu1 }
 0x1ce   : > { %v2123_v45 = vpack.c.bf16 %v2061_v39, %v2059_v37  ;;  %v1912_v52 = vadd.f32 %v1911_v41, %v1719_v43  ;;  %v2062_v0 = vmax.f32 %v1910_v55, 0.0  ;;  %v1739_v37 = vadd.f32 %v5376_v10, %v5391_v14 }
 0x1cf   : > { %v5421_v50 = vpop.f32.mrf.mxu0  ;;  %v1913_v51 = vpop.f32.mrf.mxu1  ;;  %v1741_v39 = vadd.f32 %v5381_v12, %v5387_v40  ;;  %v1737_v41 = vadd.f32 %v5374_v7, %v5387_v40 }
 0x1d0   : > { %v1914_v33 = vadd.f32 %v1913_v51, %v1721_v44  ;;  %2321 = vmatprep.mubr.bf16.mxu0 %v2123_v45  ;;  %v2063_v62 = vmax.f32 %v1912_v52, 0.0  ;;  %v1743_v45 = vadd.f32 %v5383_v47, %v5391_v14  ;;  %v1749_v47 = vadd.f32 %v5395_v2, %v5391_v14 }
 0x1d1   : > { %v5424_v53 = vpop.f32.mrf.mxu0  ;;  %v1915_v56 = vpop.f32.mrf.mxu1  ;;  %2322 = vmatmul.mubr.bf16.vlgmr.msra.gmra.mxu0 %v2122_v49 }
 0x1d2   : > { %v1916_v8 = vadd.f32 %v1915_v56, %v1723_v18  ;;  %v2064_v58 = vmax.f32 %v1914_v33, 0.0 }
 0x1d3   : > { %v5429_v59 = vpop.f32.mrf.mxu0  ;;  %v1919_v61 = vpop.f32.mrf.mxu1 }
 0x1d4   : > { %v2065_v63 = vmax.f32 %v1916_v8, 0.0  ;;  %v2124_v23 = vpack.c.bf16 %v2064_v58, %v2062_v0  ;;  %v1920_v32 = vadd.f32 %v1919_v61, %v1727_v22  ;;  %v1751_v61 = vadd.f32 %v5400_v26, %v5387_v40 }
 0x1d5   : > { %v5431_v1 = vpop.f32.mrf.mxu0  ;;  %v1921_v3 = vpop.f32.mrf.mxu1 }
 0x1d6   : > { %v2125_v21 = vpack.c.bf16 %v2065_v63, %v2063_v62  ;;  %v1922_v28 = vadd.f32 %v1921_v3, %v1729_v25  ;;  %v2066_v34 = vmax.f32 %v1920_v32, 0.0  ;;  %v1747_v63 = vadd.f32 %v5393_v17, %v5387_v40 }
 0x1d7   : > { %v5442_v16 = vpop.f32.mrf.mxu0  ;;  %v1923_v24 = vpop.f32.mrf.mxu1  ;;  %v1753_v25 = vadd.f32 %v5403_v15, %v5391_v14  ;;  %v1759_v15 = vadd.f32 %v5413_v4, %v5391_v14 }
 0x1d8   : > { %v1924_v31 = vadd.f32 %v1923_v24, %v1731_v11  ;;  %2329 = vmatprep.mubr.bf16.mxu0 %v2125_v21  ;;  %v2067_v27 = vmax.f32 %v1922_v28, 0.0 }
 0x1d9   : > { %v5446_v6 = vpop.f32.mrf.mxu0  ;;  %v1925_v29 = vpop.f32.mrf.mxu1  ;;  %2330 = vmatmul.mubr.bf16.gmra.mxu0 %v2124_v23 }
 0x1da   : > { %v1926_v20 = vadd.f32 %v1925_v29, %v1733_v9  ;;  %v2068_v54 = vmax.f32 %v1924_v31, 0.0 }
 0x1db   : > { %v5448_v48 = vpop.f32.mrf.mxu0  ;;  %v1929_v19 = vpop.f32.mrf.mxu1 }
 0x1dc   : > { %v2069_v38 = vmax.f32 %v1926_v20, 0.0  ;;  %v2126_v42 = vpack.c.bf16 %v2068_v54, %v2066_v34  ;;  %v1930_v51 = vadd.f32 %v1929_v19, %v1737_v41  ;;  %v1761_v54 = vadd.f32 %v5421_v50, %v5387_v40 }
 0x1dd   : > { %v5450_v60 = vpop.f32.mrf.mxu0  ;;  %v1931_v36 = vpop.f32.mrf.mxu1 }
 0x1de   : > { %v2127_v13 = vpack.c.bf16 %v2069_v38, %v2067_v27  ;;  %v1932_v46 = vadd.f32 %v1931_v36, %v1739_v37  ;;  %v2070_v57 = vmax.f32 %v1930_v51, 0.0  ;;  %v1757_v27 = vadd.f32 %v5411_v35, %v5387_v40 }
 0x1df   : > { %v5458_v43 = vpop.f32.mrf.mxu0  ;;  %v1933_v44 = vpop.f32.mrf.mxu1  ;;  %v1763_v37 = vadd.f32 %v5424_v53, %v5391_v14  ;;  %v1769_v53 = vadd.f32 %v5431_v1, %v5391_v14 }
 0x1e0   : > { %v1934_v49 = vadd.f32 %v1933_v44, %v1741_v39  ;;  %2337 = vmatprep.mubr.bf16.mxu0 %v2127_v13  ;;  %v2071_v55 = vmax.f32 %v1932_v46, 0.0 }
 0x1e1   : > { %v5462_v18 = vpop.f32.mrf.mxu0  ;;  %v1935_v10 = vpop.f32.mrf.mxu1  ;;  %2338 = vmatmul.mubr.bf16.gmra.mxu0 %v2126_v42 }
 0x1e2   : > { %v1936_v12 = vadd.f32 %v1935_v10, %v1743_v45  ;;  %v2072_v52 = vmax.f32 %v1934_v49, 0.0 }
 0x1e3   : > { %v5464_v33 = vpop.f32.mrf.mxu0  ;;  %v1939_v7 = vpop.f32.mrf.mxu1 }
 0x1e4   : > { %v2073_v56 = vmax.f32 %v1936_v12, 0.0  ;;  %v2128_v0 = vpack.c.bf16 %v2072_v52, %v2070_v57  ;;  %v1940_v22 = vadd.f32 %v1939_v7, %v1747_v63  ;;  %v1771_v52 = vadd.f32 %v5442_v16, %v5387_v40 }
 0x1e5   : > { %v5466_v8 = vpop.f32.mrf.mxu0  ;;  %v1941_v58 = vpop.f32.mrf.mxu1 }
 0x1e6   : > { %v2129_v62 = vpack.c.bf16 %v2073_v56, %v2071_v55  ;;  %v1942_v11 = vadd.f32 %v1941_v58, %v1749_v47  ;;  %v2074_v32 = vmax.f32 %v1940_v22, 0.0  ;;  %v1767_v55 = vadd.f32 %v5429_v59, %v5387_v40 }
 0x1e7   : > { %v5474_v3 = vpop.f32.mrf.mxu0  ;;  %v1943_v5 = vpop.f32.mrf.mxu1  ;;  %v1773_v47 = vadd.f32 %v5446_v6, %v5391_v14  ;;  %v1779_v6 = vadd.f32 %v5450_v60, %v5391_v14 }
 0x1e8   : > { %v1944_v21 = vadd.f32 %v1943_v5, %v1751_v61  ;;  %2345 = vmatprep.mubr.bf16.mxu0 %v2129_v62  ;;  %v2075_v28 = vmax.f32 %v1942_v11, 0.0 }
 0x1e9   : > { %v5478_v23 = vpop.f32.mrf.mxu0  ;;  %v1945_v2 = vpop.f32.mrf.mxu1  ;;  %2346 = vmatmul.mubr.bf16.gmra.mxu0 %v2128_v0 }
 0x1ea   : > { %v1946_v26 = vadd.f32 %v1945_v2, %v1753_v25  ;;  %v2076_v24 = vmax.f32 %v1944_v21, 0.0 }
 0x1eb   : > { %v5480_v9 = vpop.f32.mrf.mxu0  ;;  %v1949_v17 = vpop.f32.mrf.mxu1 }
 0x1ec   : > { %v2077_v31 = vmax.f32 %v1946_v26, 0.0  ;;  %v2130_v38 = vpack.c.bf16 %v2076_v24, %v2074_v32  ;;  %v1950_v41 = vadd.f32 %v1949_v17, %v1757_v27  ;;  %v1781_v24 = vadd.f32 %v5458_v43, %v5387_v40 }
 0x1ed   : > { %v5482_v29 = vpop.f32.mrf.mxu0  ;;  %v1951_v20 = vpop.f32.mrf.mxu1 }
 0x1ee   : > { %v2131_v19 = vpack.c.bf16 %v2077_v31, %v2075_v28  ;;  %v1952_v39 = vadd.f32 %v1951_v20, %v1759_v15  ;;  %v2078_v51 = vmax.f32 %v1950_v41, 0.0  ;;  %v1777_v28 = vadd.f32 %v5448_v48, %v5387_v40 }
 0x1ef   : > { %v5490_v34 = vpop.f32.mrf.mxu0  ;;  %v1953_v36 = vpop.f32.mrf.mxu1  ;;  %v1783_v15 = vadd.f32 %v5462_v18, %v5391_v14  ;;  %v1789_v18 = vadd.f32 %v5466_v8, %v5391_v14 }
 0x1f0   : > { %v1954_v13 = vadd.f32 %v1953_v36, %v1761_v54  ;;  %2353 = vmatprep.mubr.bf16.mxu0 %v2131_v19  ;;  %v2079_v46 = vmax.f32 %v1952_v39, 0.0 }
 0x1f1   : > { %v5494_v42 = vpop.f32.mrf.mxu0  ;;  %v1955_v4 = vpop.f32.mrf.mxu1  ;;  %2354 = vmatmul.mubr.bf16.gmra.mxu0 %v2130_v38 }
 0x1f2   : > { %v1956_v50 = vadd.f32 %v1955_v4, %v1763_v37  ;;  %v2080_v44 = vmax.f32 %v1954_v13, 0.0 }
 0x1f3   : > { %v5496_v45 = vpop.f32.mrf.mxu0  ;;  %v1959_v35 = vpop.f32.mrf.mxu1 }
 0x1f4   : > { %v2081_v49 = vmax.f32 %v1956_v50, 0.0  ;;  %v2132_v56 = vpack.c.bf16 %v2080_v44, %v2078_v51  ;;  %v1960_v63 = vadd.f32 %v1959_v35, %v1767_v55  ;;  %v1791_v44 = vadd.f32 %v5474_v3, %v5387_v40 }
 0x1f5   : > { %v5498_v10 = vpop.f32.mrf.mxu0  ;;  %v1961_v12 = vpop.f32.mrf.mxu1 }
 0x1f6   : > { %v2133_v7 = vpack.c.bf16 %v2081_v49, %v2079_v46  ;;  %v1962_v61 = vadd.f32 %v1961_v12, %v1769_v53  ;;  %v2082_v22 = vmax.f32 %v1960_v63, 0.0  ;;  %v1787_v46 = vadd.f32 %v5464_v33, %v5387_v40 }
 0x1f7   : > { %v5506_v57 = vpop.f32.mrf.mxu0  ;;  %v1963_v58 = vpop.f32.mrf.mxu1  ;;  %v1793_v12 = vadd.f32 %v5478_v23, %v5391_v14  ;;  %v1799_v23 = vadd.f32 %v5482_v29, %v5391_v14 }
 0x1f8   : > { %v1964_v62 = vadd.f32 %v1963_v58, %v1771_v52  ;;  %2361 = vmatprep.mubr.bf16.mxu0 %v2133_v7  ;;  %v2083_v11 = vmax.f32 %v1962_v61, 0.0 }
 0x1f9   : > { %v5510_v0 = vpop.f32.mrf.mxu0  ;;  %v1965_v1 = vpop.f32.mrf.mxu1  ;;  %2362 = vmatmul.mubr.bf16.gmra.mxu0 %v2132_v56 }
 0x1fa   : > { %v1966_v16 = vadd.f32 %v1965_v1, %v1773_v47  ;;  %v2084_v5 = vmax.f32 %v1964_v62, 0.0  ;;  %v1801_v1 = vadd.f32 %v5490_v34, %v5387_v40 }
 0x1fb   : > { %v5512_v25 = vpop.f32.mrf.mxu0  ;;  %v1969_v59 = vpop.f32.mrf.mxu1 }
 0x1fc   : > { %v2085_v21 = vmax.f32 %v1966_v16, 0.0  ;;  %v2134_v31 = vpack.c.bf16 %v2084_v5, %v2082_v22  ;;  %v1970_v27 = vadd.f32 %v1969_v59, %v1777_v28  ;;  %v1797_v5 = vadd.f32 %v5480_v9, %v5387_v40 }
 0x1fd   : > { %v5514_v2 = vpop.f32.mrf.mxu0  ;;  %v1971_v26 = vpop.f32.mrf.mxu1 }
 0x1fe   : > { %v2135_v17 = vpack.c.bf16 %v2085_v21, %v2083_v11  ;;  %v1972_v54 = vadd.f32 %v1971_v26, %v1779_v6  ;;  %v2086_v41 = vmax.f32 %v1970_v27, 0.0  ;;  %v1803_v21 = vadd.f32 %v5494_v42, %v5391_v14 }
 0x1ff   : > { %v5522_v32 = vpop.f32.mrf.mxu0  ;;  %v1973_v20 = vpop.f32.mrf.mxu1  ;;  %v1809_v42 = vadd.f32 %v5498_v10, %v5391_v14 }
 0x200   : > { %v1974_v19 = vadd.f32 %v1973_v20, %v1781_v24  ;;  %2369 = vmatprep.mubr.bf16.mxu0 %v2135_v17  ;;  %v2087_v39 = vmax.f32 %v1972_v54, 0.0 }
 0x201   : > { %v5526_v38 = vpop.f32.mrf.mxu0  ;;  %v1975_v60 = vpop.f32.mrf.mxu1  ;;  %2370 = vmatmul.mubr.bf16.gmra.mxu0 %v2134_v31 }
 0x202   : > { %v1976_v43 = vadd.f32 %v1975_v60, %v1783_v15  ;;  %v2088_v36 = vmax.f32 %v1974_v19, 0.0  ;;  %v1811_v19 = vadd.f32 %v5506_v57, %v5387_v40  ;;  %v1807_v60 = vadd.f32 %v5496_v45, %v5387_v40  ;;  %v4434_v45 = vld [vmem:[%s6444_s7 + $0x10] sm:$0xff]  }
 0x203   : > { %v5528_v37 = vpop.f32.mrf.mxu0  ;;  %v1979_v48 = vpop.f32.mrf.mxu1  ;;  %4235 = vmatprep.subr.bf16.mxu1 %v4434_v45 }
 0x204   : > { %v2089_v13 = vmax.f32 %v1976_v43, 0.0  ;;  %v2136_v49 = vpack.c.bf16 %v2088_v36, %v2086_v41  ;;  %v1980_v7 = vadd.f32 %v1979_v48, %v1787_v46  ;;  %v1813_v48 = vadd.f32 %v5510_v0, %v5391_v14  ;;  %4236 = vmatpush3.bf16.msra.mxu1 %v4434_v45 }
 0x205   : > { %v5530_v4 = vpop.f32.mrf.mxu0  ;;  %v1981_v50 = vpop.f32.mrf.mxu1 }
 0x206   : > { %v2137_v35 = vpack.c.bf16 %v2089_v13, %v2087_v39  ;;  %v1982_v53 = vadd.f32 %v1981_v50, %v1789_v18  ;;  %v2090_v62 = vmax.f32 %v1980_v7, 0.0  ;;  %v1817_v7 = vadd.f32 %v5512_v25, %v5387_v40 }
 0x207   : > { %v1983_v51 = vpop.f32.mrf.mxu1  ;;  %v5540_v55 = vpop.f32.mrf.mxu0 }
 0x208   : > { %v1984_v52 = vadd.f32 %v1983_v51, %v1791_v44  ;;  %2377 = vmatprep.mubr.bf16.mxu0 %v2137_v35  ;;  %v2091_v47 = vmax.f32 %v1982_v53, 0.0  ;;  %v1821_v53 = vadd.f32 %v5522_v32, %v5387_v40 }
 0x209   : > { %v1985_v56 = vpop.f32.mrf.mxu1  ;;  %2378 = vmatmul.mubr.bf16.gmra.mxu0 %v2136_v49  ;;  %v5542_v33 = vpop.f32.mrf.mxu0 }
 0x20a   : > { %v1986_v8 = vadd.f32 %v1985_v56, %v1793_v12  ;;  %v2092_v58 = vmax.f32 %v1984_v52, 0.0  ;;  %v1819_v12 = vadd.f32 %v5514_v2, %v5391_v14 }
 0x20b   : > { %v1989_v3 = vpop.f32.mrf.mxu1  ;;  %v5552_v6 = vpop.f32.mrf.mxu0 }
 0x20c   : > { %v2093_v61 = vmax.f32 %v1986_v8, 0.0  ;;  %v2138_v59 = vpack.c.bf16 %v2092_v58, %v2090_v62  ;;  %v1990_v24 = vadd.f32 %v1989_v3, %v1797_v5  ;;  %v4435_v58 = vld [vmem:[%s6444_s7 + $0x8] sm:$0xff]   ;;  %v1823_v3 = vadd.f32 %v5526_v38, %v5391_v14 }
 0x20d   : > { %v1991_v63 = vpop.f32.mrf.mxu1  ;;  %v5554_v9 = vpop.f32.mrf.mxu0  ;;  %4237 = vmatprep.subr.bf16.mxu1 %v4435_v58 }
 0x20e   : > { %v2139_v16 = vpack.c.bf16 %v2093_v61, %v2091_v47  ;;  %v1992_v22 = vadd.f32 %v1991_v63, %v1799_v23  ;;  %v2094_v15 = vmax.f32 %v1990_v24, 0.0  ;;  %4238 = vmatpush3.bf16.msra.mxu1 %v4435_v58  ;;  %v1827_v24 = vadd.f32 %v5528_v37, %v5387_v40 }
 0x20f   : > { %v1993_v11 = vpop.f32.mrf.mxu1  ;;  %v5564_v41 = vpop.f32.mrf.mxu0 }
 0x210   : > { %v1994_v26 = vadd.f32 %v1993_v11, %v1801_v1  ;;  %2385 = vmatprep.mubr.bf16.mxu0 %v2139_v16  ;;  %v2095_v31 = vmax.f32 %v1992_v22, 0.0  ;;  %v4436_v1 = vld [vmem:[%s6444_s7] sm:$0xff]   ;;  %v1831_v22 = vadd.f32 %v5540_v55, %v5387_v40 }
 0x211   : > { %v1995_v17 = vpop.f32.mrf.mxu1  ;;  %2386 = vmatmul.mubr.bf16.gmra.mxu0 %v2138_v59  ;;  %v1842_v49 = vpop.f32.mrf.mxu0  ;;  %4239 = vmatprep.subr.bf16.mxu1 %v4436_v1 }
 0x212   : > { %v1996_v29 = vadd.f32 %v1995_v17, %v1803_v21  ;;  %v2096_v28 = vmax.f32 %v1994_v26, 0.0  ;;  %v1829_v21 = vadd.f32 %v5530_v4, %v5391_v14  ;;  %4240 = vmatpush3.bf16.msra.mxu1 %v4436_v1 }
 0x213   : > { %v1999_v34 = vpop.f32.mrf.mxu1  ;;  %v5580_v2 = vpop.f32.mrf.mxu0 }
 0x214   : > { %v2097_v20 = vmax.f32 %v1996_v29, 0.0  ;;  %v2140_v43 = vpack.c.bf16 %v2096_v28, %v2094_v15  ;;  %v2000_v50 = vadd.f32 %v1999_v34, %v1807_v60  ;;  %v1833_v28 = vadd.f32 %v5542_v33, %v5391_v14 }
 0x215   : > { %v2001_v54 = vpop.f32.mrf.mxu1  ;;  %v1848_v38 = vpop.f32.mrf.mxu0  ;;  %v1841_v33 = vadd.f32 %v5564_v41, %v5387_v40 }
 0x216   : > { %v2141_v27 = vpack.c.bf16 %v2097_v20, %v2095_v31  ;;  %v2002_v39 = vadd.f32 %v2001_v54, %v1809_v42  ;;  %v2098_v51 = vmax.f32 %v2000_v50, 0.0 }
 0x217   : > { %v2003_v36 = vpop.f32.mrf.mxu1  ;;  %v1850_v20 = vpop.f32.mrf.mxu0 }
 0x218   : > { %v2004_v13 = vadd.f32 %v2003_v36, %v1811_v19  ;;  %2393 = vmatprep.mubr.bf16.mxu0 %v2141_v27  ;;  %v2099_v35 = vmax.f32 %v2002_v39, 0.0  ;;  %v1839_v36 = vadd.f32 %v5554_v9, %v5391_v14  ;;  %v1837_v39 = vadd.f32 %v5552_v6, %v5387_v40 }
 0x219   : > { %v2005_v18 = vpop.f32.mrf.mxu1  ;;  %2394 = vmatmul.mubr.bf16.gmra.mxu0 %v2140_v43  ;;  %v1852_v60 = vpop.f32.mrf.mxu0  ;;  %v1849_v6 = vadd.f32 %v1848_v38, %v5391_v14 }
 0x21a   : > { %v2006_v10 = vadd.f32 %v2005_v18, %v1813_v48  ;;  %v2100_v44 = vmax.f32 %v2004_v13, 0.0  ;;  %v1843_v18 = vadd.f32 %v1842_v49, %v5391_v14 }
 0x21b   : > { %v2009_v57 = vpop.f32.mrf.mxu1 }
 0x21c   : > { %v2101_v46 = vmax.f32 %v2006_v10, 0.0  ;;  %v2142_v56 = vpack.c.bf16 %v2100_v44, %v2098_v51  ;;  %v2010_v32 = vadd.f32 %v2009_v57, %v1817_v7  ;;  %v1856_v57 = vpop.f32.mrf.mxu0  ;;  %v1851_v7 = vadd.f32 %v1850_v20, %v5387_v40 }
 0x21d   : > { %v2011_v0 = vpop.f32.mrf.mxu1 }
 0x21e   : > { %v2143_v52 = vpack.c.bf16 %v2101_v46, %v2099_v35  ;;  %v2012_v47 = vadd.f32 %v2011_v0, %v1819_v12  ;;  %v2102_v59 = vmax.f32 %v2010_v32, 0.0  ;;  %v1858_v12 = vpop.f32.mrf.mxu0 }
 0x21f   : > { %v2013_v8 = vpop.f32.mrf.mxu1 }
 0x220   : > { %v2014_v61 = vadd.f32 %v2013_v8, %v1821_v53  ;;  %2401 = vmatprep.mubr.bf16.mxu0 %v2143_v52  ;;  %v2103_v16 = vmax.f32 %v2012_v47, 0.0  ;;  %v1860_v32 = vpop.f32.mrf.mxu0 }
 0x221   : > { %v2015_v62 = vpop.f32.mrf.mxu1  ;;  %2402 = vmatmul.mubr.bf16.gmra.mxu0 %v2142_v56  ;;  %v1847_v56 = vadd.f32 %v5580_v2, %v5387_v40  ;;  %v1859_v2 = vadd.f32 %v1858_v12, %v5391_v14 }
 0x222   : > { %v2016_v63 = vadd.f32 %v2015_v62, %v1823_v3  ;;  %v2104_v25 = vmax.f32 %v2014_v61, 0.0  ;;  %v1853_v3 = vadd.f32 %v1852_v60, %v5391_v14  ;;  %v1862_v38 = vpop.f32.mrf.mxu0  ;;  %v3344_v60 = vld [vmem:[%s5616_s27 + $0x18] sm:$0xff] }
 0x223   : > { %v2019_v23 = vpop.f32.mrf.mxu1 }
 0x224   : > { %v2105_v5 = vmax.f32 %v2016_v63, 0.0  ;;  %v2144_v17 = vpack.c.bf16 %v2104_v25, %v2102_v59  ;;  %v2020_v15 = vadd.f32 %v2019_v23, %v1827_v24 }
 0x225   : > { %v2021_v11 = vpop.f32.mrf.mxu1 }
 0x226   : > { %v2145_v26 = vpack.c.bf16 %v2105_v5, %v2103_v16  ;;  %v2022_v34 = vadd.f32 %v2021_v11, %v1829_v21  ;;  %v2106_v43 = vmax.f32 %v2020_v15, 0.0  ;;  %v1861_v21 = vadd.f32 %v1860_v32, %v5387_v40 }
 0x227   : > { %v2023_v29 = vpop.f32.mrf.mxu1 }
 0x228   : > { %v2024_v31 = vadd.f32 %v2023_v29, %v1831_v22  ;;  %2409 = vmatprep.mubr.bf16.mxu0 %v2145_v26  ;;  %v2107_v19 = vmax.f32 %v2022_v34, 0.0  ;;  %v1857_v26 = vadd.f32 %v1856_v57, %v5387_v40  ;;  %v1863_v29 = vadd.f32 %v1862_v38, %v5391_v14  ;;  %v3342_v40 = vld [vmem:[%s5616_s27 + $0x8] sm:$0xff]  ;;  %v3343_v14 = vld [vmem:[%s5616_s27 + $0x10] sm:$0xff] }
 0x229   : > { %v2025_v54 = vpop.f32.mrf.mxu1  ;;  %2410 = vmatmul.mubr.bf16.gmra.mxu0 %v2144_v17  ;;  %3377 = vperm.xlu1 %4288, %v3342_v40  }
 0x22a   : > { %v2026_v4 = vadd.f32 %v2025_v54, %v1833_v28  ;;  %v2108_v42 = vmax.f32 %v2024_v31, 0.0 }
 0x22b   : > { %v2029_v55 = vpop.f32.mrf.mxu1 }
 0x22c   : > { %v2109_v27 = vmax.f32 %v2026_v4, 0.0  ;;  %v2146_v13 = vpack.c.bf16 %v2108_v42, %v2106_v43  ;;  %v2030_v45 = vadd.f32 %v2029_v55, %v1837_v39  ;;  %v3345_v43 = vld [vmem:[%s5616_s27 + $0x20] sm:$0xff]  ;;  %v3351_v39 = vld [vmem:[%s5616_s27 + $0x50] sm:$0xff] }
 0x22d   : > { %v2031_v37 = vpop.f32.mrf.mxu1  ;;  %3380 = vperm.xlu1 %4288, %v3343_v14  }
 0x22e   : > { %v2147_v48 = vpack.c.bf16 %v2109_v27, %v2107_v19  ;;  %v2032_v10 = vadd.f32 %v2031_v37, %v1839_v36  ;;  %v2110_v53 = vmax.f32 %v2030_v45, 0.0  ;;  %v3346_v37 = vld [vmem:[%s5616_s27 + $0x28] sm:$0xff]  ;;  %v3347_v36 = vld [vmem:[%s5616_s27 + $0x30] sm:$0xff]  ;;  %v5635_v45 = vld [vmem:[%s6443_s6] ss:$0 sm:$0xff] }
 0x22f   : > { %v2033_v50 = vpop.f32.mrf.mxu1 }
 0x230   : > { %v2034_v44 = vadd.f32 %v2033_v50, %v1841_v33  ;;  %2417 = vmatprep.mubr.bf16.mxu0 %v2147_v48  ;;  %v2111_v0 = vmax.f32 %v2032_v10, 0.0  ;;  %v3348_v33 = vld [vmem:[%s5616_s27 + $0x38] sm:$0xff]  ;;  %v3349_v48 = vld [vmem:[%s5616_s27 + $0x40] sm:$0xff]  ;;  %v3355_v10 = vld [vmem:[%s5616_s27 + $0x70] sm:$0xff] }
 0x231   : > { %v2035_v35 = vpop.f32.mrf.mxu1  ;;  %2418 = vmatmul.mubr.bf16.gmra.mxu0 %v2146_v13  ;;  %3383 = vperm.xlu1 %4288, %v3344_v60   ;;  %v3341_v13 = vld [vmem:[%s5616_s27] sm:$0xff] }
 0x232   : > { %v2036_v46 = vadd.f32 %v2035_v35, %v1843_v18  ;;  %v2112_v9 = vmax.f32 %v2034_v44, 0.0  ;;  %3374 = vperm.xlu0 %4287, %v3341_v13   ;;  %v3353_v50 = vld [vmem:[%s5616_s27 + $0x60] sm:$0xff]  ;;  %v3350_v18 = vld [vmem:[%s5616_s27 + $0x48] sm:$0xff]  ;;  %v3352_v44 = vld [vmem:[%s5616_s27 + $0x58] sm:$0xff] }
 0x233   : > { %v2039_v51 = vpop.f32.mrf.mxu1 }
 0x234   : > { %v2113_v41 = vmax.f32 %v2036_v46, 0.0  ;;  %v2148_v8 = vpack.c.bf16 %v2112_v9, %v2110_v53  ;;  %v2040_v62 = vadd.f32 %v2039_v51, %v1847_v56  ;;  %v3357_v9 = vld [vmem:[%s5616_s27 + $0x80] sm:$0xff]  ;;  %v3354_v51 = vld [vmem:[%s5616_s27 + $0x68] sm:$0xff] }
 0x235   : > { %v2041_v52 = vpop.f32.mrf.mxu1  ;;  %3386 = vperm.xlu1 %4288, %v3345_v43  }
 0x236   : > { %v2149_v49 = vpack.c.bf16 %v2113_v41, %v2111_v0  ;;  %v2042_v47 = vadd.f32 %v2041_v52, %v1849_v6  ;;  %v2114_v59 = vmax.f32 %v2040_v62, 0.0  ;;  %3401 = vperm.xlu0 %4287, %v3350_v18   ;;  %v3359_v6 = vld [vmem:[%s5616_s27 + $0x90] sm:$0xff]  ;;  %v3370_v18 = vld [vmem:[%s5616_s27 + $0xe8] sm:$0xff] }
 0x237   : > { %v2043_v58 = vpop.f32.mrf.mxu1 }
 0x238   : > { %v2044_v61 = vadd.f32 %v2043_v58, %v1851_v7  ;;  %2425 = vmatprep.mubr.bf16.mxu0 %v2149_v49  ;;  %v2115_v16 = vmax.f32 %v2042_v47, 0.0  ;;  %v3356_v7 = vld [vmem:[%s5616_s27 + $0x78] sm:$0xff]  ;;  %v3358_v58 = vld [vmem:[%s5616_s27 + $0x88] sm:$0xff] }
 0x239   : > { %v2045_v63 = vpop.f32.mrf.mxu1  ;;  %2426 = vmatmul.mubr.bf16.gmra.mxu0 %v2148_v8  ;;  %3389 = vperm.xlu1 %4288, %v3346_v37   ;;  %v3361_v8 = vld [vmem:[%s5616_s27 + $0xa0] sm:$0xff]  ;;  %v3371_v37 = vld [vmem:[%s5616_s27 + $0xf0] sm:$0xff] }
 0x23a   : > { %v2046_v25 = vadd.f32 %v2045_v63, %v1853_v3  ;;  %v2116_v23 = vmax.f32 %v2044_v61, 0.0  ;;  %3407 = vperm.xlu0 %4287, %v3352_v44  }
 0x23b   : > { %v2049_v1 = vpop.f32.mrf.mxu1 }
 0x23c   : > { %v2117_v5 = vmax.f32 %v2046_v25, 0.0  ;;  %v2150_v24 = vpack.c.bf16 %v2116_v23, %v2114_v59  ;;  %v2050_v31 = vadd.f32 %v2049_v1, %v1857_v26  ;;  %v3363_v25 = vld [vmem:[%s5616_s27 + $0xb0] sm:$0xff]  ;;  %v3360_v23 = vld [vmem:[%s5616_s27 + $0x98] sm:$0xff] }
 0x23d   : > { %v2051_v11 = vpop.f32.mrf.mxu1  ;;  %3392 = vperm.xlu1 %4288, %v3347_v36   ;;  %v3368_v36 = vld [vmem:[%s5616_s27 + $0xd8] sm:$0xff] }
 0x23e   : > { %v2151_v22 = vpack.c.bf16 %v2117_v5, %v2115_v16  ;;  %v2052_v28 = vadd.f32 %v2051_v11, %v1859_v2  ;;  %v2118_v55 = vmax.f32 %v2050_v31, 0.0  ;;  %3413 = vperm.xlu0 %4287, %v3354_v51   ;;  %v3365_v11 = vld [vmem:[%s5616_s27 + $0xc0] sm:$0xff]  ;;  %v3362_v2 = vld [vmem:[%s5616_s27 + $0xa8] sm:$0xff]  ;;  %v3372_v51 = vld [vmem:[%s5616_s27 + $0xf8] sm:$0xff] }
 0x23f   : > { %v2053_v17 = vpop.f32.mrf.mxu1 }
 0x240   : > { %v2054_v34 = vadd.f32 %v2053_v17, %v1861_v21  ;;  %2433 = vmatprep.mubr.bf16.mxu0 %v2151_v22  ;;  %v2119_v4 = vmax.f32 %v2052_v28, 0.0  ;;  %v3367_v28 = vld [vmem:[%s5616_s27 + $0xd0] sm:$0xff] }
 0x241   : > { %v2055_v20 = vpop.f32.mrf.mxu1  ;;  %2434 = vmatmul.mubr.bf16.gmra.mxu0 %v2150_v24  ;;  %3395 = vperm.xlu1 %4288, %v3348_v33  }
 0x242   : > { %v2056_v15 = vadd.f32 %v2055_v20, %v1863_v29  ;;  %v2120_v54 = vmax.f32 %v2054_v34, 0.0  ;;  %3419 = vperm.xlu0 %4287, %v3356_v7   ;;  %v3364_v34 = vld [vmem:[%s5616_s27 + $0xb8] sm:$0xff] }
 0x244   : > { %v2121_v42 = vmax.f32 %v2056_v15, 0.0  ;;  %v2152_v27 = vpack.c.bf16 %v2120_v54, %v2118_v55  ;;  %v3366_v55 = vld [vmem:[%s5616_s27 + $0xc8] sm:$0xff] }
 0x245   : > { %3398 = vperm.xlu1 %4288, %v3349_v48  }
 0x246   : > { %v2153_v19 = vpack.c.bf16 %v2121_v42, %v2119_v4  ;;  %3425 = vperm.xlu0 %4287, %v3358_v58   ;;  %v3369_v42 = vld [vmem:[%s5616_s27 + $0xe0] sm:$0xff] }
 0x248   : > { %2441 = vmatprep.mubr.bf16.mxu0 %v2153_v19 }
 0x249   : > { %2442 = vmatmul.mubr.bf16.gmra.mxu0 %v2152_v27  ;;  %3404 = vperm.xlu1 %4288, %v3351_v39  }
 0x24a   : > { %3431 = vperm.xlu0 %4287, %v3360_v23  }
 0x24d   : > { %3410 = vperm.xlu1 %4288, %v3353_v50  }
 0x24e   : > { %3437 = vperm.xlu0 %4287, %v3362_v2  }
 0x251   : > { %3416 = vperm.xlu1 %4288, %v3355_v10  }
 0x252   : > { %3443 = vperm.xlu0 %4287, %v3364_v34  }
 0x255   : > { %3422 = vperm.xlu1 %4288, %v3357_v9  }
 0x256   : > { %3449 = vperm.xlu0 %4287, %v3366_v55  }
 0x259   : > { %3428 = vperm.xlu1 %4288, %v3359_v6  }
 0x25a   : > { %3455 = vperm.xlu0 %4287, %v3368_v36  }
 0x25d   : > { %3434 = vperm.xlu1 %4288, %v3361_v8  }
 0x25e   : > { %3461 = vperm.xlu0 %4287, %v3370_v18  }
 0x261   : > { %3440 = vperm.xlu1 %4288, %v3363_v25  }
 0x262   : > { %3467 = vperm.xlu0 %4287, %v3372_v51  }
 0x265   : > { %3446 = vperm.xlu1 %4288, %v3365_v11  }
 0x269   : > { %3452 = vperm.xlu1 %4288, %v3367_v28  }
 0x26d   : > { %3458 = vperm.xlu1 %4288, %v3369_v42  }
 0x271   : > { %3464 = vperm.xlu1 %4288, %v3371_v37  }
 0x291   : > { %v4105_v57 = vpop.f32.mrf.mxu0 }
 0x293   : > { %v4106_v35 = vpop.f32.mrf.mxu0 }
 0x294   : > { %v4107_v46 = vadd.f32 %v4106_v35, %v4105_v57 }
 0x295   : > { %v4108_v0 = vpop.f32.mrf.mxu0 }
 0x296   : > { %v2324_v41 = vadd.f32 %v4107_v46, %v5635_v45 }
 0x297   : > { %v4109_v12 = vpop.f32.mrf.mxu0 }
 0x298   : > { %v2450_v53 = vmax.f32 %v2324_v41, 0.0  ;;  %v4110_v52 = vadd.f32 %v4109_v12, %v4108_v0 }
 0x299   : > { %v4111_v49 = vpop.f32.mrf.mxu0 }
 0x29a   : > { %2482 = vst [vmem:[%s5644_s30] sm:$0xff] %v2450_v53  ;;  %v2327_v56 = vadd.f32 %v4110_v52, %v5635_v45 }
 0x29b   : > { %v4112_v3 = vpop.f32.mrf.mxu0 }
 0x29c   : > { %v2451_v47 = vmax.f32 %v2327_v56, 0.0  ;;  %v4113_v61 = vadd.f32 %v4112_v3, %v4111_v49 }
 0x29d   : > { %v4114_v32 = vpop.f32.mrf.mxu0 }
 0x29e   : > { %2483 = vst [vmem:[%s5644_s30 + $0x8] sm:$0xff] %v2451_v47  ;;  %v2332_v62 = vadd.f32 %v4113_v61, %v5635_v45  ;;  %v2514_v63 = vpack.c.bf16 %v2451_v47, %v2450_v53 }
 0x29f   : > { %v4115_v1 = vpop.f32.mrf.mxu0 }
 0x2a0   : > { %v2452_v16 = vmax.f32 %v2332_v62, 0.0  ;;  %v4116_v5 = vadd.f32 %v4115_v1, %v4114_v32  ;;  %4241 = vmatprep.mubr.bf16.mxu1 %v2514_v63 }
 0x2a1   : > { %v4117_v38 = vpop.f32.mrf.mxu0 }
 0x2a2   : > { %2484 = vst [vmem:[%s5644_s30 + $0x10] sm:$0xff] %v2452_v16  ;;  %v2335_v59 = vadd.f32 %v4116_v5, %v5635_v45 }
 0x2a3   : > { %v4118_v21 = vpop.f32.mrf.mxu0 }
 0x2a4   : > { %v2453_v22 = vmax.f32 %v2335_v59, 0.0  ;;  %v4119_v26 = vadd.f32 %v4118_v21, %v4117_v38 }
 0x2a5   : > { %v4120_v24 = vpop.f32.mrf.mxu0 }
 0x2a6   : > { %2485 = vst [vmem:[%s5644_s30 + $0x18] sm:$0xff] %v2453_v22  ;;  %v2515_v17 = vpack.c.bf16 %v2453_v22, %v2452_v16  ;;  %v2340_v29 = vadd.f32 %v4119_v26, %v5635_v45 }
 0x2a7   : > { %v4121_v31 = vpop.f32.mrf.mxu0 }
 0x2a8   : > { %v2454_v20 = vmax.f32 %v2340_v29, 0.0  ;;  %v4122_v15 = vadd.f32 %v4121_v31, %v4120_v24  ;;  %4242 = vmatmul.mubr.bf16.vlgmr.msra.gmra.mxu1 %v2515_v17 }
 0x2a9   : > { %v4123_v54 = vpop.f32.mrf.mxu0 }
 0x2aa   : > { %2486 = vst [vmem:[%s5644_s30 + $0x20] sm:$0xff] %v2454_v20  ;;  %v2343_v4 = vadd.f32 %v4122_v15, %v5635_v45 }
 0x2ab   : > { %v4124_v19 = vpop.f32.mrf.mxu0 }
 0x2ac   : > { %v2455_v27 = vmax.f32 %v2343_v4, 0.0  ;;  %v4125_v40 = vadd.f32 %v4124_v19, %v4123_v54 }
 0x2ad   : > { %v4126_v14 = vpop.f32.mrf.mxu0 }
 0x2ae   : > { %2487 = vst [vmem:[%s5644_s30 + $0x28] sm:$0xff] %v2455_v27  ;;  %v2348_v60 = vadd.f32 %v4125_v40, %v5635_v45  ;;  %v2516_v43 = vpack.c.bf16 %v2455_v27, %v2454_v20 }
 0x2af   : > { %v4127_v33 = vpop.f32.mrf.mxu0 }
 0x2b0   : > { %v2456_v48 = vmax.f32 %v2348_v60, 0.0  ;;  %v4128_v39 = vadd.f32 %v4127_v33, %v4126_v14  ;;  %4245 = vmatprep.mubr.bf16.mxu1 %v2516_v43 }
 0x2b1   : > { %v4129_v13 = vpop.f32.mrf.mxu0 }
 0x2b2   : > { %2488 = vst [vmem:[%s5644_s30 + $0x30] sm:$0xff] %v2456_v48  ;;  %v2351_v50 = vadd.f32 %v4128_v39, %v5635_v45 }
 0x2b3   : > { %v4130_v10 = vpop.f32.mrf.mxu0 }
 0x2b4   : > { %v2457_v44 = vmax.f32 %v2351_v50, 0.0  ;;  %v4131_v57 = vadd.f32 %v4130_v10, %v4129_v13 }
 0x2b5   : > { %v4132_v35 = vpop.f32.mrf.mxu0 }
 0x2b6   : > { %2489 = vst [vmem:[%s5644_s30 + $0x38] sm:$0xff] %v2457_v44  ;;  %v2517_v46 = vpack.c.bf16 %v2457_v44, %v2456_v48  ;;  %v2356_v9 = vadd.f32 %v4131_v57, %v5635_v45 }
 0x2b7   : > { %v4133_v0 = vpop.f32.mrf.mxu0 }
 0x2b8   : > { %v2458_v41 = vmax.f32 %v2356_v9, 0.0  ;;  %v4134_v12 = vadd.f32 %v4133_v0, %v4132_v35  ;;  %4246 = vmatmul.mubr.bf16.gmra.mxu1 %v2517_v46 }
 0x2b9   : > { %v4135_v53 = vpop.f32.mrf.mxu0 }
 0x2ba   : > { %2490 = vst [vmem:[%s5644_s30 + $0x40] sm:$0xff] %v2458_v41  ;;  %v2359_v52 = vadd.f32 %v4134_v12, %v5635_v45 }
 0x2bb   : > { %v4136_v6 = vpop.f32.mrf.mxu0 }
 0x2bc   : > { %v2459_v7 = vmax.f32 %v2359_v52, 0.0  ;;  %v4137_v49 = vadd.f32 %v4136_v6, %v4135_v53 }
 0x2bd   : > { %v4138_v56 = vpop.f32.mrf.mxu0 }
 0x2be   : > { %2491 = vst [vmem:[%s5644_s30 + $0x48] sm:$0xff] %v2459_v7  ;;  %v2364_v8 = vadd.f32 %v4137_v49, %v5635_v45  ;;  %v2518_v58 = vpack.c.bf16 %v2459_v7, %v2458_v41 }
 0x2bf   : > { %v4139_v3 = vpop.f32.mrf.mxu0 }
 0x2c0   : > { %v2460_v47 = vmax.f32 %v2364_v8, 0.0  ;;  %v4140_v61 = vadd.f32 %v4139_v3, %v4138_v56  ;;  %4249 = vmatprep.mubr.bf16.mxu1 %v2518_v58 }
 0x2c1   : > { %v4141_v32 = vpop.f32.mrf.mxu0 }
 0x2c2   : > { %2492 = vst [vmem:[%s5644_s30 + $0x50] sm:$0xff] %v2460_v47  ;;  %v2367_v62 = vadd.f32 %v4140_v61, %v5635_v45 }
 0x2c3   : > { %v4142_v63 = vpop.f32.mrf.mxu0 }
 0x2c4   : > { %v2461_v25 = vmax.f32 %v2367_v62, 0.0  ;;  %v4143_v23 = vadd.f32 %v4142_v63, %v4141_v32 }
 0x2c5   : > { %v4144_v1 = vpop.f32.mrf.mxu0 }
 0x2c6   : > { %2493 = vst [vmem:[%s5644_s30 + $0x58] sm:$0xff] %v2461_v25  ;;  %v2519_v16 = vpack.c.bf16 %v2461_v25, %v2460_v47  ;;  %v2372_v5 = vadd.f32 %v4143_v23, %v5635_v45 }
 0x2c7   : > { %v4145_v38 = vpop.f32.mrf.mxu0 }
 0x2c8   : > { %v2462_v59 = vmax.f32 %v2372_v5, 0.0  ;;  %v4146_v11 = vadd.f32 %v4145_v38, %v4144_v1  ;;  %4250 = vmatmul.mubr.bf16.gmra.mxu1 %v2519_v16 }
 0x2c9   : > { %v4147_v2 = vpop.f32.mrf.mxu0 }
 0x2ca   : > { %2494 = vst [vmem:[%s5644_s30 + $0x60] sm:$0xff] %v2462_v59  ;;  %v2375_v21 = vadd.f32 %v4146_v11, %v5635_v45 }
 0x2cb   : > { %v4148_v22 = vpop.f32.mrf.mxu0 }
 0x2cc   : > { %v2463_v26 = vmax.f32 %v2375_v21, 0.0  ;;  %v4149_v24 = vadd.f32 %v4148_v22, %v4147_v2 }
 0x2cd   : > { %v4150_v17 = vpop.f32.mrf.mxu0 }
 0x2ce   : > { %2495 = vst [vmem:[%s5644_s30 + $0x68] sm:$0xff] %v2463_v26  ;;  %v2380_v29 = vadd.f32 %v4149_v24, %v5635_v45  ;;  %v2520_v28 = vpack.c.bf16 %v2463_v26, %v2462_v59 }
 0x2cf   : > { %v4151_v34 = vpop.f32.mrf.mxu0 }
 0x2d0   : > { %v2464_v31 = vmax.f32 %v2380_v29, 0.0  ;;  %v4152_v20 = vadd.f32 %v4151_v34, %v4150_v17  ;;  %4253 = vmatprep.mubr.bf16.mxu1 %v2520_v28 }
 0x2d1   : > { %v4153_v15 = vpop.f32.mrf.mxu0 }
 0x2d2   : > { %2496 = vst [vmem:[%s5644_s30 + $0x70] sm:$0xff] %v2464_v31  ;;  %v2383_v54 = vadd.f32 %v4152_v20, %v5635_v45 }
 0x2d3   : > { %v4154_v4 = vpop.f32.mrf.mxu0 }
 0x2d4   : > { %v2465_v42 = vmax.f32 %v2383_v54, 0.0  ;;  %v4155_v55 = vadd.f32 %v4154_v4, %v4153_v15 }
 0x2d5   : > { %v4156_v19 = vpop.f32.mrf.mxu0 }
 0x2d6   : > { %2497 = vst [vmem:[%s5644_s30 + $0x78] sm:$0xff] %v2465_v42  ;;  %v2521_v27 = vpack.c.bf16 %v2465_v42, %v2464_v31  ;;  %v2388_v40 = vadd.f32 %v4155_v55, %v5635_v45 }
 0x2d7   : > { %v4157_v14 = vpop.f32.mrf.mxu0 }
 0x2d8   : > { %v2466_v60 = vmax.f32 %v2388_v40, 0.0  ;;  %v4158_v43 = vadd.f32 %v4157_v14, %v4156_v19  ;;  %4254 = vmatmul.mubr.bf16.gmra.mxu1 %v2521_v27 }
 0x2d9   : > { %v4159_v37 = vpop.f32.mrf.mxu0 }
 0x2da   : > { %2498 = vst [vmem:[%s5644_s30 + $0x80] sm:$0xff] %v2466_v60  ;;  %v2391_v36 = vadd.f32 %v4158_v43, %v5635_v45 }
 0x2db   : > { %v4160_v33 = vpop.f32.mrf.mxu0 }
 0x2dc   : > { %v2467_v48 = vmax.f32 %v2391_v36, 0.0  ;;  %v4161_v39 = vadd.f32 %v4160_v33, %v4159_v37 }
 0x2dd   : > { %v4162_v13 = vpop.f32.mrf.mxu0 }
 0x2de   : > { %2499 = vst [vmem:[%s5644_s30 + $0x88] sm:$0xff] %v2467_v48  ;;  %v2396_v50 = vadd.f32 %v4161_v39, %v5635_v45  ;;  %v2522_v18 = vpack.c.bf16 %v2467_v48, %v2466_v60 }
 0x2df   : > { %v4163_v10 = vpop.f32.mrf.mxu0 }
 0x2e0   : > { %v2468_v44 = vmax.f32 %v2396_v50, 0.0  ;;  %v4164_v57 = vadd.f32 %v4163_v10, %v4162_v13  ;;  %4257 = vmatprep.mubr.bf16.mxu1 %v2522_v18 }
 0x2e1   : > { %v4165_v35 = vpop.f32.mrf.mxu0 }
 0x2e2   : > { %2500 = vst [vmem:[%s5644_s30 + $0x90] sm:$0xff] %v2468_v44  ;;  %v2399_v46 = vadd.f32 %v4164_v57, %v5635_v45 }
 0x2e3   : > { %v4166_v9 = vpop.f32.mrf.mxu0 }
 0x2e4   : > { %v2469_v51 = vmax.f32 %v2399_v46, 0.0  ;;  %v4167_v0 = vadd.f32 %v4166_v9, %v4165_v35 }
 0x2e5   : > { %v4168_v41 = vpop.f32.mrf.mxu0 }
 0x2e6   : > { %2501 = vst [vmem:[%s5644_s30 + $0x98] sm:$0xff] %v2469_v51  ;;  %v2523_v12 = vpack.c.bf16 %v2469_v51, %v2468_v44  ;;  %v2404_v53 = vadd.f32 %v4167_v0, %v5635_v45 }
 0x2e7   : > { %v4169_v52 = vpop.f32.mrf.mxu0 }
 0x2e8   : > { %v2470_v6 = vmax.f32 %v2404_v53, 0.0  ;;  %v4170_v7 = vadd.f32 %v4169_v52, %v4168_v41  ;;  %4258 = vmatmul.mubr.bf16.gmra.mxu1 %v2523_v12  ;;  %v5728_v53 = vld [vmem:[%s6445_s8] ss:$0 sm:$0xff] }
 0x2e9   : > { %v4171_v49 = vpop.f32.mrf.mxu0 }
 0x2ea   : > { %2502 = vst [vmem:[%s5644_s30 + $0xa0] sm:$0xff] %v2470_v6  ;;  %v2407_v56 = vadd.f32 %v4170_v7, %v5635_v45 }
 0x2eb   : > { %v4172_v8 = vpop.f32.mrf.mxu0 }
 0x2ec   : > { %v2471_v58 = vmax.f32 %v2407_v56, 0.0  ;;  %v4173_v3 = vadd.f32 %v4172_v8, %v4171_v49 }
 0x2ed   : > { %v4174_v47 = vpop.f32.mrf.mxu0 }
 0x2ee   : > { %2503 = vst [vmem:[%s5644_s30 + $0xa8] sm:$0xff] %v2471_v58  ;;  %v2412_v61 = vadd.f32 %v4173_v3, %v5635_v45  ;;  %v2524_v32 = vpack.c.bf16 %v2471_v58, %v2470_v6 }
 0x2ef   : > { %v4175_v62 = vpop.f32.mrf.mxu0 }
 0x2f0   : > { %v2472_v63 = vmax.f32 %v2412_v61, 0.0  ;;  %v4176_v25 = vadd.f32 %v4175_v62, %v4174_v47  ;;  %4261 = vmatprep.mubr.bf16.mxu1 %v2524_v32  ;;  %v5734_v62 = vpop.permute.xlu1 %3377 }
 0x2f1   : > { %v4177_v23 = vpop.f32.mrf.mxu0 }
 0x2f2   : > { %2504 = vst [vmem:[%s5644_s30 + $0xb0] sm:$0xff] %v2472_v63  ;;  %v2415_v1 = vadd.f32 %v4176_v25, %v5635_v45 }
 0x2f3   : > { %v4178_v16 = vpop.f32.mrf.mxu0 }
 0x2f4   : > { %v2473_v5 = vmax.f32 %v2415_v1, 0.0  ;;  %v4179_v38 = vadd.f32 %v4178_v16, %v4177_v23  ;;  %v3381_v1 = vpop.permute.xlu1 %3380 }
 0x2f5   : > { %v4180_v59 = vpop.f32.mrf.mxu0 }
 0x2f6   : > { %2505 = vst [vmem:[%s5644_s30 + $0xb8] sm:$0xff] %v2473_v5  ;;  %v2525_v11 = vpack.c.bf16 %v2473_v5, %v2472_v63  ;;  %v2420_v2 = vadd.f32 %v4179_v38, %v5635_v45 }
 0x2f7   : > { %v4181_v21 = vpop.f32.mrf.mxu0 }
 0x2f8   : > { %v2474_v22 = vmax.f32 %v2420_v2, 0.0  ;;  %v4182_v26 = vadd.f32 %v4181_v21, %v4180_v59  ;;  %4262 = vmatmul.mubr.bf16.gmra.mxu1 %v2525_v11 }
 0x2f9   : > { %v4183_v24 = vpop.f32.mrf.mxu0 }
 0x2fa   : > { %2506 = vst [vmem:[%s5644_s30 + $0xc0] sm:$0xff] %v2474_v22  ;;  %v2423_v17 = vadd.f32 %v4182_v26, %v5635_v45 }
 0x2fb   : > { %v4184_v29 = vpop.f32.mrf.mxu0 }
 0x2fc   : > { %v2475_v28 = vmax.f32 %v2423_v17, 0.0  ;;  %v4185_v34 = vadd.f32 %v4184_v29, %v4183_v24 }
 0x2fd   : > { %v4186_v31 = vpop.f32.mrf.mxu0 }
 0x2fe   : > { %2507 = vst [vmem:[%s5644_s30 + $0xc8] sm:$0xff] %v2475_v28  ;;  %v2428_v20 = vadd.f32 %v4185_v34, %v5635_v45  ;;  %v2526_v15 = vpack.c.bf16 %v2475_v28, %v2474_v22 }
 0x2ff   : > { %v4187_v54 = vpop.f32.mrf.mxu0 }
 0x300   : > { %v2476_v4 = vmax.f32 %v2428_v20, 0.0  ;;  %v4188_v42 = vadd.f32 %v4187_v54, %v4186_v31  ;;  %4265 = vmatprep.mubr.bf16.mxu1 %v2526_v15  ;;  %v5740_v20 = vpop.permute.xlu1 %3383  ;;  %v5743_v15 = vand.u32 127, %v509_v30 }
 0x301   : > { %v4189_v55 = vpop.f32.mrf.mxu0 }
 0x302   : > { %2508 = vst [vmem:[%s5644_s30 + $0xd0] sm:$0xff] %v2476_v4  ;;  %v2431_v19 = vadd.f32 %v4188_v42, %v5635_v45  ;;  %vm3471_vm1 = vcmp.eq.s32.totalorder %v5743_v15, %v3381_v1  ;;  %vm2988_vm3 = vcmp.lt.s32.totalorder %v5743_v15, 8  ;;  %vm3472_vm4 = vcmp.eq.s32.totalorder %v5743_v15, %v5740_v20 }
 0x303   : > { %v4190_v27 = vpop.f32.mrf.mxu0  ;;  %vm3470_vm5 = vcmp.eq.s32.totalorder %v5743_v15, %v5734_v62 }
 0x304   : > { %v2477_v40 = vmax.f32 %v2431_v19, 0.0  ;;  %v4191_v14 = vadd.f32 %v4190_v27, %v4189_v55  ;;  %v5746_v42 = vpop.permute.xlu1 %3386  ;;  %v3375_v55 = vpop.permute.xlu0 %3374  ;;  %v4702_v19 = vmov 0.0  }
 0x305   : > { %v4192_v60 = vpop.f32.mrf.mxu0  ;;  %vm3469_vm2 = vcmp.eq.s32.totalorder %v5743_v15, %v3375_v55  ;;  %v4057_v27 = vsel %vm3471_vm1, 1.0, %v4702_v19  ;;  %vm3473_vm8 = vcmp.eq.s32.totalorder %v5743_v15, %v5746_v42 }
 0x306   : > { %2509 = vst [vmem:[%s5644_s30 + $0xd8] sm:$0xff] %v2477_v40  ;;  %v2527_v43 = vpack.c.bf16 %v2477_v40, %v2476_v4  ;;  %v2436_v37 = vadd.f32 %v4191_v14, %v5635_v45 }
 0x307   : > { %v4193_v36 = vpop.f32.mrf.mxu0 }
 0x308   : > { %v2478_v33 = vmax.f32 %v2436_v37, 0.0  ;;  %v4194_v48 = vadd.f32 %v4193_v36, %v4192_v60  ;;  %4266 = vmatmul.mubr.bf16.gmra.mxu1 %v2527_v43  ;;  %v4055_v43 = vsel %vm3469_vm2, 1.0, %v4702_v19 }
 0x309   : > { %v4195_v39 = vpop.f32.mrf.mxu0 }
 0x30a   : > { %2510 = vst [vmem:[%s5644_s30 + $0xe0] sm:$0xff] %v2478_v33  ;;  %v2439_v13 = vadd.f32 %v4194_v48, %v5635_v45 }
 0x30b   : > { %v4196_v50 = vpop.f32.mrf.mxu0 }
 0x30c   : > { %v2479_v18 = vmax.f32 %v2439_v13, 0.0  ;;  %v4197_v10 = vadd.f32 %v4196_v50, %v4195_v39  ;;  %v5765_v50 = vpop.permute.xlu1 %3389 }
 0x30d   : > { %v4198_v44 = vpop.f32.mrf.mxu0  ;;  %vm3474_vm9 = vcmp.eq.s32.totalorder %v5743_v15, %v5765_v50 }
 0x30e   : > { %2511 = vst [vmem:[%s5644_s30 + $0xe8] sm:$0xff] %v2479_v18  ;;  %v2444_v57 = vadd.f32 %v4197_v10, %v5635_v45  ;;  %v2528_v35 = vpack.c.bf16 %v2479_v18, %v2478_v33 }
 0x30f   : > { %v4199_v46 = vpop.f32.mrf.mxu0 }
 0x310   : > { %v2480_v9 = vmax.f32 %v2444_v57, 0.0  ;;  %v4200_v51 = vadd.f32 %v4199_v46, %v4198_v44  ;;  %4269 = vmatprep.mubr.bf16.mxu1 %v2528_v35 }
 0x312   : > { %2512 = vst [vmem:[%s5644_s30 + $0xf0] sm:$0xff] %v2480_v9  ;;  %v2447_v0 = vadd.f32 %v4200_v51, %v5635_v45 }
 0x314   : > { %v2481_v41 = vmax.f32 %v2447_v0, 0.0 }
 0x316   : > { %2513 = vst [vmem:[%s5644_s30 + $0xf8] sm:$0xff] %v2481_v41  ;;  %v2529_v12 = vpack.c.bf16 %v2481_v41, %v2480_v9 }
 0x318   : > { %4270 = vmatmul.mubr.bf16.gmra.mxu1 %v2529_v12 }
 0x368   : > { %v4243_v52 = vpop.f32.mrf.mxu1 }
 0x369   : > { %v2644_v6 = vadd.f32 %v4243_v52, %v5728_v53 }
 0x36a   : > { %v2635_v7 = vpop.f32.mrf.mxu1 }
 0x36b   : > { %v4025_v49 = vmul.f32 -1.442695, %v2644_v6  ;;  %v2636_v56 = vadd.f32 %v5728_v53, %v2635_v7 }
 0x36c   : > { %v4244_v8 = vpop.f32.mrf.mxu1 }
 0x36d   : > { %4437 = vpow2.f32 %v4025_v49  ;;  %v4023_v58 = vmul.f32 -1.442695, %v2636_v56  ;;  %v2647_v45 = vadd.f32 %v4244_v8, %v5728_v53 }
 0x36e   : > { %v2638_v3 = vpop.f32.mrf.mxu1 }
 0x36f   : > { %4439 = vpow2.f32 %v4023_v58  ;;  %v4026_v47 = vmul.f32 -1.442695, %v2647_v45  ;;  %v2639_v61 = vadd.f32 %v5728_v53, %v2638_v3  ;;  %v3393_v58 = vpop.permute.xlu1 %3392 }
 0x370   : > { %vm3475_vm6 = vcmp.eq.s32.totalorder %v5743_v15, %v3393_v58 }
 0x371   : > { %4441 = vpow2.f32 %v4026_v47  ;;  %v4024_v32 = vmul.f32 -1.442695, %v2639_v61  ;;  %v4058_v47 = vsel %vm3472_vm4, 1.0, %v4702_v19 }
 0x373   : > { %4443 = vpow2.f32 %v4024_v32  ;;  %v4056_v32 = vsel %vm3470_vm5, 1.0, %v4702_v19 }
 0x378   : > { %v4247_v63 = vpop.f32.mrf.mxu1 }
 0x379   : > { %v2660_v25 = vadd.f32 %v4247_v63, %v5728_v53 }
 0x37a   : > { %v4438_v23 = vpop.eup %4437  ;;  %v2651_v16 = vpop.f32.mrf.mxu1 }
 0x37b   : > { %v2860_v5 = vadd.f32 1.0, %v4438_v23  ;;  %v4029_v38 = vmul.f32 -1.442695, %v2660_v25  ;;  %v2652_v59 = vadd.f32 %v5728_v53, %v2651_v16  ;;  %v3396_v25 = vpop.permute.xlu1 %3395 }
 0x37c   : > { %v4440_v11 = vpop.eup %4439  ;;  %v4248_v2 = vpop.f32.mrf.mxu1  ;;  %vm3476_vm7 = vcmp.eq.s32.totalorder %v5743_v15, %v3396_v25 }
 0x37d   : > { %4445 = vrcp.f32 %v2860_v5  ;;  %v2858_v21 = vadd.f32 1.0, %v4440_v11  ;;  %v4027_v22 = vmul.f32 -1.442695, %v2652_v59  ;;  %v2663_v26 = vadd.f32 %v4248_v2, %v5728_v53 }
 0x37e   : > { %v4442_v24 = vpop.eup %4441  ;;  %4447 = vpow2.f32 %v4029_v38  ;;  %v2654_v17 = vpop.f32.mrf.mxu1 }
 0x37f   : > { %4449 = vrcp.f32 %v2858_v21  ;;  %v2861_v29 = vadd.f32 1.0, %v4442_v24  ;;  %v4030_v28 = vmul.f32 -1.442695, %v2663_v26  ;;  %v2655_v34 = vadd.f32 %v5728_v53, %v2654_v17  ;;  %v5810_v20 = vpop.permute.xlu1 %3398 }
 0x380   : > { %v4444_v31 = vpop.eup %4443  ;;  %4451 = vpow2.f32 %v4027_v22  ;;  %v4061_v21 = vsel %vm3475_vm6, 1.0, %v4702_v19  ;;  %vm3477_vm11 = vcmp.eq.s32.totalorder %v5743_v15, %v5810_v20 }
 0x381   : > { %4453 = vrcp.f32 %v2861_v29  ;;  %v2859_v54 = vadd.f32 1.0, %v4444_v31  ;;  %v4028_v4 = vmul.f32 -1.442695, %v2655_v34 }
 0x382   : > { %4455 = vpow2.f32 %v4030_v28 }
 0x383   : > { %4457 = vrcp.f32 %v2859_v54 }
 0x384   : > { %4459 = vpow2.f32 %v4028_v4 }
 0x388   : > { %v4251_v30 = vpop.f32.mrf.mxu1 }
 0x389   : > { %v2676_v40 = vadd.f32 %v4251_v30, %v5728_v53 }
 0x38a   : > { %v4446_v14 = vpop.eup %4445  ;;  %v2667_v60 = vpop.f32.mrf.mxu1 }
 0x38b   : > { %v4448_v37 = vpop.eup %4447  ;;  %2956 = vst [vmem:[%s5753_s17 + $0x10] sm:$0xff] %v4446_v14  ;;  %v4033_v36 = vmul.f32 -1.442695, %v2676_v40  ;;  %v2668_v33 = vadd.f32 %v5728_v53, %v2667_v60  ;;  %v5763_v48 = vsel %vm2988_vm3, %v4446_v14, -inf  ;;  %v3567_v39 = vmul.f32 %v4446_v14, %v4057_v27 }
 0x38c   : > { %v4450_v13 = vpop.eup %4449  ;;  %v2864_v18 = vadd.f32 1.0, %v4448_v37  ;;  %3025 = vmax.xlane.f32.xlu1 %v5763_v48  ;;  %v4252_v10 = vpop.f32.mrf.mxu1 }
 0x38d   : > { %v4452_v44 = vpop.eup %4451  ;;  %2954 = vst [vmem:[%s5753_s17] sm:$0xff] %v4450_v13  ;;  %4461 = vpow2.f32 %v4033_v36  ;;  %v4031_v57 = vmul.f32 -1.442695, %v2668_v33  ;;  %v2679_v35 = vadd.f32 %v4252_v10, %v5728_v53  ;;  %3601 = vadd.xlane.f32.xlu0 %v3567_v39  ;;  %v3565_v46 = vmul.f32 %v4450_v13, %v4055_v43  ;;  %v5825_v39 = vpop.permute.xlu0 %3401 }
 0x38e   : > { %v4454_v9 = vpop.eup %4453  ;;  %4463 = vrcp.f32 %v2864_v18  ;;  %v2862_v51 = vadd.f32 1.0, %v4452_v44  ;;  %v2670_v0 = vpop.f32.mrf.mxu1  ;;  %v5776_v49 = vsel %vm2988_vm3, %v4450_v13, -inf  ;;  %v4062_v43 = vsel %vm3476_vm7, 1.0, %v4702_v19 }
 0x38f   : > { %v4456_v41 = vpop.eup %4455  ;;  %2957 = vst [vmem:[%s5753_s17 + $0x18] sm:$0xff] %v4454_v9  ;;  %4465 = vpow2.f32 %v4031_v57  ;;  %v4034_v12 = vmul.f32 -1.442695, %v2679_v35  ;;  %v2671_v52 = vadd.f32 %v5728_v53, %v2670_v0  ;;  %v5784_v3 = vsel %vm2988_vm3, %v4454_v9, -inf  ;;  %v3405_v18 = vpop.permute.xlu1 %3404 }
 0x390   : > { %v4458_v6 = vpop.eup %4457  ;;  %4467 = vrcp.f32 %v2862_v51  ;;  %v2865_v7 = vadd.f32 1.0, %v4456_v41  ;;  %3597 = vadd.xlane.f32.xlu1 %v3565_v46  ;;  %v3568_v62 = vmul.f32 %v4454_v9, %v4058_v47  ;;  %v4059_v10 = vsel %vm3473_vm8, 1.0, %v4702_v19 }
 0x391   : > { %v4460_v56 = vpop.eup %4459  ;;  %2955 = vst [vmem:[%s5753_s17 + $0x8] sm:$0xff] %v4458_v6  ;;  %4469 = vpow2.f32 %v4034_v12  ;;  %v4032_v8 = vmul.f32 -1.442695, %v2671_v52  ;;  %3021 = vmax.xlane.f32.xlu0 %v5776_v49  ;;  %v5793_v61 = vsel %vm2988_vm3, %v4458_v6, -inf  ;;  %v3566_v63 = vmul.f32 %v4458_v6, %v4056_v32  ;;  %v3408_v9 = vpop.permute.xlu0 %3407 }
 0x392   : > { %4471 = vrcp.f32 %v2865_v7  ;;  %v2863_v45 = vadd.f32 1.0, %v4460_v56  ;;  %vm3479_vm10 = vcmp.eq.s32.totalorder %v5743_v15, %v3405_v18  ;;  %v4060_v57 = vsel %vm3474_vm9, 1.0, %v4702_v19 }
 0x393   : > { %4473 = vpow2.f32 %v4032_v8  ;;  %v4065_v46 = vsel %vm3479_vm10, 1.0, %v4702_v19  ;;  %vm3480_vm12 = vcmp.eq.s32.totalorder %v5743_v15, %v3408_v9  ;;  %vm3478_vm13 = vcmp.eq.s32.totalorder %v5743_v15, %v5825_v39 }
 0x394   : > { %4475 = vrcp.f32 %v2863_v45  ;;  %3027 = vmax.xlane.f32.xlu1 %v5784_v3  ;;  %v4066_v25 = vsel %vm3480_vm12, 1.0, %v4702_v19 }
 0x395   : > { %3023 = vmax.xlane.f32.xlu0 %v5793_v61  ;;  %v3414_v20 = vpop.permute.xlu0 %3413 }
 0x396   : > { %vm3482_vm1 = vcmp.eq.s32.totalorder %v5743_v15, %v3414_v20 }
 0x398   : > { %v4255_v23 = vpop.f32.mrf.mxu1  ;;  %3603 = vadd.xlane.f32.xlu1 %v3568_v62 }
 0x399   : > { %v2692_v1 = vadd.f32 %v4255_v23, %v5728_v53  ;;  %3599 = vadd.xlane.f32.xlu0 %v3566_v63 }
 0x39a   : > { %v4462_v16 = vpop.eup %4461  ;;  %v2683_v5 = vpop.f32.mrf.mxu1 }
 0x39b   : > { %v4464_v38 = vpop.eup %4463  ;;  %v2868_v59 = vadd.f32 1.0, %v4462_v16  ;;  %v4037_v11 = vmul.f32 -1.442695, %v2692_v1  ;;  %v2684_v2 = vadd.f32 %v5728_v53, %v2683_v5  ;;  %v4063_v5 = vsel %vm3477_vm11, 1.0, %v4702_v19 }
 0x39c   : > { %v4466_v22 = vpop.eup %4465  ;;  %2960 = vst [vmem:[%s5753_s17 + $0x30] sm:$0xff] %v4464_v38  ;;  %v4256_v26 = vpop.f32.mrf.mxu1  ;;  %v5805_v24 = vsel %vm2988_vm3, %v4464_v38, -inf  ;;  %v3571_v4 = vmul.f32 %v4464_v38, %v4061_v21 }
 0x39d   : > { %v4468_v17 = vpop.eup %4467  ;;  %4477 = vrcp.f32 %v2868_v59  ;;  %v2866_v29 = vadd.f32 1.0, %v4466_v22  ;;  %v4035_v28 = vmul.f32 -1.442695, %v2684_v2  ;;  %v2695_v34 = vadd.f32 %v4256_v26, %v5728_v53  ;;  %3033 = vmax.xlane.f32.xlu0 %v5805_v24 }
 0x39e   : > { %v4470_v31 = vpop.eup %4469  ;;  %2958 = vst [vmem:[%s5753_s17 + $0x20] sm:$0xff] %v4468_v17  ;;  %4479 = vpow2.f32 %v4037_v11  ;;  %v2686_v54 = vpop.f32.mrf.mxu1  ;;  %v5831_v42 = vsel %vm2988_vm3, %v4468_v17, -inf  ;;  %v3569_v44 = vmul.f32 %v4468_v17, %v4059_v10 }
 0x39f   : > { %v4472_v55 = vpop.eup %4471  ;;  %4481 = vrcp.f32 %v2866_v29  ;;  %v2869_v30 = vadd.f32 1.0, %v4470_v31  ;;  %v4038_v27 = vmul.f32 -1.442695, %v2695_v34  ;;  %v2687_v40 = vadd.f32 %v5728_v53, %v2686_v54 }
 0x3a0   : > { %v4474_v14 = vpop.eup %4473  ;;  %2961 = vst [vmem:[%s5753_s17 + $0x38] sm:$0xff] %v4472_v55  ;;  %4483 = vpow2.f32 %v4035_v28  ;;  %v5816_v60 = vsel %vm2988_vm3, %v4472_v55, -inf  ;;  %v3572_v13 = vmul.f32 %v4472_v55, %v4062_v43  ;;  %v3411_v28 = vpop.permute.xlu1 %3410  ;;  %v4064_v55 = vsel %vm3478_vm13, 1.0, %v4702_v19 }
 0x3a1   : > { %v4476_v37 = vpop.eup %4475  ;;  %4485 = vrcp.f32 %v2869_v30  ;;  %v2867_v36 = vadd.f32 1.0, %v4474_v14  ;;  %v4036_v33 = vmul.f32 -1.442695, %v2687_v40  ;;  %3035 = vmax.xlane.f32.xlu1 %v5816_v60  ;;  %3609 = vadd.xlane.f32.xlu0 %v3571_v4  ;;  %vm3481_vm15 = vcmp.eq.s32.totalorder %v5743_v15, %v3411_v28  ;;  %v3420_v14 = vpop.permute.xlu0 %3419 }
 0x3a2   : > { %2959 = vst [vmem:[%s5753_s17 + $0x28] sm:$0xff] %v4476_v37  ;;  %4487 = vpow2.f32 %v4038_v27  ;;  %v5839_v50 = vsel %vm2988_vm3, %v4476_v37, -inf  ;;  %v3570_v12 = vmul.f32 %v4476_v37, %v4060_v57  ;;  %vm3484_vm0 = vcmp.eq.s32.totalorder %v5743_v15, %v3420_v14 }
 0x3a3   : > { %4489 = vrcp.f32 %v2867_v36 }
 0x3a4   : > { %4491 = vpow2.f32 %v4036_v33  ;;  %v3417_v30 = vpop.permute.xlu1 %3416 }
 0x3a5   : > { %3611 = vadd.xlane.f32.xlu1 %v3572_v13  ;;  %3029 = vmax.xlane.f32.xlu0 %v5831_v42  ;;  %vm3483_vm14 = vcmp.eq.s32.totalorder %v5743_v15, %v3417_v30 }
 0x3a6   : > { %v4069_v10 = vsel %vm3483_vm14, 1.0, %v4702_v19 }
 0x3a8   : > { %v4259_v35 = vpop.f32.mrf.mxu1 }
 0x3a9   : > { %v2708_v51 = vadd.f32 %v4259_v35, %v5728_v53  ;;  %3031 = vmax.xlane.f32.xlu1 %v5839_v50  ;;  %3605 = vadd.xlane.f32.xlu0 %v3569_v44 }
 0x3aa   : > { %v4478_v0 = vpop.eup %4477  ;;  %v2699_v41 = vpop.f32.mrf.mxu1 }
 0x3ab   : > { %v4480_v52 = vpop.eup %4479  ;;  %2964 = vst [vmem:[%s5753_s17 + $0x50] sm:$0xff] %v4478_v0  ;;  %v4041_v6 = vmul.f32 -1.442695, %v2708_v51  ;;  %v2700_v7 = vadd.f32 %v5728_v53, %v2699_v41  ;;  %v5851_v56 = vsel %vm2988_vm3, %v4478_v0, -inf  ;;  %v5853_v8 = vmul.f32 %v4478_v0, %v4065_v46 }
 0x3ac   : > { %v4482_v58 = vpop.eup %4481  ;;  %v2872_v45 = vadd.f32 1.0, %v4480_v52  ;;  %v4260_v47 = vpop.f32.mrf.mxu1  ;;  %v4067_v46 = vsel %vm3481_vm15, 1.0, %v4702_v19 }
 0x3ad   : > { %v4484_v32 = vpop.eup %4483  ;;  %2962 = vst [vmem:[%s5753_s17 + $0x40] sm:$0xff] %v4482_v58  ;;  %4493 = vpow2.f32 %v4041_v6  ;;  %v4039_v62 = vmul.f32 -1.442695, %v2700_v7  ;;  %v2711_v63 = vadd.f32 %v4260_v47, %v5728_v53  ;;  %3607 = vadd.xlane.f32.xlu1 %v3570_v12  ;;  %3041 = vmax.xlane.f32.xlu0 %v5851_v56  ;;  %v5873_v26 = vsel %vm2988_vm3, %v4482_v58, -inf }
 0x3ae   : > { %v4486_v23 = vpop.eup %4485  ;;  %4495 = vrcp.f32 %v2872_v45  ;;  %v2870_v1 = vadd.f32 1.0, %v4484_v32  ;;  %v2702_v16 = vpop.f32.mrf.mxu1  ;;  %v3573_v54 = vmul.f32 %v4482_v58, %v4063_v5  ;;  %v4070_v58 = vsel %vm3484_vm0, 1.0, %v4702_v19 }
 0x3af   : > { %v4488_v38 = vpop.eup %4487  ;;  %2965 = vst [vmem:[%s5753_s17 + $0x58] sm:$0xff] %v4486_v23  ;;  %4497 = vpow2.f32 %v4039_v62  ;;  %v4042_v59 = vmul.f32 -1.442695, %v2711_v63  ;;  %v2703_v11 = vadd.f32 %v5728_v53, %v2702_v16  ;;  %v5869_v2 = vsel %vm2988_vm3, %v4486_v23, -inf }
 0x3b0   : > { %v4490_v21 = vpop.eup %4489  ;;  %4499 = vrcp.f32 %v2870_v1  ;;  %v2873_v22 = vadd.f32 1.0, %v4488_v38  ;;  %v5875_v17 = vmul.f32 %v4486_v23, %v4066_v25  ;;  %v3423_v25 = vpop.permute.xlu1 %3422 }
 0x3b1   : > { %v4492_v29 = vpop.eup %4491  ;;  %2963 = vst [vmem:[%s5753_s17 + $0x48] sm:$0xff] %v4490_v21  ;;  %4501 = vpow2.f32 %v4042_v59  ;;  %v4040_v34 = vmul.f32 -1.442695, %v2703_v11  ;;  %3043 = vmax.xlane.f32.xlu1 %v5869_v2  ;;  %3037 = vmax.xlane.f32.xlu0 %v5873_v26  ;;  %v5884_v4 = vsel %vm2988_vm3, %v4490_v21, -inf  ;;  %v3574_v27 = vmul.f32 %v4490_v21, %v4064_v55 }
 0x3b2   : > { %4503 = vrcp.f32 %v2873_v22  ;;  %v2871_v31 = vadd.f32 1.0, %v4492_v29  ;;  %v4068_v11 = vsel %vm3482_vm1, 1.0, %v4702_v19  ;;  %v3426_v22 = vpop.permute.xlu0 %3425  ;;  %vm3485_vm4 = vcmp.eq.s32.totalorder %v5743_v15, %v3423_v25 }
 0x3b3   : > { %4505 = vpow2.f32 %v4040_v34  ;;  %vm3486_vm6 = vcmp.eq.s32.totalorder %v5743_v15, %v3426_v22 }
 0x3b4   : > { %4507 = vrcp.f32 %v2871_v31  ;;  %v3429_v28 = vpop.permute.xlu1 %3428 }
 0x3b5   : > { %3039 = vmax.xlane.f32.xlu1 %v5884_v4  ;;  %3613 = vadd.xlane.f32.xlu0 %v3573_v54  ;;  %vm3487_vm2 = vcmp.eq.s32.totalorder %v5743_v15, %v3429_v28 }
 0x3b6   : > { %v3432_v31 = vpop.permute.xlu0 %3431  ;;  %v4073_v30 = vsel %vm3487_vm2, 1.0, %v4702_v19 }
 0x3b7   : > { %vm3488_vm5 = vcmp.eq.s32.totalorder %v5743_v15, %v3432_v31 }
 0x3b8   : > { %v4263_v40 = vpop.f32.mrf.mxu1 }
 0x3b9   : > { %v2724_v43 = vadd.f32 %v4263_v40, %v5728_v53  ;;  %3615 = vadd.xlane.f32.xlu1 %v3574_v27 }
 0x3ba   : > { %v4494_v37 = vpop.eup %4493  ;;  %v2715_v36 = vpop.f32.mrf.mxu1 }
 0x3bb   : > { %v4496_v33 = vpop.eup %4495  ;;  %v2876_v39 = vadd.f32 1.0, %v4494_v37  ;;  %v4045_v13 = vmul.f32 -1.442695, %v2724_v43  ;;  %v2716_v18 = vadd.f32 %v5728_v53, %v2715_v36 }
 0x3bc   : > { %v4498_v44 = vpop.eup %4497  ;;  %2968 = vst [vmem:[%s5753_s17 + $0x70] sm:$0xff] %v4496_v33  ;;  %v4264_v57 = vpop.f32.mrf.mxu1  ;;  %v5897_v35 = vsel %vm2988_vm3, %v4496_v33, -inf  ;;  %v5902_v9 = vmul.f32 %v4496_v33, %v4069_v10 }
 0x3bd   : > { %v4500_v51 = vpop.eup %4499  ;;  %4509 = vrcp.f32 %v2876_v39  ;;  %v2874_v0 = vadd.f32 1.0, %v4498_v44  ;;  %v4043_v41 = vmul.f32 -1.442695, %v2716_v18  ;;  %v2727_v12 = vadd.f32 %v4264_v57, %v5728_v53  ;;  %3049 = vmax.xlane.f32.xlu0 %v5897_v35 }
 0x3be   : > { %v4502_v52 = vpop.eup %4501  ;;  %2966 = vst [vmem:[%s5753_s17 + $0x60] sm:$0xff] %v4500_v51  ;;  %4511 = vpow2.f32 %v4045_v13  ;;  %v2718_v6 = vpop.f32.mrf.mxu1  ;;  %v5908_v7 = vmul.f32 %v4500_v51, %v4067_v46  ;;  %v5921_v1 = vsel %vm2988_vm3, %v4500_v51, -inf  ;;  %v4071_v13 = vsel %vm3485_vm4, 1.0, %v4702_v19 }
 0x3bf   : > { %v4504_v45 = vpop.eup %4503  ;;  %4513 = vrcp.f32 %v2874_v0  ;;  %v2877_v47 = vadd.f32 1.0, %v4502_v52  ;;  %v4046_v32 = vmul.f32 -1.442695, %v2727_v12  ;;  %v2719_v62 = vadd.f32 %v5728_v53, %v2718_v6 }
 0x3c0   : > { %v4506_v63 = vpop.eup %4505  ;;  %2969 = vst [vmem:[%s5753_s17 + $0x78] sm:$0xff] %v4504_v45  ;;  %4515 = vpow2.f32 %v4043_v41  ;;  %v5917_v23 = vsel %vm2988_vm3, %v4504_v45, -inf  ;;  %v5923_v16 = vmul.f32 %v4504_v45, %v4070_v58  ;;  %v4074_v57 = vsel %vm3488_vm5, 1.0, %v4702_v19 }
 0x3c1   : > { %v4508_v5 = vpop.eup %4507  ;;  %4517 = vrcp.f32 %v2877_v47  ;;  %v2875_v38 = vadd.f32 1.0, %v4506_v63  ;;  %v4044_v59 = vmul.f32 -1.442695, %v2719_v62  ;;  %3051 = vmax.xlane.f32.xlu1 %v5917_v23  ;;  %3045 = vmax.xlane.f32.xlu0 %v5921_v1  ;;  %v4072_v63 = vsel %vm3486_vm6, 1.0, %v4702_v19 }
 0x3c2   : > { %2967 = vst [vmem:[%s5753_s17 + $0x68] sm:$0xff] %v4508_v5  ;;  %4519 = vpow2.f32 %v4046_v32  ;;  %v5931_v21 = vmul.f32 %v4508_v5, %v4068_v11  ;;  %v5935_v29 = vsel %vm2988_vm3, %v4508_v5, -inf  ;;  %v3435_v32 = vpop.permute.xlu1 %3434 }
 0x3c3   : > { %4521 = vrcp.f32 %v2875_v38  ;;  %vm3489_vm8 = vcmp.eq.s32.totalorder %v5743_v15, %v3435_v32 }
 0x3c4   : > { %4523 = vpow2.f32 %v4044_v59 }
 0x3c5   : > { %3047 = vmax.xlane.f32.xlu1 %v5935_v29 }
 0x3c6   : > { %v3441_v22 = vpop.permute.xlu1 %3440 }
 0x3c7   : > { %vm3491_vm7 = vcmp.eq.s32.totalorder %v5743_v15, %v3441_v22 }
 0x3c8   : > { %v4267_v34 = vpop.f32.mrf.mxu1 }
 0x3c9   : > { %v2740_v20 = vadd.f32 %v4267_v34, %v5728_v53  ;;  %v3438_v34 = vpop.permute.xlu0 %3437 }
 0x3ca   : > { %v4510_v54 = vpop.eup %4509  ;;  %v2731_v55 = vpop.f32.mrf.mxu1  ;;  %vm3490_vm10 = vcmp.eq.s32.totalorder %v5743_v15, %v3438_v34 }
 0x3cb   : > { %v4512_v27 = vpop.eup %4511  ;;  %2972 = vst [vmem:[%s5753_s17 + $0x90] sm:$0xff] %v4510_v54  ;;  %v4049_v40 = vmul.f32 -1.442695, %v2740_v20  ;;  %v2732_v14 = vadd.f32 %v5728_v53, %v2731_v55  ;;  %v5947_v43 = vsel %vm2988_vm3, %v4510_v54, -inf  ;;  %v5949_v37 = vmul.f32 %v4510_v54, %v4073_v30 }
 0x3cc   : > { %v4514_v36 = vpop.eup %4513  ;;  %v2880_v33 = vadd.f32 1.0, %v4512_v27  ;;  %v4268_v39 = vpop.f32.mrf.mxu1  ;;  %3057 = vmax.xlane.f32.xlu0 %v5947_v43  ;;  %v4077_v55 = vsel %vm3491_vm7, 1.0, %v4702_v19 }
 0x3cd   : > { %v4516_v18 = vpop.eup %4515  ;;  %2970 = vst [vmem:[%s5753_s17 + $0x80] sm:$0xff] %v4514_v36  ;;  %4525 = vpow2.f32 %v4049_v40  ;;  %v4047_v10 = vmul.f32 -1.442695, %v2732_v14  ;;  %v2743_v44 = vadd.f32 %v4268_v39, %v5728_v53  ;;  %v5963_v41 = vsel %vm2988_vm3, %v4514_v36, -inf  ;;  %v3444_v30 = vpop.permute.xlu0 %3443 }
 0x3ce   : > { %v4518_v46 = vpop.eup %4517  ;;  %4527 = vrcp.f32 %v2880_v33  ;;  %v2878_v51 = vadd.f32 1.0, %v4516_v18  ;;  %v2734_v0 = vpop.f32.mrf.mxu1  ;;  %v5965_v12 = vmul.f32 %v4514_v36, %v4071_v13  ;;  %vm3492_vm9 = vcmp.eq.s32.totalorder %v5743_v15, %v3444_v30 }
 0x3cf   : > { %v4520_v52 = vpop.eup %4519  ;;  %2973 = vst [vmem:[%s5753_s17 + $0x98] sm:$0xff] %v4518_v46  ;;  %4529 = vpow2.f32 %v4047_v10  ;;  %v4050_v6 = vmul.f32 -1.442695, %v2743_v44  ;;  %v2735_v58 = vadd.f32 %v5728_v53, %v2734_v0  ;;  %v5971_v45 = vsel %vm2988_vm3, %v4518_v46, -inf }
 0x3d0   : > { %v4522_v47 = vpop.eup %4521  ;;  %4531 = vrcp.f32 %v2878_v51  ;;  %v2881_v62 = vadd.f32 1.0, %v4520_v52  ;;  %3059 = vmax.xlane.f32.xlu1 %v5971_v45  ;;  %3053 = vmax.xlane.f32.xlu0 %v5963_v41  ;;  %v5978_v25 = vmul.f32 %v4518_v46, %v4074_v57  ;;  %v4075_v10 = vsel %vm3489_vm8, 1.0, %v4702_v19 }
 0x3d1   : > { %v4524_v5 = vpop.eup %4523  ;;  %2971 = vst [vmem:[%s5753_s17 + $0x88] sm:$0xff] %v4522_v47  ;;  %4533 = vpow2.f32 %v4050_v6  ;;  %v4048_v38 = vmul.f32 -1.442695, %v2735_v58  ;;  %v5981_v59 = vmul.f32 %v4522_v47, %v4072_v63  ;;  %v5985_v28 = vsel %vm2988_vm3, %v4522_v47, -inf }
 0x3d2   : > { %4535 = vrcp.f32 %v2881_v62  ;;  %v2879_v11 = vadd.f32 1.0, %v4524_v5  ;;  %v4078_v6 = vsel %vm3492_vm9, 1.0, %v4702_v19 }
 0x3d3   : > { %4537 = vpow2.f32 %v4048_v38 }
 0x3d4   : > { %4539 = vrcp.f32 %v2879_v11  ;;  %3055 = vmax.xlane.f32.xlu1 %v5985_v28  ;;  %v3447_v11 = vpop.permute.xlu1 %3446 }
 0x3d5   : > { %vm3493_vm12 = vcmp.eq.s32.totalorder %v5743_v15, %v3447_v11 }
 0x3d8   : > { %v4271_v31 = vpop.f32.mrf.mxu1 }
 0x3d9   : > { %v2756_v20 = vadd.f32 %v4271_v31, %v5728_v53 }
 0x3da   : > { %v4526_v54 = vpop.eup %4525  ;;  %v2747_v27 = vpop.f32.mrf.mxu1 }
 0x3db   : > { %v4528_v40 = vpop.eup %4527  ;;  %v2884_v14 = vadd.f32 1.0, %v4526_v54  ;;  %v4053_v36 = vmul.f32 -1.442695, %v2756_v20  ;;  %v2748_v33 = vadd.f32 %v5728_v53, %v2747_v27 }
 0x3dc   : > { %v4530_v39 = vpop.eup %4529  ;;  %2976 = vst [vmem:[%s5753_s17 + $0xb0] sm:$0xff] %v4528_v40  ;;  %v4272_v13 = vpop.f32.mrf.mxu1  ;;  %v5997_v18 = vsel %vm2988_vm3, %v4528_v40, -inf  ;;  %v6000_v44 = vmul.f32 %v4528_v40, %v4077_v55 }
 0x3dd   : > { %v4532_v57 = vpop.eup %4531  ;;  %4541 = vrcp.f32 %v2884_v14  ;;  %v2882_v46 = vadd.f32 1.0, %v4530_v39  ;;  %v4051_v51 = vmul.f32 -1.442695, %v2748_v33  ;;  %v2759_v0 = vadd.f32 %v4272_v13, %v5728_v53  ;;  %3065 = vmax.xlane.f32.xlu0 %v5997_v18  ;;  %v3450_v40 = vpop.permute.xlu0 %3449 }
 0x3de   : > { %v4534_v52 = vpop.eup %4533  ;;  %2974 = vst [vmem:[%s5753_s17 + $0xa0] sm:$0xff] %v4532_v57  ;;  %4543 = vpow2.f32 %v4053_v36  ;;  %v2750_v58 = vpop.f32.mrf.mxu1  ;;  %v6009_v47 = vmul.f32 %v4532_v57, %v4075_v10  ;;  %v6019_v31 = vsel %vm2988_vm3, %v4532_v57, -inf  ;;  %vm3494_vm14 = vcmp.eq.s32.totalorder %v5743_v15, %v3450_v40 }
 0x3df   : > { %v4536_v32 = vpop.eup %4535  ;;  %4545 = vrcp.f32 %v2882_v46  ;;  %v2885_v62 = vadd.f32 1.0, %v4534_v52  ;;  %v4054_v63 = vmul.f32 -1.442695, %v2759_v0  ;;  %v2751_v5 = vadd.f32 %v5728_v53, %v2750_v58  ;;  %v3453_v36 = vpop.permute.xlu1 %3452 }
 0x3e0   : > { %v4538_v38 = vpop.eup %4537  ;;  %2977 = vst [vmem:[%s5753_s17 + $0xb8] sm:$0xff] %v4536_v32  ;;  %4547 = vpow2.f32 %v4051_v51  ;;  %v6015_v22 = vsel %vm2988_vm3, %v4536_v32, -inf  ;;  %v6021_v20 = vmul.f32 %v4536_v32, %v4078_v6  ;;  %v4076_v53 = vsel %vm3490_vm10, 1.0, %v4702_v19 }
 0x3e1   : > { %v4540_v54 = vpop.eup %4539  ;;  %4549 = vrcp.f32 %v2885_v62  ;;  %v2883_v55 = vadd.f32 1.0, %v4538_v38  ;;  %v4052_v30 = vmul.f32 -1.442695, %v2751_v5  ;;  %3067 = vmax.xlane.f32.xlu1 %v6015_v22  ;;  %3061 = vmax.xlane.f32.xlu0 %v6019_v31  ;;  %vm3495_vm11 = vcmp.eq.s32.totalorder %v5743_v15, %v3453_v36  ;;  %v3456_v39 = vpop.permute.xlu0 %3455 }
 0x3e2   : > { %2975 = vst [vmem:[%s5753_s17 + $0xa8] sm:$0xff] %v4540_v54  ;;  %4551 = vpow2.f32 %v4054_v63  ;;  %v6029_v27 = vmul.f32 %v4540_v54, %v4076_v53  ;;  %v6033_v14 = vsel %vm2988_vm3, %v4540_v54, -inf  ;;  %v4081_v33 = vsel %vm3495_vm11, 1.0, %v4702_v19 }
 0x3e3   : > { %4553 = vrcp.f32 %v2883_v55  ;;  %vm3496_vm13 = vcmp.eq.s32.totalorder %v5743_v15, %v3456_v39  ;;  %v4079_v51 = vsel %vm3493_vm12, 1.0, %v4702_v19  ;;  %v3459_v5 = vpop.permute.xlu1 %3458 }
 0x3e4   : > { %4555 = vpow2.f32 %v4052_v30  ;;  %v4082_v32 = vsel %vm3496_vm13, 1.0, %v4702_v19  ;;  %v4080_v30 = vsel %vm3494_vm14, 1.0, %v4702_v19  ;;  %vm3497_vm0 = vcmp.eq.s32.totalorder %v5743_v15, %v3459_v5 }
 0x3e5   : > { %3063 = vmax.xlane.f32.xlu1 %v6033_v14 }
 0x3ea   : > { %v4542_v34 = vpop.eup %4541 }
 0x3eb   : > { %v4544_v13 = vpop.eup %4543  ;;  %2980 = vst [vmem:[%s5753_s17 + $0xd0] sm:$0xff] %v4542_v34  ;;  %v6043_v10 = vsel %vm2988_vm3, %v4542_v34, -inf  ;;  %v6045_v57 = vmul.f32 %v4542_v34, %v4081_v33  ;;  %v3462_v33 = vpop.permute.xlu0 %3461 }
 0x3ec   : > { %v4546_v46 = vpop.eup %4545  ;;  %v2888_v0 = vadd.f32 1.0, %v4544_v13  ;;  %3073 = vmax.xlane.f32.xlu0 %v6043_v10  ;;  %v3465_v13 = vpop.permute.xlu1 %3464  ;;  %vm3498_vm2 = vcmp.eq.s32.totalorder %v5743_v15, %v3462_v33 }
 0x3ed   : > { %v4548_v52 = vpop.eup %4547  ;;  %2978 = vst [vmem:[%s5753_s17 + $0xc0] sm:$0xff] %v4546_v46  ;;  %v6051_v6 = vmul.f32 %v4546_v46, %v4079_v51  ;;  %v6061_v11 = vsel %vm2988_vm3, %v4546_v46, -inf  ;;  %vm3499_vm15 = vcmp.eq.s32.totalorder %v5743_v15, %v3465_v13  ;;  %v4084_v33 = vsel %vm3498_vm2, 1.0, %v4702_v19 }
 0x3ee   : > { %v4550_v58 = vpop.eup %4549  ;;  %4557 = vrcp.f32 %v2888_v0  ;;  %v2886_v62 = vadd.f32 1.0, %v4548_v52  ;;  %v4085_v0 = vsel %vm3499_vm15, 1.0, %v4702_v19 }
 0x3ef   : > { %v4552_v63 = vpop.eup %4551  ;;  %2981 = vst [vmem:[%s5753_s17 + $0xd8] sm:$0xff] %v4550_v58  ;;  %v6057_v38 = vsel %vm2988_vm3, %v4550_v58, -inf  ;;  %v6063_v54 = vmul.f32 %v4550_v58, %v4082_v32  ;;  %v3468_v46 = vpop.permute.xlu0 %3467 }
 0x3f0   : > { %v4554_v55 = vpop.eup %4553  ;;  %4559 = vrcp.f32 %v2886_v62  ;;  %v2889_v53 = vadd.f32 1.0, %v4552_v63  ;;  %3075 = vmax.xlane.f32.xlu1 %v6057_v38  ;;  %3069 = vmax.xlane.f32.xlu0 %v6061_v11  ;;  %vm3500_vm1 = vcmp.eq.s32.totalorder %v5743_v15, %v3468_v46  ;;  %v4083_v62 = vsel %vm3497_vm0, 1.0, %v4702_v19 }
 0x3f1   : > { %v4556_v40 = vpop.eup %4555  ;;  %2979 = vst [vmem:[%s5753_s17 + $0xc8] sm:$0xff] %v4554_v55  ;;  %v6069_v36 = vmul.f32 %v4554_v55, %v4080_v30  ;;  %v6073_v39 = vsel %vm2988_vm3, %v4554_v55, -inf  ;;  %v4086_v55 = vsel %vm3500_vm1, 1.0, %v4702_v19 }
 0x3f2   : > { %4561 = vrcp.f32 %v2889_v53  ;;  %v2887_v34 = vadd.f32 1.0, %v4556_v40 }
 0x3f4   : > { %4563 = vrcp.f32 %v2887_v34  ;;  %3071 = vmax.xlane.f32.xlu1 %v6073_v39 }
 0x3fb   : > { %v4558_v51 = vpop.eup %4557 }
 0x3fc   : > { %2984 = vst [vmem:[%s5753_s17 + $0xf0] sm:$0xff] %v4558_v51  ;;  %v6083_v52 = vsel %vm2988_vm3, %v4558_v51, -inf  ;;  %v6085_v58 = vmul.f32 %v4558_v51, %v4085_v0 }
 0x3fd   : > { %v4560_v32 = vpop.eup %4559  ;;  %3081 = vmax.xlane.f32.xlu0 %v6083_v52 }
 0x3fe   : > { %2982 = vst [vmem:[%s5753_s17 + $0xe0] sm:$0xff] %v4560_v32  ;;  %v6091_v63 = vmul.f32 %v4560_v32, %v4083_v62  ;;  %v6101_v53 = vsel %vm2988_vm3, %v4560_v32, -inf }
 0x3ff   : > { %v4562_v5 = vpop.eup %4561 }
 0x400   : > { %2985 = vst [vmem:[%s5753_s17 + $0xf8] sm:$0xff] %v4562_v5  ;;  %v6097_v30 = vsel %vm2988_vm3, %v4562_v5, -inf  ;;  %v6103_v40 = vmul.f32 %v4562_v5, %v4086_v55 }
 0x401   : > { %v4564_v34 = vpop.eup %4563  ;;  %3083 = vmax.xlane.f32.xlu1 %v6097_v30  ;;  %3077 = vmax.xlane.f32.xlu0 %v6101_v53 }
 0x402   : > { %2983 = vst [vmem:[%s5753_s17 + $0xe8] sm:$0xff] %v4564_v34  ;;  %v6109_v13 = vmul.f32 %v4564_v34, %v4084_v33  ;;  %v6113_v46 = vsel %vm2988_vm3, %v4564_v34, -inf  ;;  %vm3693_vm3 = vcmask 7168  }
 0x405   : > { %3079 = vmax.xlane.f32.xlu1 %v6113_v46  ;;  %3617 = vadd.xlane.f32.xlu0 %v5853_v8 }
 0x409   : > { %3619 = vadd.xlane.f32.xlu1 %v5875_v17  ;;  %3621 = vadd.xlane.f32.xlu0 %v5908_v7 }
 0x40d   : > { %3623 = vadd.xlane.f32.xlu1 %v5931_v21  ;;  %3625 = vadd.xlane.f32.xlu0 %v5902_v9 }
 0x411   : > { %3627 = vadd.xlane.f32.xlu1 %v5923_v16  ;;  %3629 = vadd.xlane.f32.xlu0 %v5965_v12 }
 0x415   : > { %3631 = vadd.xlane.f32.xlu1 %v5981_v59  ;;  %3633 = vadd.xlane.f32.xlu0 %v5949_v37  ;;  %v6125_v15 = vpop.xlane.xlu1 %3025 }
 0x416   : > { %v3087_v19 = vsub.f32 %v5763_v48, %v6125_v15  ;;  %v6129_v8 = vpop.xlane.xlu0 %3601 }
 0x418   : > { %v3121_v17 = vmul.f32 1.442695, %v3087_v19 }
 0x419   : > { %3635 = vadd.xlane.f32.xlu1 %v5978_v25  ;;  %3637 = vadd.xlane.f32.xlu0 %v6009_v47  ;;  %v6133_v9 = vpop.xlane.xlu1 %3597 }
 0x41a   : > { %4565 = vpow2.f32 %v3121_v17  ;;  %v6135_v7 = vpop.xlane.xlu0 %3021 }
 0x41b   : > { %v3085_v16 = vsub.f32 %v5776_v49, %v6135_v7 }
 0x41d   : > { %v3117_v21 = vmul.f32 1.442695, %v3085_v16  ;;  %3639 = vadd.xlane.f32.xlu1 %v6029_v27  ;;  %v6140_v37 = vpop.xlane.xlu1 %3027 }
 0x41e   : > { %v3088_v48 = vsub.f32 %v5784_v3, %v6140_v37  ;;  %v6144_v12 = vpop.xlane.xlu0 %3023 }
 0x41f   : > { %4567 = vpow2.f32 %v3117_v21  ;;  %v3086_v25 = vsub.f32 %v5793_v61, %v6144_v12 }
 0x420   : > { %v3123_v59 = vmul.f32 1.442695, %v3088_v48 }
 0x421   : > { %v3119_v47 = vmul.f32 1.442695, %v3086_v25  ;;  %v6150_v49 = vpop.xlane.xlu1 %3603 }
 0x422   : > { %4569 = vpow2.f32 %v3123_v59  ;;  %v6148_v51 = vpop.xlane.xlu0 %3599 }
 0x423   : > { %4571 = vpow2.f32 %v3119_v47 }
 0x426   : > { %v6152_v27 = vpop.xlane.xlu0 %3033 }
 0x427   : > { %v4566_v0 = vpop.eup %4565  ;;  %v3091_v3 = vsub.f32 %v5805_v24, %v6152_v27 }
 0x428   : > { %3185 = vadd.xlane.f32.xlu0 %v4566_v0 }
 0x429   : > { %v3129_v32 = vmul.f32 1.442695, %v3091_v3 }
 0x42a   : > { %v6156_v62 = vpop.xlane.xlu1 %3035  ;;  %v6158_v5 = vpop.xlane.xlu0 %3609 }
 0x42b   : > { %4573 = vpow2.f32 %v3129_v32  ;;  %v3092_v61 = vsub.f32 %v5816_v60, %v6156_v62 }
 0x42c   : > { %v4568_v55 = vpop.eup %4567 }
 0x42d   : > { %v3131_v34 = vmul.f32 1.442695, %v3092_v61  ;;  %3181 = vadd.xlane.f32.xlu0 %v4568_v55 }
 0x42e   : > { %v6162_v33 = vpop.xlane.xlu1 %3611  ;;  %v6164_v19 = vpop.xlane.xlu0 %3029 }
 0x42f   : > { %v4570_v17 = vpop.eup %4569  ;;  %4575 = vpow2.f32 %v3131_v34  ;;  %v3089_v24 = vsub.f32 %v5831_v42, %v6164_v19 }
 0x430   : > { %3187 = vadd.xlane.f32.xlu1 %v4570_v17  ;;  %v4572_v25 = vpop.eup %4571 }
 0x431   : > { %v3125_v16 = vmul.f32 1.442695, %v3089_v24 }
 0x432   : > { %v6168_v21 = vpop.xlane.xlu1 %3031  ;;  %v6170_v48 = vpop.xlane.xlu0 %3605 }
 0x433   : > { %4577 = vpow2.f32 %v3125_v16  ;;  %v3090_v60 = vsub.f32 %v5839_v50, %v6168_v21 }
 0x434   : > { %3183 = vadd.xlane.f32.xlu1 %v4572_v25 }
 0x435   : > { %v3127_v59 = vmul.f32 1.442695, %v3090_v60 }
 0x436   : > { %v6174_v47 = vpop.xlane.xlu1 %3607  ;;  %v6176_v0 = vpop.xlane.xlu0 %3041 }
 0x437   : > { %4579 = vpow2.f32 %v3127_v59  ;;  %v3095_v42 = vsub.f32 %v5851_v56, %v6176_v0 }
 0x438   : > { %v4574_v3 = vpop.eup %4573 }
 0x439   : > { %v3137_v32 = vmul.f32 1.442695, %v3095_v42  ;;  %3193 = vadd.xlane.f32.xlu0 %v4574_v3 }
 0x43a   : > { %v6180_v61 = vpop.xlane.xlu1 %3043  ;;  %v6182_v55 = vpop.xlane.xlu0 %3037 }
 0x43b   : > { %4581 = vpow2.f32 %v3137_v32  ;;  %v3096_v50 = vsub.f32 %v5869_v2, %v6180_v61  ;;  %v3093_v34 = vsub.f32 %v5873_v26, %v6182_v55 }
 0x43c   : > { %v4576_v17 = vpop.eup %4575 }
 0x43d   : > { %v3139_v24 = vmul.f32 1.442695, %v3096_v50  ;;  %v3133_v16 = vmul.f32 1.442695, %v3093_v34  ;;  %3195 = vadd.xlane.f32.xlu1 %v4576_v17 }
 0x43e   : > { %v6188_v25 = vpop.xlane.xlu1 %3039  ;;  %v6192_v42 = vpop.xlane.xlu0 %3613 }
 0x43f   : > { %4583 = vpow2.f32 %v3139_v24  ;;  %v3094_v56 = vsub.f32 %v5884_v4, %v6188_v25 }
 0x440   : > { %v4578_v60 = vpop.eup %4577  ;;  %4585 = vpow2.f32 %v3133_v16 }
 0x441   : > { %v3135_v59 = vmul.f32 1.442695, %v3094_v56  ;;  %3189 = vadd.xlane.f32.xlu0 %v4578_v60 }
 0x442   : > { %v6194_v26 = vpop.xlane.xlu1 %3615 }
 0x443   : > { %4587 = vpow2.f32 %v3135_v59 }
 0x444   : > { %v4580_v2 = vpop.eup %4579 }
 0x445   : > { %3191 = vadd.xlane.f32.xlu1 %v4580_v2 }
 0x446   : > { %v6196_v3 = vpop.xlane.xlu0 %3049 }
 0x447   : > { %v3099_v32 = vsub.f32 %v5897_v35, %v6196_v3 }
 0x448   : > { %v4582_v50 = vpop.eup %4581 }
 0x449   : > { %v3145_v34 = vmul.f32 1.442695, %v3099_v32  ;;  %3201 = vadd.xlane.f32.xlu0 %v4582_v50 }
 0x44a   : > { %v6200_v4 = vpop.xlane.xlu1 %3051  ;;  %v6202_v17 = vpop.xlane.xlu0 %3045 }
 0x44b   : > { %4589 = vpow2.f32 %v3145_v34  ;;  %v3100_v24 = vsub.f32 %v5917_v23, %v6200_v4  ;;  %v3097_v16 = vsub.f32 %v5921_v1, %v6202_v17 }
 0x44c   : > { %v4584_v56 = vpop.eup %4583 }
 0x44d   : > { %v4586_v60 = vpop.eup %4585  ;;  %v3147_v59 = vmul.f32 1.442695, %v3100_v24  ;;  %v3141_v2 = vmul.f32 1.442695, %v3097_v16  ;;  %3203 = vadd.xlane.f32.xlu1 %v4584_v56 }
 0x44e   : > { %v6208_v35 = vpop.xlane.xlu1 %3047  ;;  %3197 = vadd.xlane.f32.xlu0 %v4586_v60 }
 0x44f   : > { %4591 = vpow2.f32 %v3147_v59  ;;  %v3098_v32 = vsub.f32 %v5935_v29, %v6208_v35 }
 0x450   : > { %v4588_v50 = vpop.eup %4587  ;;  %4593 = vpow2.f32 %v3141_v2 }
 0x451   : > { %v3143_v34 = vmul.f32 1.442695, %v3098_v32  ;;  %3199 = vadd.xlane.f32.xlu1 %v4588_v50 }
 0x453   : > { %4595 = vpow2.f32 %v3143_v34 }
 0x455   : > { %v6212_v23 = vpop.xlane.xlu0 %3057 }
 0x456   : > { %v3103_v1 = vsub.f32 %v5947_v43, %v6212_v23 }
 0x458   : > { %v4590_v24 = vpop.eup %4589  ;;  %v3153_v16 = vmul.f32 1.442695, %v3103_v1 }
 0x459   : > { %3209 = vadd.xlane.f32.xlu0 %v4590_v24  ;;  %v6216_v56 = vpop.xlane.xlu1 %3059  ;;  %v6218_v60 = vpop.xlane.xlu0 %3053 }
 0x45a   : > { %4597 = vpow2.f32 %v3153_v16  ;;  %v3104_v29 = vsub.f32 %v5971_v45, %v6216_v56  ;;  %v3101_v59 = vsub.f32 %v5963_v41, %v6218_v60 }
 0x45c   : > { %v4592_v2 = vpop.eup %4591  ;;  %v3155_v32 = vmul.f32 1.442695, %v3104_v29  ;;  %v3149_v50 = vmul.f32 1.442695, %v3101_v59 }
 0x45d   : > { %v4594_v34 = vpop.eup %4593  ;;  %3211 = vadd.xlane.f32.xlu1 %v4592_v2  ;;  %v6224_v43 = vpop.xlane.xlu1 %3055 }
 0x45e   : > { %4599 = vpow2.f32 %v3155_v32  ;;  %3205 = vadd.xlane.f32.xlu0 %v4594_v34  ;;  %v3102_v1 = vsub.f32 %v5985_v28, %v6224_v43 }
 0x45f   : > { %4601 = vpow2.f32 %v3149_v50 }
 0x460   : > { %v4596_v24 = vpop.eup %4595  ;;  %v3151_v16 = vmul.f32 1.442695, %v3102_v1 }
 0x461   : > { %3207 = vadd.xlane.f32.xlu1 %v4596_v24 }
 0x462   : > { %4603 = vpow2.f32 %v3151_v16 }
 0x466   : > { %v6228_v45 = vpop.xlane.xlu0 %3065 }
 0x467   : > { %v4598_v41 = vpop.eup %4597  ;;  %v3107_v29 = vsub.f32 %v5997_v18, %v6228_v45 }
 0x468   : > { %3217 = vadd.xlane.f32.xlu0 %v4598_v41 }
 0x469   : > { %v3161_v59 = vmul.f32 1.442695, %v3107_v29 }
 0x46a   : > { %v6232_v2 = vpop.xlane.xlu1 %3067  ;;  %v6234_v32 = vpop.xlane.xlu0 %3061 }
 0x46b   : > { %v4600_v34 = vpop.eup %4599  ;;  %4605 = vpow2.f32 %v3161_v59  ;;  %v3108_v28 = vsub.f32 %v6015_v22, %v6232_v2  ;;  %v3105_v50 = vsub.f32 %v6019_v31, %v6234_v32 }
 0x46c   : > { %v4602_v1 = vpop.eup %4601  ;;  %3219 = vadd.xlane.f32.xlu1 %v4600_v34 }
 0x46d   : > { %v3163_v24 = vmul.f32 1.442695, %v3108_v28  ;;  %v3157_v16 = vmul.f32 1.442695, %v3105_v50  ;;  %3213 = vadd.xlane.f32.xlu0 %v4602_v1 }
 0x46e   : > { %v6240_v18 = vpop.xlane.xlu1 %3063 }
 0x46f   : > { %v4604_v41 = vpop.eup %4603  ;;  %4607 = vpow2.f32 %v3163_v24  ;;  %v3106_v29 = vsub.f32 %v6033_v14, %v6240_v18 }
 0x470   : > { %4609 = vpow2.f32 %v3157_v16  ;;  %3215 = vadd.xlane.f32.xlu1 %v4604_v41 }
 0x471   : > { %v3159_v59 = vmul.f32 1.442695, %v3106_v29 }
 0x473   : > { %4611 = vpow2.f32 %v3159_v59 }
 0x475   : > { %v6244_v22 = vpop.xlane.xlu0 %3073 }
 0x476   : > { %v3111_v31 = vsub.f32 %v6043_v10, %v6244_v22 }
 0x478   : > { %v4606_v34 = vpop.eup %4605  ;;  %v3169_v28 = vmul.f32 1.442695, %v3111_v31 }
 0x479   : > { %3225 = vadd.xlane.f32.xlu0 %v4606_v34  ;;  %v6248_v50 = vpop.xlane.xlu1 %3075  ;;  %v6250_v1 = vpop.xlane.xlu0 %3069 }
 0x47a   : > { %4613 = vpow2.f32 %v3169_v28  ;;  %v3112_v14 = vsub.f32 %v6057_v38, %v6248_v50  ;;  %v3109_v24 = vsub.f32 %v6061_v11, %v6250_v1 }
 0x47c   : > { %v4608_v16 = vpop.eup %4607  ;;  %v3171_v41 = vmul.f32 1.442695, %v3112_v14  ;;  %v3165_v29 = vmul.f32 1.442695, %v3109_v24 }
 0x47d   : > { %v4610_v59 = vpop.eup %4609  ;;  %3227 = vadd.xlane.f32.xlu1 %v4608_v16  ;;  %v6256_v10 = vpop.xlane.xlu1 %3071 }
 0x47e   : > { %4615 = vpow2.f32 %v3171_v41  ;;  %3221 = vadd.xlane.f32.xlu0 %v4610_v59  ;;  %v3110_v31 = vsub.f32 %v6073_v39, %v6256_v10 }
 0x47f   : > { %4617 = vpow2.f32 %v3165_v29 }
 0x480   : > { %v4612_v34 = vpop.eup %4611  ;;  %v3167_v28 = vmul.f32 1.442695, %v3110_v31 }
 0x481   : > { %3223 = vadd.xlane.f32.xlu1 %v4612_v34 }
 0x482   : > { %4619 = vpow2.f32 %v3167_v28 }
 0x486   : > { %v6260_v38 = vpop.xlane.xlu0 %3081 }
 0x487   : > { %6452 = vst [vmem:[#allocation2_spill] sm:$0xff] %v6260_v38  ;;  %v4614_v11 = vpop.eup %4613  ;;  %v3115_v14 = vsub.f32 %v6083_v52, %v6260_v38 }
 0x488   : > { %3233 = vadd.xlane.f32.xlu0 %v4614_v11 }
 0x489   : > { %v3177_v24 = vmul.f32 1.442695, %v3115_v14 }
 0x48a   : > { %v6264_v16 = vpop.xlane.xlu1 %3083  ;;  %v6266_v41 = vpop.xlane.xlu0 %3077 }
 0x48b   : > { %6453 = vst [vmem:[#allocation3_spill] sm:$0xff] %v6264_v16  ;;  %v4616_v59 = vpop.eup %4615  ;;  %4621 = vpow2.f32 %v3177_v24  ;;  %v3116_v39 = vsub.f32 %v6097_v30, %v6264_v16  ;;  %v3113_v29 = vsub.f32 %v6101_v53, %v6266_v41 }
 0x48c   : > { %v4618_v31 = vpop.eup %4617  ;;  %3235 = vadd.xlane.f32.xlu1 %v4616_v59 }
 0x48d   : > { %v3179_v34 = vmul.f32 1.442695, %v3116_v39  ;;  %v3173_v28 = vmul.f32 1.442695, %v3113_v29  ;;  %3229 = vadd.xlane.f32.xlu0 %v4618_v31 }
 0x48e   : > { %v6272_v52 = vpop.xlane.xlu1 %3079  ;;  %v6276_v38 = vpop.xlane.xlu0 %3617 }
 0x48f   : > { %v4620_v11 = vpop.eup %4619  ;;  %4623 = vpow2.f32 %v3179_v34  ;;  %v3114_v14 = vsub.f32 %v6113_v46, %v6272_v52 }
 0x490   : > { %4625 = vpow2.f32 %v3173_v28  ;;  %3231 = vadd.xlane.f32.xlu1 %v4620_v11 }
 0x491   : > { %v3175_v30 = vmul.f32 1.442695, %v3114_v14 }
 0x492   : > { %v6278_v24 = vpop.xlane.xlu0 %3621  ;;  %v6280_v53 = vpop.xlane.xlu1 %3619 }
 0x493   : > { %4627 = vpow2.f32 %v3175_v30 }
 0x496   : > { %v6282_v39 = vpop.xlane.xlu0 %3625  ;;  %v6284_v34 = vpop.xlane.xlu1 %3623 }
 0x498   : > { %v4622_v59 = vpop.eup %4621 }
 0x499   : > { %3241 = vadd.xlane.f32.xlu0 %v4622_v59 }
 0x49a   : > { %v6286_v16 = vpop.xlane.xlu0 %3629  ;;  %v6289_v28 = vpop.xlane.xlu1 %3627 }
 0x49c   : > { %v4624_v29 = vpop.eup %4623 }
 0x49d   : > { %v4626_v31 = vpop.eup %4625  ;;  %3243 = vadd.xlane.f32.xlu1 %v4624_v29 }
 0x49e   : > { %3237 = vadd.xlane.f32.xlu0 %v4626_v31  ;;  %v6293_v11 = vpop.xlane.xlu0 %3633  ;;  %v6295_v14 = vpop.xlane.xlu1 %3631 }
 0x4a0   : > { %v4628_v46 = vpop.eup %4627 }
 0x4a1   : > { %3239 = vadd.xlane.f32.xlu1 %v4628_v46 }
 0x4a2   : > { %3641 = vadd.xlane.f32.xlu0 %v6000_v44  ;;  %v6299_v30 = vpop.xlane.xlu0 %3637  ;;  %v6303_v44 = vpop.xlane.xlu1 %3635 }
 0x4a5   : > { %3643 = vadd.xlane.f32.xlu1 %v6021_v20 }
 0x4a6   : > { %3645 = vadd.xlane.f32.xlu0 %v6051_v6  ;;  %v6307_v6 = vpop.xlane.xlu1 %3639 }
 0x4a9   : > { %3647 = vadd.xlane.f32.xlu1 %v6069_v36 }
 0x4aa   : > { %3649 = vadd.xlane.f32.xlu0 %v6045_v57 }
 0x4ad   : > { %3651 = vadd.xlane.f32.xlu1 %v6063_v54 }
 0x4ae   : > { %3653 = vadd.xlane.f32.xlu0 %v6091_v63 }
 0x4b1   : > { %3655 = vadd.xlane.f32.xlu1 %v6109_v13  ;;  %v3186_v20 = vpop.xlane.xlu0 %3185 }
 0x4b2   : > { %3657 = vadd.xlane.f32.xlu0 %v6085_v58  ;;  %4629 = vlog2.f32 %v3186_v20 }
 0x4b5   : > { %3659 = vadd.xlane.f32.xlu1 %v6103_v40 }
 0x4b6   : > { %v3182_v57 = vpop.xlane.xlu0 %3181 }
 0x4b7   : > { %4631 = vlog2.f32 %v3182_v57 }
 0x4b9   : > { %v3188_v36 = vpop.xlane.xlu1 %3187 }
 0x4ba   : > { %4633 = vlog2.f32 %v3188_v36 }
 0x4bd   : > { %v3184_v54 = vpop.xlane.xlu1 %3183 }
 0x4be   : > { %4635 = vlog2.f32 %v3184_v54 }
 0x4bf   : > { %v4630_v63 = vpop.eup %4629 }
 0x4c0   : > { %v3250_v59 = vmul.f32 0.6931472, %v4630_v63 }
 0x4c2   : > { %v3311_v29 = vadd.f32 %v3250_v59, %v6125_v15  ;;  %v3194_v13 = vpop.xlane.xlu0 %3193 }
 0x4c3   : > { %4637 = vlog2.f32 %v3194_v13 }
 0x4c4   : > { %v4632_v58 = vpop.eup %4631  ;;  %v3663_v40 = vsub.f32 %v3311_v29, %v6129_v8 }
 0x4c5   : > { %v3246_v31 = vmul.f32 0.6931472, %v4632_v58 }
 0x4c6   : > { %3696 = vst.msk [vmem:[%s6315_s22 + $0x10] sm:$0xff] %vm3693_vm3, %v3663_v40  ;;  %v3196_v46 = vpop.xlane.xlu1 %3195 }
 0x4c7   : > { %v4634_v20 = vpop.eup %4633  ;;  %v3309_v15 = vadd.f32 %v3246_v31, %v6135_v7  ;;  %4639 = vlog2.f32 %v3196_v46 }
 0x4c8   : > { %v3252_v57 = vmul.f32 0.6931472, %v4634_v20 }
 0x4c9   : > { %v3661_v36 = vsub.f32 %v3309_v15, %v6133_v9 }
 0x4ca   : > { %v3312_v54 = vadd.f32 %v3252_v57, %v6140_v37  ;;  %v3190_v63 = vpop.xlane.xlu0 %3189 }
 0x4cb   : > { %v4636_v59 = vpop.eup %4635  ;;  %3694 = vst.msk [vmem:[%s6315_s22] sm:$0xff] %vm3693_vm3, %v3661_v36  ;;  %4641 = vlog2.f32 %v3190_v63 }
 0x4cc   : > { %v3664_v8 = vsub.f32 %v3312_v54, %v6150_v49  ;;  %v3248_v29 = vmul.f32 0.6931472, %v4636_v59 }
 0x4ce   : > { %3697 = vst.msk [vmem:[%s6315_s22 + $0x18] sm:$0xff] %vm3693_vm3, %v3664_v8  ;;  %v3310_v7 = vadd.f32 %v3248_v29, %v6144_v12  ;;  %v3192_v13 = vpop.xlane.xlu1 %3191 }
 0x4cf   : > { %4643 = vlog2.f32 %v3192_v13 }
 0x4d0   : > { %v4638_v58 = vpop.eup %4637  ;;  %v3662_v9 = vsub.f32 %v3310_v7, %v6148_v51 }
 0x4d1   : > { %v3258_v40 = vmul.f32 0.6931472, %v4638_v58 }
 0x4d2   : > { %3695 = vst.msk [vmem:[%s6315_s22 + $0x8] sm:$0xff] %vm3693_vm3, %v3662_v9  ;;  %v3202_v37 = vpop.xlane.xlu0 %3201 }
 0x4d3   : > { %v3315_v31 = vadd.f32 %v3258_v40, %v6152_v27  ;;  %4645 = vlog2.f32 %v3202_v37 }
 0x4d4   : > { %v4640_v49 = vpop.eup %4639 }
 0x4d5   : > { %v3667_v46 = vsub.f32 %v3315_v31, %v6158_v5  ;;  %v3260_v20 = vmul.f32 0.6931472, %v4640_v49 }
 0x4d6   : > { %v3204_v15 = vpop.xlane.xlu1 %3203 }
 0x4d7   : > { %3700 = vst.msk [vmem:[%s6315_s22 + $0x30] sm:$0xff] %vm3693_vm3, %v3667_v46  ;;  %v3316_v12 = vadd.f32 %v3260_v20, %v6156_v62  ;;  %4647 = vlog2.f32 %v3204_v15  ;;  %v3198_v51 = vpop.xlane.xlu0 %3197 }
 0x4d8   : > { %v4642_v57 = vpop.eup %4641  ;;  %4649 = vlog2.f32 %v3198_v51 }
 0x4d9   : > { %v3668_v36 = vsub.f32 %v3316_v12, %v6162_v33  ;;  %v3254_v54 = vmul.f32 0.6931472, %v4642_v57 }
 0x4da   : > { %v3200_v27 = vpop.xlane.xlu1 %3199 }
 0x4db   : > { %3701 = vst.msk [vmem:[%s6315_s22 + $0x38] sm:$0xff] %vm3693_vm3, %v3668_v36  ;;  %v3313_v5 = vadd.f32 %v3254_v54, %v6164_v19  ;;  %4651 = vlog2.f32 %v3200_v27 }
 0x4dc   : > { %v4644_v63 = vpop.eup %4643 }
 0x4dd   : > { %v3665_v59 = vsub.f32 %v3313_v5, %v6170_v48  ;;  %v3256_v8 = vmul.f32 0.6931472, %v4644_v63 }
 0x4df   : > { %3698 = vst.msk [vmem:[%s6315_s22 + $0x20] sm:$0xff] %vm3693_vm3, %v3665_v59  ;;  %v3314_v62 = vadd.f32 %v3256_v8, %v6168_v21 }
 0x4e0   : > { %v4646_v29 = vpop.eup %4645 }
 0x4e1   : > { %v3666_v7 = vsub.f32 %v3314_v62, %v6174_v47  ;;  %v3266_v33 = vmul.f32 0.6931472, %v4646_v29 }
 0x4e2   : > { %v3210_v13 = vpop.xlane.xlu0 %3209 }
 0x4e3   : > { %3699 = vst.msk [vmem:[%s6315_s22 + $0x28] sm:$0xff] %vm3693_vm3, %v3666_v7  ;;  %v3319_v58 = vadd.f32 %v3266_v33, %v6176_v0  ;;  %4653 = vlog2.f32 %v3210_v13 }
 0x4e4   : > { %v4648_v19 = vpop.eup %4647 }
 0x4e5   : > { %v4650_v9 = vpop.eup %4649  ;;  %v3671_v48 = vsub.f32 %v3319_v58, %v6276_v38  ;;  %v3268_v40 = vmul.f32 0.6931472, %v4648_v19 }
 0x4e6   : > { %v3262_v37 = vmul.f32 0.6931472, %v4650_v9  ;;  %v3212_v31 = vpop.xlane.xlu1 %3211 }
 0x4e7   : > { %3704 = vst.msk [vmem:[%s6315_s22 + $0x50] sm:$0xff] %vm3693_vm3, %v3671_v48  ;;  %v3320_v21 = vadd.f32 %v3268_v40, %v6180_v61  ;;  %4655 = vlog2.f32 %v3212_v31  ;;  %v3206_v47 = vpop.xlane.xlu0 %3205 }
 0x4e8   : > { %v4652_v49 = vpop.eup %4651  ;;  %v3317_v0 = vadd.f32 %v3262_v37, %v6182_v55  ;;  %4657 = vlog2.f32 %v3206_v47 }
 0x4e9   : > { %v3672_v46 = vsub.f32 %v3320_v21, %v6280_v53  ;;  %v3264_v20 = vmul.f32 0.6931472, %v4652_v49 }
 0x4ea   : > { %v3669_v38 = vsub.f32 %v3317_v0, %v6192_v42  ;;  %v3208_v15 = vpop.xlane.xlu1 %3207 }
 0x4eb   : > { %3705 = vst.msk [vmem:[%s6315_s22 + $0x58] sm:$0xff] %vm3693_vm3, %v3672_v46  ;;  %v3318_v12 = vadd.f32 %v3264_v20, %v6188_v25  ;;  %4659 = vlog2.f32 %v3208_v15 }
 0x4ec   : > { %3702 = vst.msk [vmem:[%s6315_s22 + $0x40] sm:$0xff] %vm3693_vm3, %v3669_v38 }
 0x4ed   : > { %v3670_v61 = vsub.f32 %v3318_v12, %v6194_v26 }
 0x4ef   : > { %3703 = vst.msk [vmem:[%s6315_s22 + $0x48] sm:$0xff] %vm3693_vm3, %v3670_v61 }
 0x4f0   : > { %v4654_v55 = vpop.eup %4653 }
 0x4f1   : > { %v3274_v51 = vmul.f32 0.6931472, %v4654_v55  ;;  %v3218_v57 = vpop.xlane.xlu0 %3217 }
 0x4f2   : > { %4661 = vlog2.f32 %v3218_v57 }
 0x4f3   : > { %v3323_v53 = vadd.f32 %v3274_v51, %v6196_v3 }
 0x4f4   : > { %v4656_v42 = vpop.eup %4655 }
 0x4f5   : > { %v4658_v36 = vpop.eup %4657  ;;  %v3675_v54 = vsub.f32 %v3323_v53, %v6282_v39  ;;  %v3276_v25 = vmul.f32 0.6931472, %v4656_v42  ;;  %v3220_v27 = vpop.xlane.xlu1 %3219 }
 0x4f6   : > { %v3270_v5 = vmul.f32 0.6931472, %v4658_v36  ;;  %4663 = vlog2.f32 %v3220_v27  ;;  %v3214_v63 = vpop.xlane.xlu0 %3213 }
 0x4f7   : > { %3708 = vst.msk [vmem:[%s6315_s22 + $0x70] sm:$0xff] %vm3693_vm3, %v3675_v54  ;;  %v3324_v26 = vadd.f32 %v3276_v25, %v6200_v4  ;;  %4665 = vlog2.f32 %v3214_v63 }
 0x4f8   : > { %v4660_v59 = vpop.eup %4659  ;;  %v3321_v3 = vadd.f32 %v3270_v5, %v6202_v17 }
 0x4f9   : > { %v3676_v8 = vsub.f32 %v3324_v26, %v6289_v28  ;;  %v3272_v62 = vmul.f32 0.6931472, %v4660_v59  ;;  %v3216_v39 = vpop.xlane.xlu1 %3215 }
 0x4fa   : > { %v3673_v29 = vsub.f32 %v3321_v3, %v6278_v24  ;;  %4667 = vlog2.f32 %v3216_v39 }
 0x4fb   : > { %3709 = vst.msk [vmem:[%s6315_s22 + $0x78] sm:$0xff] %vm3693_vm3, %v3676_v8  ;;  %v3322_v7 = vadd.f32 %v3272_v62, %v6208_v35 }
 0x4fc   : > { %3706 = vst.msk [vmem:[%s6315_s22 + $0x60] sm:$0xff] %vm3693_vm3, %v3673_v29 }
 0x4fd   : > { %v3674_v4 = vsub.f32 %v3322_v7, %v6284_v34 }
 0x4ff   : > { %v4662_v33 = vpop.eup %4661  ;;  %3707 = vst.msk [vmem:[%s6315_s22 + $0x68] sm:$0xff] %vm3693_vm3, %v3674_v4 }
 0x500   : > { %v3282_v17 = vmul.f32 0.6931472, %v4662_v33 }
 0x502   : > { %v3327_v28 = vadd.f32 %v3282_v17, %v6212_v23  ;;  %v3226_v13 = vpop.xlane.xlu0 %3225 }
 0x503   : > { %v4664_v58 = vpop.eup %4663 }
 0x504   : > { %v4666_v24 = vpop.eup %4665  ;;  %v3679_v19 = vsub.f32 %v3327_v28, %v6293_v11  ;;  %v3284_v9 = vmul.f32 0.6931472, %v4664_v58 }
 0x505   : > { %v3278_v48 = vmul.f32 0.6931472, %v4666_v24 }
 0x506   : > { %3712 = vst.msk [vmem:[%s6315_s22 + $0x90] sm:$0xff] %vm3693_vm3, %v3679_v19  ;;  %v3328_v35 = vadd.f32 %v3284_v9, %v6216_v56  ;;  %v3228_v34 = vpop.xlane.xlu1 %3227 }
 0x507   : > { %v4668_v40 = vpop.eup %4667  ;;  %v3325_v37 = vadd.f32 %v3278_v48, %v6218_v60  ;;  %v3222_v31 = vpop.xlane.xlu0 %3221 }
 0x508   : > { %v3680_v23 = vsub.f32 %v3328_v35, %v6303_v44  ;;  %v3280_v21 = vmul.f32 0.6931472, %v4668_v40  ;;  %4669 = vlog2.f32 %v3222_v31 }
 0x509   : > { %v3677_v47 = vsub.f32 %v3325_v37, %v6286_v16 }
 0x50a   : > { %3713 = vst.msk [vmem:[%s6315_s22 + $0x98] sm:$0xff] %vm3693_vm3, %v3680_v23  ;;  %v3326_v11 = vadd.f32 %v3280_v21, %v6224_v43  ;;  %v3224_v49 = vpop.xlane.xlu1 %3223 }
 0x50b   : > { %3710 = vst.msk [vmem:[%s6315_s22 + $0x80] sm:$0xff] %vm3693_vm3, %v3677_v47  ;;  %4671 = vlog2.f32 %v3224_v49  ;;  %v6454_v47 = vld [vmem:[#allocation2_spill] sm:$0xff] }
 0x50c   : > { %v3678_v56 = vsub.f32 %v3326_v11, %v6295_v14  ;;  %4673 = vlog2.f32 %v3226_v13 }
 0x50d   : > { %4675 = vlog2.f32 %v3228_v34 }
 0x50e   : > { %3711 = vst.msk [vmem:[%s6315_s22 + $0x88] sm:$0xff] %vm3693_vm3, %v3678_v56 }
 0x511   : > { %v3234_v60 = vpop.xlane.xlu0 %3233 }
 0x515   : > { %v4670_v0 = vpop.eup %4669  ;;  %v3236_v44 = vpop.xlane.xlu1 %3235 }
 0x516   : > { %v3286_v46 = vmul.f32 0.6931472, %v4670_v0  ;;  %v3230_v16 = vpop.xlane.xlu0 %3229 }
 0x517   : > { %4677 = vlog2.f32 %v3230_v16 }
 0x518   : > { %v4672_v20 = vpop.eup %4671  ;;  %v3329_v38 = vadd.f32 %v3286_v46, %v6234_v32 }
 0x519   : > { %v3288_v43 = vmul.f32 0.6931472, %v4672_v20  ;;  %v3232_v12 = vpop.xlane.xlu1 %3231  ;;  %v4674_v51 = vpop.eup %4673 }
 0x51a   : > { %v3681_v15 = vsub.f32 %v3329_v38, %v6299_v30  ;;  %4679 = vlog2.f32 %v3232_v12  ;;  %v4676_v32 = vpop.eup %4675  ;;  %v3290_v57 = vmul.f32 0.6931472, %v4674_v51 }
 0x51b   : > { %v3330_v14 = vadd.f32 %v3288_v43, %v6240_v18  ;;  %4681 = vlog2.f32 %v3234_v60  ;;  %v3292_v18 = vmul.f32 0.6931472, %v4676_v32 }
 0x51c   : > { %3714 = vst.msk [vmem:[%s6315_s22 + $0xa0] sm:$0xff] %vm3693_vm3, %v3681_v15  ;;  %4683 = vlog2.f32 %v3236_v44  ;;  %v3331_v25 = vadd.f32 %v3290_v57, %v6228_v45  ;;  %v6455_v44 = vld [vmem:[#allocation3_spill] sm:$0xff] }
 0x51d   : > { %v3682_v61 = vsub.f32 %v3330_v14, %v6307_v6  ;;  %v3332_v59 = vadd.f32 %v3292_v18, %v6232_v2 }
 0x51f   : > { %3715 = vst.msk [vmem:[%s6315_s22 + $0xa8] sm:$0xff] %vm3693_vm3, %v3682_v61 }
 0x522   : > { %v3242_v55 = vpop.xlane.xlu0 %3241 }
 0x523   : > { %4685 = vlog2.f32 %v3242_v55 }
 0x524   : > { %v4678_v30 = vpop.eup %4677 }
 0x525   : > { %v3294_v54 = vmul.f32 0.6931472, %v4678_v30 }
 0x526   : > { %v3244_v53 = vpop.xlane.xlu1 %3243 }
 0x527   : > { %v3238_v42 = vpop.xlane.xlu0 %3237  ;;  %v4680_v36 = vpop.eup %4679  ;;  %v3333_v39 = vadd.f32 %v3294_v54, %v6250_v1 }
 0x528   : > { %4687 = vlog2.f32 %v3238_v42  ;;  %v4682_v27 = vpop.eup %4681  ;;  %v3296_v26 = vmul.f32 0.6931472, %v4680_v36 }
 0x529   : > { %4689 = vlog2.f32 %v3244_v53  ;;  %v4684_v3 = vpop.eup %4683  ;;  %v3298_v8 = vmul.f32 0.6931472, %v4682_v27 }
 0x52a   : > { %v3240_v6 = vpop.xlane.xlu1 %3239  ;;  %v3300_v4 = vmul.f32 0.6931472, %v4684_v3  ;;  %v3334_v33 = vadd.f32 %v3296_v26, %v6256_v10 }
 0x52b   : > { %4691 = vlog2.f32 %v3240_v6  ;;  %v3642_v5 = vpop.xlane.xlu0 %3641  ;;  %v3335_v17 = vadd.f32 %v3298_v8, %v6244_v22 }
 0x52c   : > { %v3683_v63 = vsub.f32 %v3331_v25, %v3642_v5  ;;  %v3336_v19 = vadd.f32 %v3300_v4, %v6248_v50 }
 0x52e   : > { %3716 = vst.msk [vmem:[%s6315_s22 + $0xb0] sm:$0xff] %vm3693_vm3, %v3683_v63  ;;  %v3644_v62 = vpop.xlane.xlu1 %3643 }
 0x52f   : > { %v3684_v29 = vsub.f32 %v3332_v59, %v3644_v62  ;;  %v3646_v7 = vpop.xlane.xlu0 %3645 }
 0x530   : > { %v3685_v45 = vsub.f32 %v3333_v39, %v3646_v7  ;;  %v4686_v28 = vpop.eup %4685 }
 0x531   : > { %3717 = vst.msk [vmem:[%s6315_s22 + $0xb8] sm:$0xff] %vm3693_vm3, %v3684_v29  ;;  %v3306_v48 = vmul.f32 0.6931472, %v4686_v28 }
 0x532   : > { %3718 = vst.msk [vmem:[%s6315_s22 + $0xc0] sm:$0xff] %vm3693_vm3, %v3685_v45  ;;  %v3648_v2 = vpop.xlane.xlu1 %3647 }
 0x533   : > { %v3686_v13 = vsub.f32 %v3334_v33, %v3648_v2  ;;  %v3650_v58 = vpop.xlane.xlu0 %3649  ;;  %v3339_v11 = vadd.f32 %v3306_v48, %v6454_v47 }
 0x534   : > { %v3687_v24 = vsub.f32 %v3335_v17, %v3650_v58 }
 0x535   : > { %v4688_v1 = vpop.eup %4687  ;;  %3719 = vst.msk [vmem:[%s6315_s22 + $0xc8] sm:$0xff] %vm3693_vm3, %v3686_v13 }
 0x536   : > { %v4690_v9 = vpop.eup %4689  ;;  %v3302_v35 = vmul.f32 0.6931472, %v4688_v1  ;;  %3720 = vst.msk [vmem:[%s6315_s22 + $0xd0] sm:$0xff] %vm3693_vm3, %v3687_v24  ;;  %v3652_v10 = vpop.xlane.xlu1 %3651 }
 0x537   : > { %v3688_v34 = vsub.f32 %v3336_v19, %v3652_v10  ;;  %v3654_v22 = vpop.xlane.xlu0 %3653  ;;  %v3308_v31 = vmul.f32 0.6931472, %v4690_v9 }
 0x538   : > { %v4692_v40 = vpop.eup %4691  ;;  %v3337_v37 = vadd.f32 %v3302_v35, %v6266_v41 }
 0x539   : > { %v3304_v23 = vmul.f32 0.6931472, %v4692_v40  ;;  %3721 = vst.msk [vmem:[%s6315_s22 + $0xd8] sm:$0xff] %vm3693_vm3, %v3688_v34  ;;  %v3340_v46 = vadd.f32 %v3308_v31, %v6455_v44 }
 0x53a   : > { %v3689_v50 = vsub.f32 %v3337_v37, %v3654_v22  ;;  %v3656_v21 = vpop.xlane.xlu1 %3655 }
 0x53b   : > { %v3338_v49 = vadd.f32 %v3304_v23, %v6272_v52  ;;  %v3658_v56 = vpop.xlane.xlu0 %3657 }
 0x53c   : > { %3722 = vst.msk [vmem:[%s6315_s22 + $0xe0] sm:$0xff] %vm3693_vm3, %v3689_v50  ;;  %v3691_v60 = vsub.f32 %v3339_v11, %v3658_v56 }
 0x53d   : > { %v3690_v0 = vsub.f32 %v3338_v49, %v3656_v21 }
 0x53e   : > { %3724 = vst.msk [vmem:[%s6315_s22 + $0xf0] sm:$0xff] %vm3693_vm3, %v3691_v60  ;;  %v3660_v41 = vpop.xlane.xlu1 %3659 }
 0x53f   : > { %3723 = vst.msk [vmem:[%s6315_s22 + $0xe8] sm:$0xff] %vm3693_vm3, %v3690_v0  ;;  %v3692_v16 = vsub.f32 %v3340_v46, %v3660_v41 }
 0x541   : > { %3725 = vst.msk [vmem:[%s6315_s22 + $0xf8] sm:$0xff] %vm3693_vm3, %v3692_v16 }
 0x542 PF: > { %s23_s21 = sadd.s32 1, %s4699_s21  }
 0x543   : > { %p20_p4 = scmp.ge.s32.totalorder %s23_s21, 4  }
 0x545   :  { %22 = sbr.rel (!%p20_p4) target bundleno = 1 (0x1), region = 117 }

</bundles_post_ra>
